<compile_context>
chip_gen: v7x
topology: tpu7x:2x2x1
jax: 0.10.0
libtpu: 0.0.40
codegen_flags: <defaults>
</compile_context>

<pallas_src>
import math
from functools import partial

import jax
import jax.numpy as jnp
from jax import lax
from jax.experimental import pallas as pl
from jax.experimental.pallas import tpu as pltpu

BN_EPS = 1e-5
CHUNK = 512  # in-kernel batch sub-chunk (rows per fori_loop iteration)


def _round_up(n, m):
    return (n + m - 1) // m * m


def _make_expert_kernel(n_chunks, approx_sigmoid):
    """Kernel factory. n_chunks = TB // CHUNK (static Python int)."""

    def kernel(x_ref, w1_ref, b1_ref, w2_ref, b2_ref, w3_ref, b3_ref, o_ref):
        # Hoist the VMEM-resident weights once per grid step.
        w1 = w1_ref[...]          # (D, H)   compute dtype
        b1 = b1_ref[...]          # (1, H)   f32
        w2 = w2_ref[...]          # (H, H2)  compute dtype
        b2 = b2_ref[...]          # (1, H2)  f32
        w3 = w3_ref[...]          # (1, H2)  f32   (third Linear as a row vector)
        b3 = b3_ref[...]          # (1, 1)   f32

        def body(c, carry):
            r = c * CHUNK
            xc = x_ref[pl.ds(r, CHUNK), :]                        # (CHUNK, D)

            # Linear(D,H) + bias + ReLU, fused with the cast so f32 h1 never hits VMEM.
            h1 = jnp.dot(xc, w1, preferred_element_type=jnp.float32)
            h1 = jnp.maximum(h1 + b1, 0.0).astype(w2.dtype)       # (CHUNK, H)

            # Linear(H,H2) + bias + ReLU.  (Dropouts are identity in eval mode.)
            h2 = jnp.dot(h1, w2, preferred_element_type=jnp.float32)
            h2 = jnp.maximum(h2 + b2, 0.0)                        # (CHUNK, H2) f32

            # Linear(H2,1): VPU multiply + XLU lane-reduce, relaid as a lane-dense row.
            logits = jnp.sum(h2 * w3, axis=-1)[None, :] + b3      # (1, CHUNK)

            # sigmoid = 1 / (1 + exp(-x)); exp and reciprocal both ride the EUP slot.
            probs = pl.reciprocal(1.0 + jnp.exp(-logits), approx=approx_sigmoid)
            o_ref[:, pl.ds(r, CHUNK)] = probs
            return carry

        lax.fori_loop(0, n_chunks, body, 0, unroll=True)

    return kernel


@partial(jax.jit, static_argnames=("tb", "compute_dtype"))
def expert_forward(x, params, *, tb=4096, compute_dtype=jnp.bfloat16):
    """ExpertNetwork eval-mode forward.  x: (B, D) f32 -> (B, 1) f32 probabilities."""
    B, D = x.shape
    H = params["w1"].shape[1]
    H2 = params["w2"].shape[1]

    # ---- BatchNorm1d (eval) split: scale applied to x in f32, shift folded into b1.
    inv_std = lax.rsqrt(params["bn_var"].astype(jnp.float32) + BN_EPS)
    bn_scale = params["bn_gamma"] * inv_std                        # (D,)
    bn_shift = params["bn_beta"] - params["bn_mean"] * bn_scale    # (D,)
    b1_folded = params["b1"] + bn_shift @ params["w1"]             # (H,)  exact fold
    x_scaled = x.astype(jnp.float32) * bn_scale                    # (B, D) f32

    # ---- Batch tiling: multiples of CHUNK; keep >=2 grid steps whenever the padded
    #      batch spans >=2 chunks so v7x's two TensorCores both get work.
    B_ceil = _round_up(B, CHUNK)
    TB = min(_round_up(tb, CHUNK), B_ceil)
    if B_ceil >= 2 * CHUNK:
        TB = min(TB, _round_up((B_ceil + 1) // 2, CHUNK))
    num_tiles = pl.cdiv(B_ceil, TB)
    B_pad = num_tiles * TB
    n_chunks = TB // CHUNK

    x_p = x_scaled.astype(compute_dtype)
    if B_pad != B:
        x_p = jnp.pad(x_p, ((0, B_pad - B), (0, 0)))   # padded tail rows sliced off below

    w1_c = params["w1"].astype(compute_dtype)
    w2_c = params["w2"].astype(compute_dtype)
    b1_r = b1_folded.reshape(1, H).astype(jnp.float32)
    b2_r = params["b2"].reshape(1, H2).astype(jnp.float32)
    w3_r = params["w3"].reshape(1, H2).astype(jnp.float32)
    b3_r = params["b3"].reshape(1, 1).astype(jnp.float32)

    flops = 2 * B_pad * (D * H + H * H2 + H2)
    bytes_accessed = int(
        x_p.size * x_p.dtype.itemsize
        + w1_c.size * w1_c.dtype.itemsize
        + w2_c.size * w2_c.dtype.itemsize
        + 4 * (b1_r.size + b2_r.size + w3_r.size + b3_r.size)
        + 4 * B_pad)

    kernel = _make_expert_kernel(
        n_chunks=n_chunks, approx_sigmoid=(compute_dtype != jnp.float32))

    out = pl.pallas_call(
        kernel,
        out_shape=jax.ShapeDtypeStruct((1, B_pad), jnp.float32),
        grid=(num_tiles,),
        in_specs=[
            pl.BlockSpec((TB, D), lambda i: (i, 0)),   # x tile streams per grid step
            pl.BlockSpec((D, H), lambda i: (0, 0)),    # constant blocks -> VMEM-resident
            pl.BlockSpec((1, H), lambda i: (0, 0)),
            pl.BlockSpec((H, H2), lambda i: (0, 0)),
            pl.BlockSpec((1, H2), lambda i: (0, 0)),
            pl.BlockSpec((1, H2), lambda i: (0, 0)),
            pl.BlockSpec((1, 1), lambda i: (0, 0)),
        ],
        out_specs=pl.BlockSpec((1, TB), lambda i: (0, i)),   # lane-dense (batch on lanes)
        compiler_params=pltpu.CompilerParams(
            dimension_semantics=("parallel",),   # batch tiles shard across v7x's 2 TCs
            vmem_limit_bytes=32 * 1024 * 1024,
        ),
        cost_estimate=pl.CostEstimate(
            flops=flops, transcendentals=2 * B_pad, bytes_accessed=bytes_accessed),
    )(x_p, w1_c, b1_r, w2_c, b2_r, w3_r, b3_r)

    return out.reshape(B_pad, 1)[:B]


def xavier_uniform(key, fan_in, fan_out, gain):
    # Matches torch.nn.init.xavier_uniform_ semantics.
    bound = gain * math.sqrt(6.0 / (fan_in + fan_out))
    w = jax.random.uniform(key, (fan_out, fan_in), jnp.float32, -bound, bound)
    return w.T  # stored as (in, out) for row-major matmuls


def init_params(key, input_dim, hidden_dim=128):
    h2 = hidden_dim // 2
    k1, k2, k3 = jax.random.split(key, 3)
    return {
        # BatchNorm1d(input_dim) default init (running stats).
        "bn_gamma": jnp.ones((input_dim,), jnp.float32),
        "bn_beta": jnp.zeros((input_dim,), jnp.float32),
        "bn_mean": jnp.zeros((input_dim,), jnp.float32),
        "bn_var": jnp.ones((input_dim,), jnp.float32),
        # Linear layers: xavier_uniform(gain=2.0), bias = 0.1.
        "w1": xavier_uniform(k1, input_dim, hidden_dim, gain=2.0),
        "b1": jnp.full((hidden_dim,), 0.1, jnp.float32),
        "w2": xavier_uniform(k2, hidden_dim, h2, gain=2.0),
        "b2": jnp.full((h2,), 0.1, jnp.float32),
        "w3": xavier_uniform(k3, h2, 1, gain=2.0),
        "b3": jnp.full((1,), 0.1, jnp.float32),
    }


def reference_forward(x, params):
    """Pure-JAX f32 reference (PyTorch eval-mode semantics)."""
    inv_std = lax.rsqrt(params["bn_var"] + BN_EPS)
    xn = (x - params["bn_mean"]) * inv_std * params["bn_gamma"] + params["bn_beta"]
    h1 = jnp.maximum(xn @ params["w1"] + params["b1"], 0.0)
    h2 = jnp.maximum(h1 @ params["w2"] + params["b2"], 0.0)
    logits = h2 @ params["w3"] + params["b3"]
    return jax.nn.sigmoid(logits)


# TODO(synk): training-mode behavior (batch statistics in BatchNorm, dropout masks) is
# intentionally not implemented; this kernel reproduces module.eval() forward only.

if __name__ == "__main__":
    key = jax.random.PRNGKey(0)
    k_x, k_p = jax.random.split(key)

    batch, input_dim, hidden_dim = 8, 32, 128
    x = jax.random.normal(k_x, (batch, input_dim), jnp.float32)
    params = init_params(k_p, input_dim, hidden_dim)

    ref = jax.block_until_ready(reference_forward(x, params))

    # 1) Exact-semantics check: f32 matmul operands + exact reciprocal -> tight match.
    out_f32 = jax.block_until_ready(
        expert_forward(x, params, compute_dtype=jnp.float32))
    assert out_f32.shape == (batch, 1)
    assert jnp.allclose(out_f32, ref, atol=1e-5, rtol=1e-5), "f32 kernel mismatch"

    # 2) Production path: bf16 matmul operands (f32 accumulation / activations).
    out_bf16 = jax.block_until_ready(expert_forward(x, params))
    assert out_bf16.shape == (batch, 1)
    assert bool(jnp.all(jnp.isfinite(out_bf16)))
    assert jnp.allclose(out_bf16, ref, atol=3e-2), "bf16 kernel drifted too far"

    # 3) Ragged batch: exercises wrapper-side padding of the tail tile.
    x2 = jax.random.normal(k_x, (13, input_dim), jnp.float32)
    out2 = jax.block_until_ready(
        expert_forward(x2, params, compute_dtype=jnp.float32))
    ref2 = reference_forward(x2, params)
    assert out2.shape == (13, 1)
    assert jnp.allclose(out2, ref2, atol=1e-5, rtol=1e-5), "ragged-batch mismatch"

    print("KERNEL_OK")
</pallas_src>

<mosaic_0001>
module attributes {stable_mosaic.version = 11 : i64} {
  func.func @kernel(%arg0: i32, %arg1: memref<512x32xf32, #tpu.memory_space<vmem>>, %arg2: memref<32x128xf32, #tpu.memory_space<vmem>>, %arg3: memref<1x128xf32, #tpu.memory_space<vmem>>, %arg4: memref<128x64xf32, #tpu.memory_space<vmem>>, %arg5: memref<1x64xf32, #tpu.memory_space<vmem>>, %arg6: memref<1x64xf32, #tpu.memory_space<vmem>>, %arg7: memref<1x1xf32, #tpu.memory_space<vmem>>, %arg8: memref<1x512xf32, #tpu.memory_space<vmem>>) attributes {dimension_semantics = [#tpu.dimension_semantics<parallel>], iteration_bounds = array<i64: 1>, scalar_prefetch = 0 : i64, scratch_operands = 0 : i64, tpu.core_type = #tpu.core_type<tc>, window_params = [{transform_indices = @transform_0, window_bounds = array<i64: 512, 32>}, {pipeline_mode = #tpu.pipeline_mode<synchronous>, transform_indices = @transform_1, window_bounds = array<i64: 32, 128>}, {pipeline_mode = #tpu.pipeline_mode<synchronous>, transform_indices = @transform_2, window_bounds = array<i64: 1, 128>}, {pipeline_mode = #tpu.pipeline_mode<synchronous>, transform_indices = @transform_3, window_bounds = array<i64: 128, 64>}, {pipeline_mode = #tpu.pipeline_mode<synchronous>, transform_indices = @transform_4, window_bounds = array<i64: 1, 64>}, {pipeline_mode = #tpu.pipeline_mode<synchronous>, transform_indices = @transform_5, window_bounds = array<i64: 1, 64>}, {pipeline_mode = #tpu.pipeline_mode<synchronous>, transform_indices = @transform_6, window_bounds = array<i64: 1, 1>}, {transform_indices = @transform_7, window_bounds = array<i64: 1, 512>}]} {
    %c0 = arith.constant 0 : index
    %c0_0 = arith.constant 0 : index
    %0 = vector.load %arg2[%c0, %c0_0] : memref<32x128xf32, #tpu.memory_space<vmem>>, vector<32x128xf32>
    %c0_1 = arith.constant 0 : index
    %c0_2 = arith.constant 0 : index
    %1 = vector.load %arg3[%c0_1, %c0_2] : memref<1x128xf32, #tpu.memory_space<vmem>>, vector<1x128xf32>
    %c0_3 = arith.constant 0 : index
    %c0_4 = arith.constant 0 : index
    %2 = vector.load %arg4[%c0_3, %c0_4] : memref<128x64xf32, #tpu.memory_space<vmem>>, vector<128x64xf32>
    %c0_5 = arith.constant 0 : index
    %c0_6 = arith.constant 0 : index
    %3 = vector.load %arg5[%c0_5, %c0_6] : memref<1x64xf32, #tpu.memory_space<vmem>>, vector<1x64xf32>
    %c0_7 = arith.constant 0 : index
    %c0_8 = arith.constant 0 : index
    %4 = vector.load %arg6[%c0_7, %c0_8] : memref<1x64xf32, #tpu.memory_space<vmem>>, vector<1x64xf32>
    %c0_9 = arith.constant 0 : index
    %c0_10 = arith.constant 0 : index
    %5 = vector.load %arg7[%c0_9, %c0_10] : memref<1x1xf32, #tpu.memory_space<vmem>>, vector<1x1xf32>
    %c0_i32 = arith.constant 0 : i32
    %c512_i32 = arith.constant 512 : i32
    %6 = arith.muli %c0_i32, %c512_i32 : i32
    %7 = arith.index_cast %6 : i32 to index
    %c0_11 = arith.constant 0 : index
    %8 = vector.load %arg1[%7, %c0_11] : memref<512x32xf32, #tpu.memory_space<vmem>>, vector<512x32xf32>
    %cst = arith.constant dense<0.000000e+00> : vector<512x128xf32>
    %9 = tpu.matmul %8, %0, %cst {dimension_numbers = #tpu.dot_dimension_numbers<[1], [0], [0], [1], [0, 0, 1, 1], [], []>} : vector<512x32xf32>, vector<32x128xf32>, vector<512x128xf32> -> vector<512x128xf32>
    %10 = vector.broadcast %1 : vector<1x128xf32> to vector<512x128xf32>
    %11 = arith.addf %9, %10 : vector<512x128xf32>
    %cst_12 = arith.constant 0.000000e+00 : f32
    %12 = vector.broadcast %cst_12 : f32 to vector<512x128xf32>
    %13 = arith.maximumf %11, %12 : vector<512x128xf32>
    %cst_13 = arith.constant dense<0.000000e+00> : vector<512x64xf32>
    %14 = tpu.matmul %13, %2, %cst_13 {dimension_numbers = #tpu.dot_dimension_numbers<[1], [0], [0], [1], [0, 0, 1, 1], [], []>} : vector<512x128xf32>, vector<128x64xf32>, vector<512x64xf32> -> vector<512x64xf32>
    %15 = vector.broadcast %3 : vector<1x64xf32> to vector<512x64xf32>
    %16 = arith.addf %14, %15 : vector<512x64xf32>
    %cst_14 = arith.constant 0.000000e+00 : f32
    %17 = vector.broadcast %cst_14 : f32 to vector<512x64xf32>
    %18 = arith.maximumf %16, %17 : vector<512x64xf32>
    %19 = vector.broadcast %4 : vector<1x64xf32> to vector<512x64xf32>
    %20 = arith.mulf %18, %19 : vector<512x64xf32>
    %cst_15 = arith.constant dense<0.000000e+00> : vector<512xf32>
    %21 = vector.multi_reduction <add>, %20, %cst_15 [1] : vector<512x64xf32> to vector<512xf32>
    %22 = vector.shape_cast %21 : vector<512xf32> to vector<1x512xf32>
    %23 = vector.broadcast %5 : vector<1x1xf32> to vector<1x512xf32>
    %24 = arith.addf %22, %23 : vector<1x512xf32>
    %cst_16 = arith.constant 0.000000e+00 : f32
    %25 = vector.broadcast %cst_16 : f32 to vector<1x512xf32>
    %26 = arith.subf %25, %24 : vector<1x512xf32>
    %27 = math.exp %26 : vector<1x512xf32>
    %cst_17 = arith.constant 1.000000e+00 : f32
    %28 = vector.broadcast %cst_17 : f32 to vector<1x512xf32>
    %29 = arith.addf %28, %27 : vector<1x512xf32>
    %30 = tpu.reciprocal %29 : vector<1x512xf32> -> vector<1x512xf32>
    %c0_18 = arith.constant 0 : index
    %31 = arith.index_cast %6 : i32 to index
    %32 = vector.load %arg8[%c0_18, %31] : memref<1x512xf32, #tpu.memory_space<vmem>>, vector<1x512xf32>
    tpu.vector_store %arg8[%c0_18, %31], %30 {strides = array<i32>} : memref<1x512xf32, #tpu.memory_space<vmem>>, vector<1x512xf32>,
    %c1_i32 = arith.constant 1 : i32
    return
  }
  func.func @transform_0(%arg0: i32) -> (i32, i32) {
    %c0_i32 = arith.constant 0 : i32
    %c0_i32_0 = arith.constant 0 : i32
    return %arg0, %c0_i32 : i32, i32
  }
  func.func @transform_1(%arg0: i32) -> (i32, i32) {
    %c0_i32 = arith.constant 0 : i32
    %c0_i32_0 = arith.constant 0 : i32
    %c0_i32_1 = arith.constant 0 : i32
    return %c0_i32, %c0_i32_0 : i32, i32
  }
  func.func @transform_2(%arg0: i32) -> (i32, i32) {
    %c0_i32 = arith.constant 0 : i32
    %c0_i32_0 = arith.constant 0 : i32
    %c0_i32_1 = arith.constant 0 : i32
    return %c0_i32, %c0_i32_0 : i32, i32
  }
  func.func @transform_3(%arg0: i32) -> (i32, i32) {
    %c0_i32 = arith.constant 0 : i32
    %c0_i32_0 = arith.constant 0 : i32
    %c0_i32_1 = arith.constant 0 : i32
    return %c0_i32, %c0_i32_0 : i32, i32
  }
  func.func @transform_4(%arg0: i32) -> (i32, i32) {
    %c0_i32 = arith.constant 0 : i32
    %c0_i32_0 = arith.constant 0 : i32
    %c0_i32_1 = arith.constant 0 : i32
    return %c0_i32, %c0_i32_0 : i32, i32
  }
  func.func @transform_5(%arg0: i32) -> (i32, i32) {
    %c0_i32 = arith.constant 0 : i32
    %c0_i32_0 = arith.constant 0 : i32
    %c0_i32_1 = arith.constant 0 : i32
    return %c0_i32, %c0_i32_0 : i32, i32
  }
  func.func @transform_6(%arg0: i32) -> (i32, i32) {
    %c0_i32 = arith.constant 0 : i32
    %c0_i32_0 = arith.constant 0 : i32
    %c0_i32_1 = arith.constant 0 : i32
    return %c0_i32, %c0_i32_0 : i32, i32
  }
  func.func @transform_7(%arg0: i32) -> (i32, i32) {
    %c0_i32 = arith.constant 0 : i32
    %c0_i32_0 = arith.constant 0 : i32
    return %c0_i32, %arg0 : i32, i32
  }
}

</mosaic_0001>

<bundles_post_ra>
// kernel: expert_forward.1
= control target key start
LH: loop header
LB: loop body
LE: loop exit
PB: predicated region body
PF: predicated region fallthrough
CT: control target
= control target key end

     0   :  { %vm122_vm0 = vcmask 261120   ;;  %vm1289_vm1 = vcmask 523264   ;;  %vm7326_vm2 = vcmask 130112   ;;  %vm7333_vm3 = vcmask 195712   ;;  %s10998_s1 = inlined_call_operand.vmem [shape: f32[32,128], index: 1, kind: input, shape index: {}]   ;;  %s10999_s0 = inlined_call_operand.vmem [shape: f32[512,32], index: 0, kind: input, shape index: {}]   ;;  %s11000_s3 = inlined_call_operand.vmem [shape: f32[128,64], index: 3, kind: input, shape index: {}]   ;;  %s11001_s2 = inlined_call_operand.vmem [shape: f32[1,128], index: 2, kind: input, shape index: {}]   ;;  %s11002_s6 = inlined_call_operand.<no memory space> [shape: f32[1,1], index: 6, kind: input, shape index: {}]   ;;  %s11003_s4 = inlined_call_operand.vmem [shape: f32[1,64], index: 4, kind: input, shape index: {}]   ;;  %s11004_s5 = inlined_call_operand.vmem [shape: f32[1,64], index: 5, kind: input, shape index: {}]   ;;  %s11005_s7 = inlined_call_operand.vmem [shape: f32[1,512], index: 7, kind: output, shape index: {}]  }
   0x1   :  { %v28_v0 = vld [vmem:[%s10998_s1] sm:$0xff]  ;;  %v29_v1 = vld [vmem:[%s10998_s1 + $0x8] sm:$0xff]  ;;  %v30_v2 = vld [vmem:[%s10998_s1 + $0x10] sm:$0xff]  ;;  %vm7340_vm4 = vcmask 261312   ;;  %vm7347_vm5 = vcmask 326912   ;;  %vm7354_vm6 = vcmask 392512  }
   0x2   :  { %v8144_v3 = vpack.c.bf16 %v29_v1, %v28_v0  ;;  %v31_v4 = vld [vmem:[%s10998_s1 + $0x18] sm:$0xff]  ;;  %v52_v5 = vld [vmem:[%s10999_s0] sm:$0xff]  ;;  %v53_v7 = vld [vmem:[%s10999_s0 + $0x8] sm:$0xff]  ;;  %vm7361_vm7 = vcmask 458112   ;;  %vm7368_vm8 = vcmask 523712   ;;  %vm7375_vm9 = vcmask 589312  }
   0x3   :  { %v8148_v6 = vpack.c.bf16 %v31_v4, %v30_v2  ;;  %7920 = vmatprep.mubr.msk.f32.mxu0 %vm122_vm0, %v52_v5  ;;  %v54_v8 = vld [vmem:[%s10999_s0 + $0x10] sm:$0xff]  ;;  %v55_v9 = vld [vmem:[%s10999_s0 + $0x18] sm:$0xff]  ;;  %v56_v10 = vld [vmem:[%s10999_s0 + $0x20] sm:$0xff]  ;;  %vm7382_vm10 = vcmask 654912   ;;  %vm7389_vm11 = vcmask 720512   ;;  %vm7396_vm12 = vcmask 786112  }
   0x4   :  { %8145 = vmatprep.subr.bf16.mxu0 %v8144_v3  ;;  %v57_v11 = vld [vmem:[%s10999_s0 + $0x28] sm:$0xff]  ;;  %v33_v12 = vld [vmem:[%s11000_s3] sm:$0xff]  ;;  %v58_v13 = vld [vmem:[%s10999_s0 + $0x30] sm:$0xff]  ;;  %vm7403_vm13 = vcmask 851712   ;;  %vm7410_vm14 = vcmask 917312   ;;  %vm7417_vm15 = vcmask 982912  }
   0x5   :  { %8147 = vmatpush3.bf16.msra.mxu0 %v8144_v3  ;;  %v34_v14 = vld [vmem:[%s11000_s3 + $0x8] sm:$0xff]  ;;  %v59_v16 = vld [vmem:[%s10999_s0 + $0x38] sm:$0xff]  ;;  %v35_v17 = vld [vmem:[%s11000_s3 + $0x10] sm:$0xff] }
   0x6   :  { %8149 = vmatprep.subr.bf16.mxu0 %v8148_v6  ;;  %v8152_v15 = vpack.c.bf16 %v34_v14, %v33_v12  ;;  %v36_v18 = vld [vmem:[%s11000_s3 + $0x18] sm:$0xff]  ;;  %v60_v19 = vld [vmem:[%s10999_s0 + $0x40] sm:$0xff]  ;;  %v38_v22 = vld [vmem:[%s11000_s3 + $0x28] sm:$0xff] }
   0x7   :  { %v8156_v20 = vpack.c.bf16 %v36_v18, %v35_v17  ;;  %v37_v21 = vld [vmem:[%s11000_s3 + $0x20] sm:$0xff]  ;;  %v61_v23 = vld [vmem:[%s10999_s0 + $0x48] sm:$0xff]  ;;  %v39_v25 = vld [vmem:[%s11000_s3 + $0x30] sm:$0xff] }
   0x8   :  { %8184 = vmatprep.subr.bf16.mxu1 %v8152_v15  ;;  %v8160_v24 = vpack.c.bf16 %v38_v22, %v37_v21  ;;  %v62_v26 = vld [vmem:[%s10999_s0 + $0x50] sm:$0xff]  ;;  %v40_v27 = vld [vmem:[%s11000_s3 + $0x38] sm:$0xff]  ;;  %v41_v29 = vld [vmem:[%s11000_s3 + $0x40] sm:$0xff] }
   0x9   :  { %8151 = vmatpush3.bf16.msra.mxu0 %v8148_v6  ;;  %8192 = vmatpush3.bf16.msra.mxu1 %v8152_v15  ;;  %v8164_v28 = vpack.c.bf16 %v40_v27, %v39_v25  ;;  %v42_v30 = vld [vmem:[%s11000_s3 + $0x48] sm:$0xff]  ;;  %v63_v31 = vld [vmem:[%s10999_s0 + $0x58] sm:$0xff]  ;;  %v64_v32 = vld [vmem:[%s10999_s0 + $0x60] sm:$0xff] }
   0xa   :  { %8153 = vmatprep.subr.bf16.mxu0 %v8152_v15  ;;  %8185 = vmatprep.subr.bf16.mxu1 %v8156_v20  ;;  %v8168_v33 = vpack.c.bf16 %v42_v30, %v41_v29  ;;  %v43_v34 = vld [vmem:[%s11000_s3 + $0x50] sm:$0xff]  ;;  %v44_v35 = vld [vmem:[%s11000_s3 + $0x58] sm:$0xff]  ;;  %v65_v36 = vld [vmem:[%s10999_s0 + $0x68] sm:$0xff] }
   0xb   :  { %v66_v37 = vld [vmem:[%s10999_s0 + $0x70] sm:$0xff]  ;;  %v8172_v38 = vpack.c.bf16 %v44_v35, %v43_v34  ;;  %v45_v39 = vld [vmem:[%s11000_s3 + $0x60] sm:$0xff]  ;;  %v46_v40 = vld [vmem:[%s11000_s3 + $0x68] sm:$0xff] }
   0xc   :  { %7921 = vmatmul.mubr.msk.f32.vlgmr.msra.gmra.mrb[0].mxu0 %vm122_vm0, %v53_v7  ;;  %v67_v41 = vld [vmem:[%s10999_s0 + $0x78] sm:$0xff]  ;;  %v68_v42 = vld [vmem:[%s10999_s0 + $0x80] sm:$0xff]  ;;  %v8176_v43 = vpack.c.bf16 %v46_v40, %v45_v39  ;;  %v47_v44 = vld [vmem:[%s11000_s3 + $0x70] sm:$0xff] }
   0xd   :  { %7923 = vmatprep.mubr.msk.f32.mxu0 %vm122_vm0, %v54_v8  ;;  %8155 = vmatpush3.bf16.msra.mxu0 %v8152_v15  ;;  %v48_v45 = vld [vmem:[%s11000_s3 + $0x78] sm:$0xff]  ;;  %v69_v46 = vld [vmem:[%s10999_s0 + $0x88] sm:$0xff]  ;;  %v70_v47 = vld [vmem:[%s10999_s0 + $0x90] sm:$0xff] }
   0xe   :  { %8157 = vmatprep.subr.bf16.mxu0 %v8156_v20  ;;  %8193 = vmatpush3.bf16.msra.mxu1 %v8156_v20  ;;  %v8180_v48 = vpack.c.bf16 %v48_v45, %v47_v44  ;;  %v71_v49 = vld [vmem:[%s10999_s0 + $0x98] sm:$0xff]  ;;  %v72_v50 = vld [vmem:[%s10999_s0 + $0xa0] sm:$0xff]  ;;  %v73_v51 = vld [vmem:[%s10999_s0 + $0xa8] sm:$0xff] }
   0xf   :  { %8186 = vmatprep.subr.bf16.mxu1 %v8160_v24  ;;  %v74_v52 = vld [vmem:[%s10999_s0 + $0xb0] sm:$0xff]  ;;  %v75_v53 = vld [vmem:[%s10999_s0 + $0xb8] sm:$0xff]  ;;  %v76_v54 = vld [vmem:[%s10999_s0 + $0xc0] sm:$0xff] }
  0x10   :  { %7924 = vmatmul.mubr.msk.f32.gmra.mrb[2].mxu0 %vm122_vm0, %v55_v9  ;;  %v77_v55 = vld [vmem:[%s10999_s0 + $0xc8] sm:$0xff]  ;;  %v78_v56 = vld [vmem:[%s10999_s0 + $0xd0] sm:$0xff]  ;;  %v79_v57 = vld [vmem:[%s10999_s0 + $0xd8] sm:$0xff] }
  0x11   :  { %7926 = vmatprep.mubr.msk.f32.mxu0 %vm122_vm0, %v56_v10  ;;  %8159 = vmatpush3.bf16.msra.mxu0 %v8156_v20  ;;  %v80_v58 = vld [vmem:[%s10999_s0 + $0xe0] sm:$0xff]  ;;  %v81_v59 = vld [vmem:[%s10999_s0 + $0xe8] sm:$0xff]  ;;  %v82_v60 = vld [vmem:[%s10999_s0 + $0xf0] sm:$0xff] }
  0x12   :  { %8161 = vmatprep.subr.bf16.mxu0 %v8160_v24  ;;  %8194 = vmatpush3.bf16.msra.mxu1 %v8160_v24  ;;  %v83_v61 = vld [vmem:[%s10999_s0 + $0xf8] sm:$0xff]  ;;  %v84_v62 = vld [vmem:[%s10999_s0 + $0x100] sm:$0xff]  ;;  %v85_v63 = vld [vmem:[%s10999_s0 + $0x108] sm:$0xff] }
  0x13   :  { %8187 = vmatprep.subr.bf16.mxu1 %v8164_v28  ;;  %v86_v0 = vld [vmem:[%s10999_s0 + $0x110] sm:$0xff]  ;;  %v87_v1 = vld [vmem:[%s10999_s0 + $0x118] sm:$0xff]  ;;  %v88_v2 = vld [vmem:[%s10999_s0 + $0x120] sm:$0xff] }
  0x14   :  { %7927 = vmatmul.mubr.msk.f32.gmra.mrb[4].mxu0 %vm122_vm0, %v57_v11  ;;  %v89_v3 = vld [vmem:[%s10999_s0 + $0x128] sm:$0xff]  ;;  %v90_v4 = vld [vmem:[%s10999_s0 + $0x130] sm:$0xff]  ;;  %v91_v5 = vld [vmem:[%s10999_s0 + $0x138] sm:$0xff] }
  0x15   :  { %7929 = vmatprep.mubr.msk.f32.mxu0 %vm122_vm0, %v58_v13  ;;  %8163 = vmatpush3.bf16.msra.mxu0 %v8160_v24  ;;  %v92_v6 = vld [vmem:[%s10999_s0 + $0x140] sm:$0xff]  ;;  %v93_v7 = vld [vmem:[%s10999_s0 + $0x148] sm:$0xff]  ;;  %v94_v8 = vld [vmem:[%s10999_s0 + $0x150] sm:$0xff] }
  0x16   :  { %8165 = vmatprep.subr.bf16.mxu0 %v8164_v28  ;;  %8195 = vmatpush3.bf16.msra.mxu1 %v8164_v28  ;;  %v95_v9 = vld [vmem:[%s10999_s0 + $0x158] sm:$0xff]  ;;  %v96_v10 = vld [vmem:[%s10999_s0 + $0x160] sm:$0xff]  ;;  %v97_v11 = vld [vmem:[%s10999_s0 + $0x168] sm:$0xff] }
  0x17   :  { %8188 = vmatprep.subr.bf16.mxu1 %v8168_v33  ;;  %v98_v12 = vld [vmem:[%s10999_s0 + $0x170] sm:$0xff]  ;;  %v99_v13 = vld [vmem:[%s10999_s0 + $0x178] sm:$0xff]  ;;  %v100_v14 = vld [vmem:[%s10999_s0 + $0x180] sm:$0xff] }
  0x18   :  { %7930 = vmatmul.mubr.msk.f32.gmra.mrb[6].mxu0 %vm122_vm0, %v59_v16  ;;  %v101_v15 = vld [vmem:[%s10999_s0 + $0x188] sm:$0xff]  ;;  %v102_v16 = vld [vmem:[%s10999_s0 + $0x190] sm:$0xff]  ;;  %v103_v17 = vld [vmem:[%s10999_s0 + $0x198] sm:$0xff] }
  0x19   :  { %7932 = vmatprep.mubr.msk.f32.mxu0 %vm122_vm0, %v60_v19  ;;  %8167 = vmatpush3.bf16.msra.mxu0 %v8164_v28  ;;  %v104_v18 = vld [vmem:[%s10999_s0 + $0x1a0] sm:$0xff]  ;;  %v105_v19 = vld [vmem:[%s10999_s0 + $0x1a8] sm:$0xff]  ;;  %v106_v20 = vld [vmem:[%s10999_s0 + $0x1b0] sm:$0xff] }
  0x1a   :  { %8169 = vmatprep.subr.bf16.mxu0 %v8168_v33  ;;  %8196 = vmatpush3.bf16.msra.mxu1 %v8168_v33  ;;  %v107_v21 = vld [vmem:[%s10999_s0 + $0x1b8] sm:$0xff]  ;;  %v108_v22 = vld [vmem:[%s10999_s0 + $0x1c0] sm:$0xff]  ;;  %v110_v24 = vld [vmem:[%s10999_s0 + $0x1d0] sm:$0xff] }
  0x1b   :  { %8189 = vmatprep.subr.bf16.mxu1 %v8172_v38  ;;  %v111_v25 = vld [vmem:[%s10999_s0 + $0x1d8] sm:$0xff]  ;;  %v113_v27 = vld [vmem:[%s10999_s0 + $0x1e8] sm:$0xff]  ;;  %v114_v28 = vld [vmem:[%s10999_s0 + $0x1f0] sm:$0xff] }
  0x1c   :  { %7933 = vmatmul.mubr.msk.f32.gmra.mrb[8].mxu0 %vm122_vm0, %v61_v23  ;;  %v109_v23 = vld [vmem:[%s10999_s0 + $0x1c8] sm:$0xff]  ;;  %v115_v29 = vld [vmem:[%s10999_s0 + $0x1f8] sm:$0xff]  ;;  %v8821_v30 = vld [vmem:[%s11001_s2] ss:$0 sm:$0xff] }
  0x1d   :  { %7935 = vmatprep.mubr.msk.f32.mxu0 %vm122_vm0, %v62_v26  ;;  %8171 = vmatpush3.bf16.msra.mxu0 %v8168_v33  ;;  %v112_v26 = vld [vmem:[%s10999_s0 + $0x1e0] sm:$0xff] }
  0x1e   :  { %8173 = vmatprep.subr.bf16.mxu0 %v8172_v38  ;;  %8197 = vmatpush3.bf16.msra.mxu1 %v8172_v38 }
  0x1f   :  { %8190 = vmatprep.subr.bf16.mxu1 %v8176_v43 }
  0x20   :  { %7936 = vmatmul.mubr.msk.f32.gmra.mrb[10].mxu0 %vm122_vm0, %v63_v31 }
  0x21   :  { %7938 = vmatprep.mubr.msk.f32.mxu0 %vm122_vm0, %v64_v32  ;;  %8175 = vmatpush3.bf16.msra.mxu0 %v8172_v38  ;;  %v12_v38 = vstv %s11002_s6 }
  0x22   :  { %8177 = vmatprep.subr.bf16.mxu0 %v8176_v43  ;;  %8198 = vmatpush3.bf16.msra.mxu1 %v8176_v43  ;;  %13 = vst [vmem:[#allocation2] sm:$0x1] %v12_v38 }
  0x23   :  { %8191 = vmatprep.subr.bf16.mxu1 %v8180_v48 }
  0x24   :  { %7939 = vmatmul.mubr.msk.f32.gmra.mrb[12].mxu0 %vm122_vm0, %v65_v36 }
  0x25   :  { %7941 = vmatprep.mubr.msk.f32.mxu0 %vm122_vm0, %v66_v37  ;;  %8179 = vmatpush3.bf16.msra.mxu0 %v8176_v43  ;;  %v8460_v37 = vmov 0  }
  0x26   :  { %8181 = vmatprep.subr.bf16.mxu0 %v8180_v48  ;;  %8199 = vmatpush3.bf16.msra.mxu1 %v8180_v48 }
  0x27   :  { %8202 = vset.pattern.permute.xlu0 %v8460_v37  ;;  %8203 = vset.pattern.permute.xlu1 %v8460_v37 }
  0x28   :  { %7942 = vmatmul.mubr.msk.f32.gmra.mrb[14].mxu0 %vm122_vm0, %v67_v41 }
  0x29   :  { %7944 = vmatprep.mubr.msk.f32.mxu0 %vm122_vm0, %v68_v42  ;;  %8183 = vmatpush3.bf16.msra.mxu0 %v8180_v48 }
  0x2c   :  { %7945 = vmatmul.mubr.msk.f32.gmra.mrb[16].mxu0 %vm122_vm0, %v69_v46 }
  0x2d   :  { %7947 = vmatprep.mubr.msk.f32.mxu0 %vm122_vm0, %v70_v47 }
  0x30   :  { %7948 = vmatmul.mubr.msk.f32.gmra.mrb[18].mxu0 %vm122_vm0, %v71_v49 }
  0x31   :  { %7950 = vmatprep.mubr.msk.f32.mxu0 %vm122_vm0, %v72_v50 }
  0x34   :  { %7951 = vmatmul.mubr.msk.f32.gmra.mrb[20].mxu0 %vm122_vm0, %v73_v51 }
  0x35   :  { %7953 = vmatprep.mubr.msk.f32.mxu0 %vm122_vm0, %v74_v52  ;;  %v51_v52 = vld [vmem:[#allocation2] sm:$0x1] }
  0x36   :  { %1484 = vperm.xlu0 %8202, %v51_v52  }
  0x38   :  { %7954 = vmatmul.mubr.msk.f32.gmra.mrb[22].mxu0 %vm122_vm0, %v75_v53 }
  0x39   :  { %7956 = vmatprep.mubr.msk.f32.mxu0 %vm122_vm0, %v76_v54 }
  0x3c   :  { %7957 = vmatmul.mubr.msk.f32.gmra.mrb[24].mxu0 %vm122_vm0, %v77_v55 }
  0x3d   :  { %7959 = vmatprep.mubr.msk.f32.mxu0 %vm122_vm0, %v78_v56 }
  0x40   :  { %7960 = vmatmul.mubr.msk.f32.gmra.mrb[26].mxu0 %vm122_vm0, %v79_v57 }
  0x41   :  { %7962 = vmatprep.mubr.msk.f32.mxu0 %vm122_vm0, %v80_v58 }
  0x44   :  { %7963 = vmatmul.mubr.msk.f32.gmra.mrb[28].mxu0 %vm122_vm0, %v81_v59 }
  0x45   :  { %7965 = vmatprep.mubr.msk.f32.mxu0 %vm122_vm0, %v82_v60 }
  0x48   :  { %7966 = vmatmul.mubr.msk.f32.gmra.mrb[30].mxu0 %vm122_vm0, %v83_v61 }
  0x49   :  { %7968 = vmatprep.mubr.msk.f32.mxu0 %vm122_vm0, %v84_v62 }
  0x4c   :  { %7969 = vmatmul.mubr.msk.f32.gmra.mrb[32].mxu0 %vm122_vm0, %v85_v63 }
  0x4d   :  { %7971 = vmatprep.mubr.msk.f32.mxu0 %vm122_vm0, %v86_v0 }
  0x50   :  { %7972 = vmatmul.mubr.msk.f32.gmra.mrb[34].mxu0 %vm122_vm0, %v87_v1 }
  0x51   :  { %7974 = vmatprep.mubr.msk.f32.mxu0 %vm122_vm0, %v88_v2 }
  0x54   :  { %7975 = vmatmul.mubr.msk.f32.gmra.mrb[36].mxu0 %vm122_vm0, %v89_v3 }
  0x55   :  { %7977 = vmatprep.mubr.msk.f32.mxu0 %vm122_vm0, %v90_v4 }
  0x58   :  { %7978 = vmatmul.mubr.msk.f32.gmra.mrb[38].mxu0 %vm122_vm0, %v91_v5 }
  0x59   :  { %7980 = vmatprep.mubr.msk.f32.mxu0 %vm122_vm0, %v92_v6 }
  0x5c   :  { %7981 = vmatmul.mubr.msk.f32.gmra.mrb[40].mxu0 %vm122_vm0, %v93_v7 }
  0x5d   :  { %7983 = vmatprep.mubr.msk.f32.mxu0 %vm122_vm0, %v94_v8 }
  0x60   :  { %7984 = vmatmul.mubr.msk.f32.gmra.mrb[42].mxu0 %vm122_vm0, %v95_v9 }
  0x61   :  { %7986 = vmatprep.mubr.msk.f32.mxu0 %vm122_vm0, %v96_v10 }
  0x64   :  { %7987 = vmatmul.mubr.msk.f32.gmra.mrb[44].mxu0 %vm122_vm0, %v97_v11 }
  0x65   :  { %7989 = vmatprep.mubr.msk.f32.mxu0 %vm122_vm0, %v98_v12 }
  0x68   :  { %7990 = vmatmul.mubr.msk.f32.gmra.mrb[46].mxu0 %vm122_vm0, %v99_v13 }
  0x69   :  { %7992 = vmatprep.mubr.msk.f32.mxu0 %vm122_vm0, %v100_v14 }
  0x6c   :  { %7993 = vmatmul.mubr.msk.f32.gmra.mrb[48].mxu0 %vm122_vm0, %v101_v15 }
  0x6d   :  { %7995 = vmatprep.mubr.msk.f32.mxu0 %vm122_vm0, %v102_v16 }
  0x70   :  { %7996 = vmatmul.mubr.msk.f32.gmra.mrb[50].mxu0 %vm122_vm0, %v103_v17 }
  0x71   :  { %7998 = vmatprep.mubr.msk.f32.mxu0 %vm122_vm0, %v104_v18 }
  0x74   :  { %7999 = vmatmul.mubr.msk.f32.gmra.mrb[52].mxu0 %vm122_vm0, %v105_v19 }
  0x75   :  { %8001 = vmatprep.mubr.msk.f32.mxu0 %vm122_vm0, %v106_v20 }
  0x78   :  { %8002 = vmatmul.mubr.msk.f32.gmra.mrb[54].mxu0 %vm122_vm0, %v107_v21 }
  0x79   :  { %8004 = vmatprep.mubr.msk.f32.mxu0 %vm122_vm0, %v108_v22 }
  0x7c   :  { %8005 = vmatmul.mubr.msk.f32.gmra.mrb[56].mxu0 %vm122_vm0, %v109_v23 }
  0x7d   :  { %8007 = vmatprep.mubr.msk.f32.mxu0 %vm122_vm0, %v110_v24 }
  0x80   :  { %8008 = vmatmul.mubr.msk.f32.gmra.mrb[58].mxu0 %vm122_vm0, %v111_v25 }
  0x81   :  { %8010 = vmatprep.mubr.msk.f32.mxu0 %vm122_vm0, %v112_v26 }
  0x84   :  { %8011 = vmatmul.mubr.msk.f32.gmra.mrb[60].mxu0 %vm122_vm0, %v113_v27 }
  0x85   :  { %8013 = vmatprep.mubr.msk.f32.mxu0 %vm122_vm0, %v114_v28 }
  0x88   :  { %8014 = vmatmul.mubr.msk.f32.gmra.mrb[62].mxu0 %vm122_vm0, %v115_v29  ;;  %vm7424_vm0 = vcmask 1048512  }
  0xdf   :  { %v7922_v31 = vpop.f32.mrb[0].mxu0 }
  0xe0   :  { %v387_v32 = vadd.f32 %v7922_v31, %v8821_v30  ;;  %v381_v33 = vpop.f32.mrb[1].mxu0 }
  0xe1   :  { %v382_v34 = vadd.f32 %v8821_v30, %v381_v33 }
  0xe2   :  { %v701_v39 = vmax.f32 %v387_v32, 0.0 }
  0xe3   :  { %v700_v35 = vmax.f32 %v382_v34, 0.0  ;;  %v7925_v36 = vpop.f32.mrb[2].mxu0 }
  0xe4   :  { %v397_v40 = vadd.f32 %v7925_v36, %v8821_v30  ;;  %v391_v41 = vpop.f32.mrb[3].mxu0 }
  0xe5   :  { %v392_v42 = vadd.f32 %v8821_v30, %v391_v41  ;;  %8048 = vmatprep.mubr.f32.mxu0 %v700_v35 }
  0xe6   :  { %8049 = vmatmul.mubr.f32.vlgmr.msra.gmra.mrb[64].mxu0 %v701_v39  ;;  %v703_v45 = vmax.f32 %v397_v40, 0.0 }
  0xe7   :  { %v702_v43 = vmax.f32 %v392_v42, 0.0  ;;  %v7928_v44 = vpop.f32.mrb[4].mxu0 }
  0xe8   :  { %v407_v46 = vadd.f32 %v7928_v44, %v8821_v30  ;;  %v401_v47 = vpop.f32.mrb[5].mxu0 }
  0xe9   :  { %v402_v48 = vadd.f32 %v8821_v30, %v401_v47  ;;  %8051 = vmatprep.mubr.f32.mxu0 %v702_v43 }
  0xea   :  { %v705_v49 = vmax.f32 %v407_v46, 0.0  ;;  %8052 = vmatmul.mubr.f32.gmra.mrb[66].mxu0 %v703_v45 }
  0xeb   :  { %v704_v50 = vmax.f32 %v402_v48, 0.0  ;;  %v7931_v51 = vpop.f32.mrb[6].mxu0 }
  0xec   :  { %v417_v53 = vadd.f32 %v7931_v51, %v8821_v30  ;;  %v411_v54 = vpop.f32.mrb[7].mxu0 }
  0xed   :  { %8054 = vmatprep.mubr.f32.mxu0 %v704_v50  ;;  %v412_v55 = vadd.f32 %v8821_v30, %v411_v54 }
  0xee   :  { %v707_v56 = vmax.f32 %v417_v53, 0.0  ;;  %8055 = vmatmul.mubr.f32.gmra.mrb[68].mxu0 %v705_v49 }
  0xef   :  { %v7934_v57 = vpop.f32.mrb[8].mxu0  ;;  %v706_v58 = vmax.f32 %v412_v55, 0.0 }
  0xf0   :  { %v427_v59 = vadd.f32 %v7934_v57, %v8821_v30  ;;  %v421_v60 = vpop.f32.mrb[9].mxu0 }
  0xf1   :  { %v422_v61 = vadd.f32 %v8821_v30, %v421_v60  ;;  %8057 = vmatprep.mubr.f32.mxu1 %v706_v58 }
  0xf2   :  { %v709_v62 = vmax.f32 %v427_v59, 0.0  ;;  %8058 = vmatmul.mubr.f32.vlgmr.msra.gmra.mrb[0].mxu1 %v707_v56 }
  0xf3   :  { %v708_v63 = vmax.f32 %v422_v61, 0.0  ;;  %v7937_v0 = vpop.f32.mrb[10].mxu0 }
  0xf4   :  { %v437_v1 = vadd.f32 %v7937_v0, %v8821_v30  ;;  %v431_v2 = vpop.f32.mrb[11].mxu0 }
  0xf5   :  { %v432_v3 = vadd.f32 %v8821_v30, %v431_v2  ;;  %8060 = vmatprep.mubr.f32.mxu1 %v708_v63 }
  0xf6   :  { %v711_v4 = vmax.f32 %v437_v1, 0.0  ;;  %8061 = vmatmul.mubr.f32.gmra.mrb[2].mxu1 %v709_v62 }
  0xf7   :  { %v710_v5 = vmax.f32 %v432_v3, 0.0  ;;  %v7940_v6 = vpop.f32.mrb[12].mxu0 }
  0xf8   :  { %v447_v7 = vadd.f32 %v7940_v6, %v8821_v30  ;;  %v441_v8 = vpop.f32.mrb[13].mxu0 }
  0xf9   :  { %v442_v9 = vadd.f32 %v8821_v30, %v441_v8  ;;  %8063 = vmatprep.mubr.f32.mxu1 %v710_v5 }
  0xfa   :  { %v713_v10 = vmax.f32 %v447_v7, 0.0  ;;  %8064 = vmatmul.mubr.f32.gmra.mrb[4].mxu1 %v711_v4 }
  0xfb   :  { %v712_v11 = vmax.f32 %v442_v9, 0.0  ;;  %v7943_v12 = vpop.f32.mrb[14].mxu0 }
  0xfc   :  { %v457_v13 = vadd.f32 %v7943_v12, %v8821_v30  ;;  %v451_v14 = vpop.f32.mrb[15].mxu0 }
  0xfd   :  { %v452_v15 = vadd.f32 %v8821_v30, %v451_v14  ;;  %8066 = vmatprep.mubr.f32.mxu1 %v712_v11 }
  0xfe   :  { %v715_v16 = vmax.f32 %v457_v13, 0.0  ;;  %8067 = vmatmul.mubr.f32.gmra.mrb[6].mxu1 %v713_v10 }
  0xff   :  { %v714_v17 = vmax.f32 %v452_v15, 0.0  ;;  %v7946_v18 = vpop.f32.mrb[16].mxu0 }
 0x100   :  { %v467_v19 = vadd.f32 %v7946_v18, %v8821_v30  ;;  %v461_v20 = vpop.f32.mrb[17].mxu0 }
 0x101   :  { %v462_v21 = vadd.f32 %v8821_v30, %v461_v20  ;;  %8069 = vmatprep.mubr.f32.mxu1 %v714_v17 }
 0x102   :  { %v717_v22 = vmax.f32 %v467_v19, 0.0  ;;  %8070 = vmatmul.mubr.f32.gmra.mrb[8].mxu1 %v715_v16 }
 0x103   :  { %v716_v23 = vmax.f32 %v462_v21, 0.0  ;;  %v7949_v24 = vpop.f32.mrb[18].mxu0 }
 0x104   :  { %v477_v25 = vadd.f32 %v7949_v24, %v8821_v30  ;;  %v471_v26 = vpop.f32.mrb[19].mxu0 }
 0x105   :  { %v472_v27 = vadd.f32 %v8821_v30, %v471_v26  ;;  %8072 = vmatprep.mubr.f32.mxu1 %v716_v23 }
 0x106   :  { %v719_v28 = vmax.f32 %v477_v25, 0.0  ;;  %8073 = vmatmul.mubr.f32.gmra.mrb[10].mxu1 %v717_v22 }
 0x107   :  { %v718_v29 = vmax.f32 %v472_v27, 0.0  ;;  %v7952_v31 = vpop.f32.mrb[20].mxu0 }
 0x108   :  { %v487_v32 = vadd.f32 %v7952_v31, %v8821_v30  ;;  %v481_v33 = vpop.f32.mrb[21].mxu0 }
 0x109   :  { %v482_v34 = vadd.f32 %v8821_v30, %v481_v33  ;;  %8075 = vmatprep.mubr.f32.mxu1 %v718_v29 }
 0x10a   :  { %v721_v35 = vmax.f32 %v487_v32, 0.0  ;;  %8076 = vmatmul.mubr.f32.gmra.mrb[12].mxu1 %v719_v28 }
 0x10b   :  { %v720_v36 = vmax.f32 %v482_v34, 0.0  ;;  %v7955_v37 = vpop.f32.mrb[22].mxu0 }
 0x10c   :  { %v497_v38 = vadd.f32 %v7955_v37, %v8821_v30  ;;  %v491_v39 = vpop.f32.mrb[23].mxu0 }
 0x10d   :  { %v492_v40 = vadd.f32 %v8821_v30, %v491_v39  ;;  %8078 = vmatprep.mubr.f32.mxu1 %v720_v36 }
 0x10e   :  { %v723_v41 = vmax.f32 %v497_v38, 0.0  ;;  %8079 = vmatmul.mubr.f32.gmra.mrb[14].mxu1 %v721_v35 }
 0x10f   :  { %v722_v42 = vmax.f32 %v492_v40, 0.0  ;;  %v7958_v43 = vpop.f32.mrb[24].mxu0 }
 0x110   :  { %v507_v44 = vadd.f32 %v7958_v43, %v8821_v30  ;;  %v501_v45 = vpop.f32.mrb[25].mxu0 }
 0x111   :  { %v502_v46 = vadd.f32 %v8821_v30, %v501_v45  ;;  %8081 = vmatprep.mubr.f32.mxu1 %v722_v42 }
 0x112   :  { %v725_v47 = vmax.f32 %v507_v44, 0.0  ;;  %8082 = vmatmul.mubr.f32.gmra.mrb[16].mxu1 %v723_v41 }
 0x113   :  { %v724_v48 = vmax.f32 %v502_v46, 0.0  ;;  %v7961_v49 = vpop.f32.mrb[26].mxu0 }
 0x114   :  { %v517_v50 = vadd.f32 %v7961_v49, %v8821_v30  ;;  %v511_v51 = vpop.f32.mrb[27].mxu0 }
 0x115   :  { %v512_v52 = vadd.f32 %v8821_v30, %v511_v51  ;;  %8084 = vmatprep.mubr.f32.mxu1 %v724_v48 }
 0x116   :  { %v727_v53 = vmax.f32 %v517_v50, 0.0  ;;  %8085 = vmatmul.mubr.f32.gmra.mrb[18].mxu1 %v725_v47 }
 0x117   :  { %v726_v54 = vmax.f32 %v512_v52, 0.0  ;;  %v7964_v55 = vpop.f32.mrb[28].mxu0 }
 0x118   :  { %v527_v56 = vadd.f32 %v7964_v55, %v8821_v30  ;;  %v521_v57 = vpop.f32.mrb[29].mxu0 }
 0x119   :  { %v522_v58 = vadd.f32 %v8821_v30, %v521_v57  ;;  %8087 = vmatprep.mubr.f32.mxu1 %v726_v54 }
 0x11a   :  { %v729_v59 = vmax.f32 %v527_v56, 0.0  ;;  %8088 = vmatmul.mubr.f32.gmra.mrb[20].mxu1 %v727_v53 }
 0x11b   :  { %v728_v60 = vmax.f32 %v522_v58, 0.0  ;;  %v7967_v61 = vpop.f32.mrb[30].mxu0 }
 0x11c   :  { %v537_v62 = vadd.f32 %v7967_v61, %v8821_v30  ;;  %v531_v63 = vpop.f32.mrb[31].mxu0 }
 0x11d   :  { %v532_v0 = vadd.f32 %v8821_v30, %v531_v63  ;;  %8090 = vmatprep.mubr.f32.mxu1 %v728_v60 }
 0x11e   :  { %v731_v1 = vmax.f32 %v537_v62, 0.0  ;;  %8091 = vmatmul.mubr.f32.gmra.mrb[22].mxu1 %v729_v59 }
 0x11f   :  { %v730_v2 = vmax.f32 %v532_v0, 0.0  ;;  %v7970_v3 = vpop.f32.mrb[32].mxu0 }
 0x120   :  { %v547_v4 = vadd.f32 %v7970_v3, %v8821_v30  ;;  %v541_v5 = vpop.f32.mrb[33].mxu0 }
 0x121   :  { %v542_v6 = vadd.f32 %v8821_v30, %v541_v5  ;;  %8093 = vmatprep.mubr.f32.mxu1 %v730_v2 }
 0x122   :  { %v733_v7 = vmax.f32 %v547_v4, 0.0  ;;  %8094 = vmatmul.mubr.f32.gmra.mrb[24].mxu1 %v731_v1 }
 0x123   :  { %v732_v8 = vmax.f32 %v542_v6, 0.0  ;;  %v7973_v9 = vpop.f32.mrb[34].mxu0 }
 0x124   :  { %v557_v10 = vadd.f32 %v7973_v9, %v8821_v30  ;;  %v551_v11 = vpop.f32.mrb[35].mxu0 }
 0x125   :  { %v552_v12 = vadd.f32 %v8821_v30, %v551_v11  ;;  %8096 = vmatprep.mubr.f32.mxu1 %v732_v8 }
 0x126   :  { %v735_v13 = vmax.f32 %v557_v10, 0.0  ;;  %8097 = vmatmul.mubr.f32.gmra.mrb[26].mxu1 %v733_v7 }
 0x127   :  { %v734_v14 = vmax.f32 %v552_v12, 0.0  ;;  %v7976_v15 = vpop.f32.mrb[36].mxu0 }
 0x128   :  { %v567_v16 = vadd.f32 %v7976_v15, %v8821_v30  ;;  %v561_v17 = vpop.f32.mrb[37].mxu0 }
 0x129   :  { %v562_v18 = vadd.f32 %v8821_v30, %v561_v17  ;;  %8099 = vmatprep.mubr.f32.mxu1 %v734_v14 }
 0x12a   :  { %v737_v19 = vmax.f32 %v567_v16, 0.0  ;;  %8100 = vmatmul.mubr.f32.gmra.mrb[28].mxu1 %v735_v13 }
 0x12b   :  { %v736_v20 = vmax.f32 %v562_v18, 0.0  ;;  %v7979_v21 = vpop.f32.mrb[38].mxu0 }
 0x12c   :  { %v577_v22 = vadd.f32 %v7979_v21, %v8821_v30  ;;  %v571_v23 = vpop.f32.mrb[39].mxu0 }
 0x12d   :  { %v572_v24 = vadd.f32 %v8821_v30, %v571_v23  ;;  %8102 = vmatprep.mubr.f32.mxu1 %v736_v20 }
 0x12e   :  { %v739_v25 = vmax.f32 %v577_v22, 0.0  ;;  %8103 = vmatmul.mubr.f32.gmra.mrb[30].mxu1 %v737_v19 }
 0x12f   :  { %v738_v26 = vmax.f32 %v572_v24, 0.0  ;;  %v7982_v27 = vpop.f32.mrb[40].mxu0 }
 0x130   :  { %v587_v28 = vadd.f32 %v7982_v27, %v8821_v30  ;;  %v581_v29 = vpop.f32.mrb[41].mxu0 }
 0x131   :  { %v582_v31 = vadd.f32 %v8821_v30, %v581_v29  ;;  %8105 = vmatprep.mubr.f32.mxu1 %v738_v26 }
 0x132   :  { %v741_v32 = vmax.f32 %v587_v28, 0.0  ;;  %8106 = vmatmul.mubr.f32.gmra.mrb[32].mxu1 %v739_v25 }
 0x133   :  { %v740_v33 = vmax.f32 %v582_v31, 0.0  ;;  %v7985_v34 = vpop.f32.mrb[42].mxu0 }
 0x134   :  { %v597_v35 = vadd.f32 %v7985_v34, %v8821_v30  ;;  %v591_v36 = vpop.f32.mrb[43].mxu0 }
 0x135   :  { %v592_v37 = vadd.f32 %v8821_v30, %v591_v36  ;;  %8108 = vmatprep.mubr.f32.mxu1 %v740_v33 }
 0x136   :  { %v743_v38 = vmax.f32 %v597_v35, 0.0  ;;  %8109 = vmatmul.mubr.f32.gmra.mrb[34].mxu1 %v741_v32 }
 0x137   :  { %v742_v39 = vmax.f32 %v592_v37, 0.0  ;;  %v7988_v40 = vpop.f32.mrb[44].mxu0  ;;  %v8893_v37 = vld [vmem:[%s11003_s4] ss:$0 sm:$0xff] }
 0x138   :  { %v607_v41 = vadd.f32 %v7988_v40, %v8821_v30  ;;  %v601_v42 = vpop.f32.mrb[45].mxu0 }
 0x139   :  { %v602_v43 = vadd.f32 %v8821_v30, %v601_v42  ;;  %8111 = vmatprep.mubr.f32.mxu1 %v742_v39 }
 0x13a   :  { %v745_v44 = vmax.f32 %v607_v41, 0.0  ;;  %8112 = vmatmul.mubr.f32.gmra.mrb[36].mxu1 %v743_v38 }
 0x13b   :  { %v744_v45 = vmax.f32 %v602_v43, 0.0  ;;  %v7991_v46 = vpop.f32.mrb[46].mxu0 }
 0x13c   :  { %v617_v47 = vadd.f32 %v7991_v46, %v8821_v30  ;;  %v611_v48 = vpop.f32.mrb[47].mxu0 }
 0x13d   :  { %v612_v49 = vadd.f32 %v8821_v30, %v611_v48  ;;  %8114 = vmatprep.mubr.f32.mxu1 %v744_v45 }
 0x13e   :  { %v747_v50 = vmax.f32 %v617_v47, 0.0  ;;  %8115 = vmatmul.mubr.f32.gmra.mrb[38].mxu1 %v745_v44 }
 0x13f   :  { %v746_v51 = vmax.f32 %v612_v49, 0.0  ;;  %v7994_v52 = vpop.f32.mrb[48].mxu0 }
 0x140   :  { %v627_v53 = vadd.f32 %v7994_v52, %v8821_v30  ;;  %v621_v54 = vpop.f32.mrb[49].mxu0 }
 0x141   :  { %v622_v55 = vadd.f32 %v8821_v30, %v621_v54  ;;  %8117 = vmatprep.mubr.f32.mxu1 %v746_v51 }
 0x142   :  { %v749_v56 = vmax.f32 %v627_v53, 0.0  ;;  %8118 = vmatmul.mubr.f32.gmra.mrb[40].mxu1 %v747_v50 }
 0x143   :  { %v748_v57 = vmax.f32 %v622_v55, 0.0  ;;  %v7997_v58 = vpop.f32.mrb[50].mxu0 }
 0x144   :  { %v637_v59 = vadd.f32 %v7997_v58, %v8821_v30  ;;  %v631_v60 = vpop.f32.mrb[51].mxu0 }
 0x145   :  { %v632_v61 = vadd.f32 %v8821_v30, %v631_v60  ;;  %8120 = vmatprep.mubr.f32.mxu1 %v748_v57 }
 0x146   :  { %v751_v62 = vmax.f32 %v637_v59, 0.0  ;;  %8121 = vmatmul.mubr.f32.gmra.mrb[42].mxu1 %v749_v56 }
 0x147   :  { %v750_v63 = vmax.f32 %v632_v61, 0.0  ;;  %v8000_v0 = vpop.f32.mrb[52].mxu0 }
 0x148   :  { %v647_v1 = vadd.f32 %v8000_v0, %v8821_v30  ;;  %v641_v2 = vpop.f32.mrb[53].mxu0 }
 0x149   :  { %v642_v3 = vadd.f32 %v8821_v30, %v641_v2  ;;  %8123 = vmatprep.mubr.f32.mxu1 %v750_v63 }
 0x14a   :  { %v753_v4 = vmax.f32 %v647_v1, 0.0  ;;  %8124 = vmatmul.mubr.f32.gmra.mrb[44].mxu1 %v751_v62 }
 0x14b   :  { %v752_v5 = vmax.f32 %v642_v3, 0.0  ;;  %v8003_v6 = vpop.f32.mrb[54].mxu0 }
 0x14c   :  { %v657_v7 = vadd.f32 %v8003_v6, %v8821_v30  ;;  %v651_v8 = vpop.f32.mrb[55].mxu0 }
 0x14d   :  { %v652_v9 = vadd.f32 %v8821_v30, %v651_v8  ;;  %8126 = vmatprep.mubr.f32.mxu1 %v752_v5 }
 0x14e   :  { %v755_v10 = vmax.f32 %v657_v7, 0.0  ;;  %8127 = vmatmul.mubr.f32.gmra.mrb[46].mxu1 %v753_v4 }
 0x14f   :  { %v754_v11 = vmax.f32 %v652_v9, 0.0  ;;  %v8006_v12 = vpop.f32.mrb[56].mxu0 }
 0x150   :  { %v667_v13 = vadd.f32 %v8006_v12, %v8821_v30  ;;  %v661_v14 = vpop.f32.mrb[57].mxu0 }
 0x151   :  { %v662_v15 = vadd.f32 %v8821_v30, %v661_v14  ;;  %8129 = vmatprep.mubr.f32.mxu1 %v754_v11 }
 0x152   :  { %v757_v16 = vmax.f32 %v667_v13, 0.0  ;;  %8130 = vmatmul.mubr.f32.gmra.mrb[48].mxu1 %v755_v10 }
 0x153   :  { %v756_v17 = vmax.f32 %v662_v15, 0.0  ;;  %v8009_v18 = vpop.f32.mrb[58].mxu0 }
 0x154   :  { %v677_v19 = vadd.f32 %v8009_v18, %v8821_v30  ;;  %v671_v20 = vpop.f32.mrb[59].mxu0 }
 0x155   :  { %v672_v21 = vadd.f32 %v8821_v30, %v671_v20  ;;  %8132 = vmatprep.mubr.f32.mxu1 %v756_v17 }
 0x156   :  { %v759_v22 = vmax.f32 %v677_v19, 0.0  ;;  %8133 = vmatmul.mubr.f32.gmra.mrb[50].mxu1 %v757_v16 }
 0x157   :  { %v758_v23 = vmax.f32 %v672_v21, 0.0  ;;  %v8012_v24 = vpop.f32.mrb[60].mxu0 }
 0x158   :  { %v687_v25 = vadd.f32 %v8012_v24, %v8821_v30  ;;  %v681_v26 = vpop.f32.mrb[61].mxu0 }
 0x159   :  { %v682_v27 = vadd.f32 %v8821_v30, %v681_v26  ;;  %8135 = vmatprep.mubr.f32.mxu1 %v758_v23 }
 0x15a   :  { %v761_v28 = vmax.f32 %v687_v25, 0.0  ;;  %8136 = vmatmul.mubr.f32.gmra.mrb[52].mxu1 %v759_v22 }
 0x15b   :  { %v760_v29 = vmax.f32 %v682_v27, 0.0  ;;  %v8015_v31 = vpop.f32.mrb[62].mxu0 }
 0x15c   :  { %v697_v32 = vadd.f32 %v8015_v31, %v8821_v30  ;;  %v691_v33 = vpop.f32.mrb[63].mxu0 }
 0x15d   :  { %v692_v34 = vadd.f32 %v8821_v30, %v691_v33  ;;  %8138 = vmatprep.mubr.f32.mxu1 %v760_v29  ;;  %v8900_v30 = vld [vmem:[%s11004_s5] ss:$0 sm:$0xff] }
 0x15e   :  { %v763_v35 = vmax.f32 %v697_v32, 0.0  ;;  %8139 = vmatmul.mubr.f32.gmra.mrb[54].mxu1 %v761_v28 }
 0x15f   :  { %v762_v36 = vmax.f32 %v692_v34, 0.0 }
 0x161   :  { %8141 = vmatprep.mubr.f32.mxu1 %v762_v36 }
 0x162   :  { %8142 = vmatmul.mubr.f32.gmra.mrb[56].mxu1 %v763_v35 }
 0x1b9   :  { %v8050_v38 = vpop.f32.mrb[64].mxu0 }
 0x1ba   :  { %v842_v39 = vadd.f32 %v8050_v38, %v8893_v37  ;;  %v836_v40 = vpop.f32.mrb[65].mxu0 }
 0x1bb   :  { %v837_v41 = vadd.f32 %v8893_v37, %v836_v40 }
 0x1bc   :  { %v1156_v42 = vmax.f32 %v842_v39, 0.0 }
 0x1bd   :  { %v1155_v43 = vmax.f32 %v837_v41, 0.0  ;;  %v8053_v44 = vpop.f32.mrb[66].mxu0 }
 0x1be   :  { %v852_v45 = vadd.f32 %v8053_v44, %v8893_v37  ;;  %v846_v46 = vpop.f32.mrb[67].mxu0  ;;  %v1226_v47 = vmul.f32 %v8900_v30, %v1156_v42 }
 0x1bf   :  { %v847_v48 = vadd.f32 %v8893_v37, %v846_v46  ;;  %v1225_v51 = vmul.f32 %v8900_v30, %v1155_v43 }
 0x1c0   :  { %v1158_v49 = vmax.f32 %v852_v45, 0.0  ;;  %v1293_v50 = vsel %vm1289_vm1, %v1226_v47, 0.0 }
 0x1c1   :  { %v1157_v52 = vmax.f32 %v847_v48, 0.0  ;;  %1294 = vadd.xlane.f32.xlu0 %v1293_v50  ;;  %v8056_v53 = vpop.f32.mrb[68].mxu0  ;;  %v1290_v60 = vsel %vm1289_vm1, %v1225_v51, 0.0 }
 0x1c2   :  { %v862_v54 = vadd.f32 %v8056_v53, %v8893_v37  ;;  %v856_v55 = vpop.f32.mrb[69].mxu0  ;;  %v1228_v56 = vmul.f32 %v8900_v30, %v1158_v49 }
 0x1c3   :  { %v857_v57 = vadd.f32 %v8893_v37, %v856_v55  ;;  %v1227_v61 = vmul.f32 %v8900_v30, %v1157_v52 }
 0x1c4   :  { %v1160_v58 = vmax.f32 %v862_v54, 0.0  ;;  %v1299_v59 = vsel %vm1289_vm1, %v1228_v56, 0.0 }
 0x1c5   :  { %v1159_v62 = vmax.f32 %v857_v57, 0.0  ;;  %v8059_v63 = vpop.f32.mrb[0].mxu1  ;;  %1300 = vadd.xlane.f32.xlu1 %v1299_v59  ;;  %1291 = vadd.xlane.f32.xlu0 %v1290_v60  ;;  %v1296_v5 = vsel %vm1289_vm1, %v1227_v61, 0.0 }
 0x1c6   :  { %v872_v0 = vadd.f32 %v8059_v63, %v8893_v37  ;;  %v866_v1 = vpop.f32.mrb[1].mxu1  ;;  %v1230_v6 = vmul.f32 %v8900_v30, %v1160_v58 }
 0x1c7   :  { %v867_v2 = vadd.f32 %v8893_v37, %v866_v1  ;;  %v1229_v3 = vmul.f32 %v8900_v30, %v1159_v62 }
 0x1c8   :  { %v1162_v4 = vmax.f32 %v872_v0, 0.0  ;;  %v1305_v15 = vsel %vm1289_vm1, %v1230_v6, 0.0 }
 0x1c9   :  { %v1161_v7 = vmax.f32 %v867_v2, 0.0  ;;  %v8062_v8 = vpop.f32.mrb[2].mxu1  ;;  %1297 = vadd.xlane.f32.xlu1 %v1296_v5  ;;  %v1302_v9 = vsel %vm1289_vm1, %v1229_v3, 0.0 }
 0x1ca   :  { %v882_v10 = vadd.f32 %v8062_v8, %v8893_v37  ;;  %v876_v11 = vpop.f32.mrb[3].mxu1  ;;  %1303 = vadd.xlane.f32.xlu0 %v1302_v9  ;;  %v1232_v16 = vmul.f32 %v8900_v30, %v1162_v4 }
 0x1cb   :  { %v877_v12 = vadd.f32 %v8893_v37, %v876_v11  ;;  %v1231_v13 = vmul.f32 %v8900_v30, %v1161_v7 }
 0x1cc   :  { %v1164_v14 = vmax.f32 %v882_v10, 0.0  ;;  %v1311_v25 = vsel %vm1289_vm1, %v1232_v16, 0.0 }
 0x1cd   :  { %v1163_v17 = vmax.f32 %v877_v12, 0.0  ;;  %v8065_v18 = vpop.f32.mrb[4].mxu1  ;;  %1306 = vadd.xlane.f32.xlu1 %v1305_v15  ;;  %v1308_v19 = vsel %vm1289_vm1, %v1231_v13, 0.0 }
 0x1ce   :  { %v892_v20 = vadd.f32 %v8065_v18, %v8893_v37  ;;  %v886_v21 = vpop.f32.mrb[5].mxu1  ;;  %1309 = vadd.xlane.f32.xlu0 %v1308_v19  ;;  %v1234_v26 = vmul.f32 %v8900_v30, %v1164_v14 }
 0x1cf   :  { %v887_v22 = vadd.f32 %v8893_v37, %v886_v21  ;;  %v1233_v23 = vmul.f32 %v8900_v30, %v1163_v17 }
 0x1d0   :  { %v1166_v24 = vmax.f32 %v892_v20, 0.0  ;;  %v1317_v36 = vsel %vm1289_vm1, %v1234_v26, 0.0 }
 0x1d1   :  { %v1165_v27 = vmax.f32 %v887_v22, 0.0  ;;  %v8068_v28 = vpop.f32.mrb[6].mxu1  ;;  %1312 = vadd.xlane.f32.xlu1 %v1311_v25  ;;  %v1314_v29 = vsel %vm1289_vm1, %v1233_v23, 0.0 }
 0x1d2   :  { %v902_v31 = vadd.f32 %v8068_v28, %v8893_v37  ;;  %v896_v32 = vpop.f32.mrb[7].mxu1  ;;  %1315 = vadd.xlane.f32.xlu0 %v1314_v29  ;;  %v1236_v38 = vmul.f32 %v8900_v30, %v1166_v24 }
 0x1d3   :  { %v897_v33 = vadd.f32 %v8893_v37, %v896_v32  ;;  %v1235_v34 = vmul.f32 %v8900_v30, %v1165_v27 }
 0x1d4   :  { %v1168_v35 = vmax.f32 %v902_v31, 0.0  ;;  %v1323_v47 = vsel %vm1289_vm1, %v1236_v38, 0.0 }
 0x1d5   :  { %v1167_v39 = vmax.f32 %v897_v33, 0.0  ;;  %v8071_v40 = vpop.f32.mrb[8].mxu1  ;;  %1318 = vadd.xlane.f32.xlu1 %v1317_v36  ;;  %v1320_v41 = vsel %vm1289_vm1, %v1235_v34, 0.0 }
 0x1d6   :  { %v912_v42 = vadd.f32 %v8071_v40, %v8893_v37  ;;  %v906_v43 = vpop.f32.mrb[9].mxu1  ;;  %1321 = vadd.xlane.f32.xlu0 %v1320_v41  ;;  %v1238_v48 = vmul.f32 %v8900_v30, %v1168_v35 }
 0x1d7   :  { %v907_v44 = vadd.f32 %v8893_v37, %v906_v43  ;;  %v1237_v45 = vmul.f32 %v8900_v30, %v1167_v39 }
 0x1d8   :  { %v1170_v46 = vmax.f32 %v912_v42, 0.0  ;;  %v1329_v57 = vsel %vm1289_vm1, %v1238_v48, 0.0 }
 0x1d9   :  { %v1169_v49 = vmax.f32 %v907_v44, 0.0  ;;  %v8074_v50 = vpop.f32.mrb[10].mxu1  ;;  %1324 = vadd.xlane.f32.xlu1 %v1323_v47  ;;  %v1326_v51 = vsel %vm1289_vm1, %v1237_v45, 0.0 }
 0x1da   :  { %v922_v52 = vadd.f32 %v8074_v50, %v8893_v37  ;;  %v916_v53 = vpop.f32.mrb[11].mxu1  ;;  %1327 = vadd.xlane.f32.xlu0 %v1326_v51  ;;  %v1240_v58 = vmul.f32 %v8900_v30, %v1170_v46 }
 0x1db   :  { %v917_v54 = vadd.f32 %v8893_v37, %v916_v53  ;;  %v1239_v55 = vmul.f32 %v8900_v30, %v1169_v49 }
 0x1dc   :  { %v1172_v56 = vmax.f32 %v922_v52, 0.0  ;;  %v1335_v3 = vsel %vm1289_vm1, %v1240_v58, 0.0 }
 0x1dd   :  { %v1171_v59 = vmax.f32 %v917_v54, 0.0  ;;  %v8077_v60 = vpop.f32.mrb[12].mxu1  ;;  %1330 = vadd.xlane.f32.xlu1 %v1329_v57  ;;  %v1332_v61 = vsel %vm1289_vm1, %v1239_v55, 0.0 }
 0x1de   :  { %v932_v62 = vadd.f32 %v8077_v60, %v8893_v37  ;;  %v926_v63 = vpop.f32.mrb[13].mxu1  ;;  %1333 = vadd.xlane.f32.xlu0 %v1332_v61  ;;  %v1242_v4 = vmul.f32 %v8900_v30, %v1172_v56 }
 0x1df   :  { %v927_v0 = vadd.f32 %v8893_v37, %v926_v63  ;;  %v1241_v1 = vmul.f32 %v8900_v30, %v1171_v59 }
 0x1e0   :  { %v1174_v2 = vmax.f32 %v932_v62, 0.0  ;;  %v1341_v13 = vsel %vm1289_vm1, %v1242_v4, 0.0 }
 0x1e1   :  { %v1173_v5 = vmax.f32 %v927_v0, 0.0  ;;  %v8080_v6 = vpop.f32.mrb[14].mxu1  ;;  %1336 = vadd.xlane.f32.xlu1 %v1335_v3  ;;  %v1338_v7 = vsel %vm1289_vm1, %v1241_v1, 0.0 }
 0x1e2   :  { %v942_v8 = vadd.f32 %v8080_v6, %v8893_v37  ;;  %v936_v9 = vpop.f32.mrb[15].mxu1  ;;  %1339 = vadd.xlane.f32.xlu0 %v1338_v7  ;;  %v1244_v14 = vmul.f32 %v8900_v30, %v1174_v2 }
 0x1e3   :  { %v937_v10 = vadd.f32 %v8893_v37, %v936_v9  ;;  %v1243_v11 = vmul.f32 %v8900_v30, %v1173_v5 }
 0x1e4   :  { %v1176_v12 = vmax.f32 %v942_v8, 0.0  ;;  %v1347_v23 = vsel %vm1289_vm1, %v1244_v14, 0.0 }
 0x1e5   :  { %v1175_v15 = vmax.f32 %v937_v10, 0.0  ;;  %v8083_v16 = vpop.f32.mrb[16].mxu1  ;;  %1342 = vadd.xlane.f32.xlu1 %v1341_v13  ;;  %v1344_v17 = vsel %vm1289_vm1, %v1243_v11, 0.0 }
 0x1e6   :  { %v952_v18 = vadd.f32 %v8083_v16, %v8893_v37  ;;  %v946_v19 = vpop.f32.mrb[17].mxu1  ;;  %1345 = vadd.xlane.f32.xlu0 %v1344_v17  ;;  %v1246_v24 = vmul.f32 %v8900_v30, %v1176_v12 }
 0x1e7   :  { %v947_v20 = vadd.f32 %v8893_v37, %v946_v19  ;;  %v1245_v21 = vmul.f32 %v8900_v30, %v1175_v15 }
 0x1e8   :  { %v1178_v22 = vmax.f32 %v952_v18, 0.0  ;;  %v1353_v34 = vsel %vm1289_vm1, %v1246_v24, 0.0 }
 0x1e9   :  { %v1177_v25 = vmax.f32 %v947_v20, 0.0  ;;  %v8086_v26 = vpop.f32.mrb[18].mxu1  ;;  %1348 = vadd.xlane.f32.xlu1 %v1347_v23  ;;  %v1350_v27 = vsel %vm1289_vm1, %v1245_v21, 0.0 }
 0x1ea   :  { %v962_v28 = vadd.f32 %v8086_v26, %v8893_v37  ;;  %v956_v29 = vpop.f32.mrb[19].mxu1  ;;  %1351 = vadd.xlane.f32.xlu0 %v1350_v27  ;;  %v1248_v35 = vmul.f32 %v8900_v30, %v1178_v22 }
 0x1eb   :  { %v957_v31 = vadd.f32 %v8893_v37, %v956_v29  ;;  %v1247_v32 = vmul.f32 %v8900_v30, %v1177_v25 }
 0x1ec   :  { %v1180_v33 = vmax.f32 %v962_v28, 0.0  ;;  %v1359_v45 = vsel %vm1289_vm1, %v1248_v35, 0.0 }
 0x1ed   :  { %v1179_v36 = vmax.f32 %v957_v31, 0.0  ;;  %v8089_v38 = vpop.f32.mrb[20].mxu1  ;;  %1354 = vadd.xlane.f32.xlu1 %v1353_v34  ;;  %v1356_v39 = vsel %vm1289_vm1, %v1247_v32, 0.0 }
 0x1ee   :  { %v972_v40 = vadd.f32 %v8089_v38, %v8893_v37  ;;  %v966_v41 = vpop.f32.mrb[21].mxu1  ;;  %1357 = vadd.xlane.f32.xlu0 %v1356_v39  ;;  %v1250_v46 = vmul.f32 %v8900_v30, %v1180_v33 }
 0x1ef   :  { %v967_v42 = vadd.f32 %v8893_v37, %v966_v41  ;;  %v1249_v43 = vmul.f32 %v8900_v30, %v1179_v36 }
 0x1f0   :  { %v1182_v44 = vmax.f32 %v972_v40, 0.0  ;;  %v1365_v55 = vsel %vm1289_vm1, %v1250_v46, 0.0 }
 0x1f1   :  { %v1181_v47 = vmax.f32 %v967_v42, 0.0  ;;  %v8092_v48 = vpop.f32.mrb[22].mxu1  ;;  %1360 = vadd.xlane.f32.xlu1 %v1359_v45  ;;  %v1362_v49 = vsel %vm1289_vm1, %v1249_v43, 0.0 }
 0x1f2   :  { %v982_v50 = vadd.f32 %v8092_v48, %v8893_v37  ;;  %v976_v51 = vpop.f32.mrb[23].mxu1  ;;  %1363 = vadd.xlane.f32.xlu0 %v1362_v49  ;;  %v1252_v56 = vmul.f32 %v8900_v30, %v1182_v44 }
 0x1f3   :  { %v977_v52 = vadd.f32 %v8893_v37, %v976_v51  ;;  %v1251_v53 = vmul.f32 %v8900_v30, %v1181_v47 }
 0x1f4   :  { %v1184_v54 = vmax.f32 %v982_v50, 0.0  ;;  %v1371_v1 = vsel %vm1289_vm1, %v1252_v56, 0.0 }
 0x1f5   :  { %v1183_v57 = vmax.f32 %v977_v52, 0.0  ;;  %v8095_v58 = vpop.f32.mrb[24].mxu1  ;;  %1366 = vadd.xlane.f32.xlu1 %v1365_v55  ;;  %v1368_v59 = vsel %vm1289_vm1, %v1251_v53, 0.0 }
 0x1f6   :  { %v992_v60 = vadd.f32 %v8095_v58, %v8893_v37  ;;  %v986_v61 = vpop.f32.mrb[25].mxu1  ;;  %1369 = vadd.xlane.f32.xlu0 %v1368_v59  ;;  %v1254_v2 = vmul.f32 %v8900_v30, %v1184_v54 }
 0x1f7   :  { %v987_v62 = vadd.f32 %v8893_v37, %v986_v61  ;;  %v1253_v63 = vmul.f32 %v8900_v30, %v1183_v57 }
 0x1f8   :  { %v1186_v0 = vmax.f32 %v992_v60, 0.0  ;;  %v1377_v11 = vsel %vm1289_vm1, %v1254_v2, 0.0 }
 0x1f9   :  { %v1185_v3 = vmax.f32 %v987_v62, 0.0  ;;  %v8098_v4 = vpop.f32.mrb[26].mxu1  ;;  %1372 = vadd.xlane.f32.xlu1 %v1371_v1  ;;  %v1374_v5 = vsel %vm1289_vm1, %v1253_v63, 0.0 }
 0x1fa   :  { %v1002_v6 = vadd.f32 %v8098_v4, %v8893_v37  ;;  %v996_v7 = vpop.f32.mrb[27].mxu1  ;;  %1375 = vadd.xlane.f32.xlu0 %v1374_v5  ;;  %v1256_v12 = vmul.f32 %v8900_v30, %v1186_v0 }
 0x1fb   :  { %v997_v8 = vadd.f32 %v8893_v37, %v996_v7  ;;  %v1255_v9 = vmul.f32 %v8900_v30, %v1185_v3 }
 0x1fc   :  { %v1188_v10 = vmax.f32 %v1002_v6, 0.0  ;;  %v1383_v21 = vsel %vm1289_vm1, %v1256_v12, 0.0 }
 0x1fd   :  { %v1187_v13 = vmax.f32 %v997_v8, 0.0  ;;  %v8101_v14 = vpop.f32.mrb[28].mxu1  ;;  %1378 = vadd.xlane.f32.xlu1 %v1377_v11  ;;  %v1380_v15 = vsel %vm1289_vm1, %v1255_v9, 0.0 }
 0x1fe   :  { %v1012_v16 = vadd.f32 %v8101_v14, %v8893_v37  ;;  %v1006_v17 = vpop.f32.mrb[29].mxu1  ;;  %1381 = vadd.xlane.f32.xlu0 %v1380_v15  ;;  %v1258_v22 = vmul.f32 %v8900_v30, %v1188_v10 }
 0x1ff   :  { %v1007_v18 = vadd.f32 %v8893_v37, %v1006_v17  ;;  %v1257_v19 = vmul.f32 %v8900_v30, %v1187_v13 }
 0x200   :  { %v1190_v20 = vmax.f32 %v1012_v16, 0.0  ;;  %v1389_v32 = vsel %vm1289_vm1, %v1258_v22, 0.0 }
 0x201   :  { %v1189_v23 = vmax.f32 %v1007_v18, 0.0  ;;  %v8104_v24 = vpop.f32.mrb[30].mxu1  ;;  %1384 = vadd.xlane.f32.xlu1 %v1383_v21  ;;  %v1386_v25 = vsel %vm1289_vm1, %v1257_v19, 0.0 }
 0x202   :  { %v1022_v26 = vadd.f32 %v8104_v24, %v8893_v37  ;;  %v1016_v27 = vpop.f32.mrb[31].mxu1  ;;  %1387 = vadd.xlane.f32.xlu0 %v1386_v25  ;;  %v1260_v33 = vmul.f32 %v8900_v30, %v1190_v20 }
 0x203   :  { %v1017_v28 = vadd.f32 %v8893_v37, %v1016_v27  ;;  %v1259_v29 = vmul.f32 %v8900_v30, %v1189_v23 }
 0x204   :  { %v1192_v31 = vmax.f32 %v1022_v26, 0.0  ;;  %v1395_v43 = vsel %vm1289_vm1, %v1260_v33, 0.0 }
 0x205   :  { %v1191_v34 = vmax.f32 %v1017_v28, 0.0  ;;  %v8107_v35 = vpop.f32.mrb[32].mxu1  ;;  %1390 = vadd.xlane.f32.xlu1 %v1389_v32  ;;  %v1392_v36 = vsel %vm1289_vm1, %v1259_v29, 0.0 }
 0x206   :  { %v1032_v38 = vadd.f32 %v8107_v35, %v8893_v37  ;;  %v1026_v39 = vpop.f32.mrb[33].mxu1  ;;  %1393 = vadd.xlane.f32.xlu0 %v1392_v36  ;;  %v1262_v44 = vmul.f32 %v8900_v30, %v1192_v31 }
 0x207   :  { %v1027_v40 = vadd.f32 %v8893_v37, %v1026_v39  ;;  %v1261_v41 = vmul.f32 %v8900_v30, %v1191_v34 }
 0x208   :  { %v1194_v42 = vmax.f32 %v1032_v38, 0.0  ;;  %v1401_v53 = vsel %vm1289_vm1, %v1262_v44, 0.0 }
 0x209   :  { %v1193_v45 = vmax.f32 %v1027_v40, 0.0  ;;  %v8110_v46 = vpop.f32.mrb[34].mxu1  ;;  %1396 = vadd.xlane.f32.xlu1 %v1395_v43  ;;  %v1398_v47 = vsel %vm1289_vm1, %v1261_v41, 0.0 }
 0x20a   :  { %v1042_v48 = vadd.f32 %v8110_v46, %v8893_v37  ;;  %v1036_v49 = vpop.f32.mrb[35].mxu1  ;;  %1399 = vadd.xlane.f32.xlu0 %v1398_v47  ;;  %v1264_v54 = vmul.f32 %v8900_v30, %v1194_v42 }
 0x20b   :  { %v1037_v50 = vadd.f32 %v8893_v37, %v1036_v49  ;;  %v1263_v51 = vmul.f32 %v8900_v30, %v1193_v45 }
 0x20c   :  { %v1196_v52 = vmax.f32 %v1042_v48, 0.0  ;;  %v1407_v63 = vsel %vm1289_vm1, %v1264_v54, 0.0 }
 0x20d   :  { %v1195_v55 = vmax.f32 %v1037_v50, 0.0  ;;  %v8113_v56 = vpop.f32.mrb[36].mxu1  ;;  %1402 = vadd.xlane.f32.xlu1 %v1401_v53  ;;  %v1404_v57 = vsel %vm1289_vm1, %v1263_v51, 0.0 }
 0x20e   :  { %v1052_v58 = vadd.f32 %v8113_v56, %v8893_v37  ;;  %v1046_v59 = vpop.f32.mrb[37].mxu1  ;;  %1405 = vadd.xlane.f32.xlu0 %v1404_v57  ;;  %v1266_v0 = vmul.f32 %v8900_v30, %v1196_v52 }
 0x20f   :  { %v1047_v60 = vadd.f32 %v8893_v37, %v1046_v59  ;;  %v1265_v61 = vmul.f32 %v8900_v30, %v1195_v55 }
 0x210   :  { %v1198_v62 = vmax.f32 %v1052_v58, 0.0  ;;  %v1413_v9 = vsel %vm1289_vm1, %v1266_v0, 0.0 }
 0x211   :  { %v1197_v1 = vmax.f32 %v1047_v60, 0.0  ;;  %v8116_v2 = vpop.f32.mrb[38].mxu1  ;;  %1408 = vadd.xlane.f32.xlu1 %v1407_v63  ;;  %v1410_v3 = vsel %vm1289_vm1, %v1265_v61, 0.0 }
 0x212   :  { %v1062_v4 = vadd.f32 %v8116_v2, %v8893_v37  ;;  %v1056_v5 = vpop.f32.mrb[39].mxu1  ;;  %1411 = vadd.xlane.f32.xlu0 %v1410_v3  ;;  %v1268_v10 = vmul.f32 %v8900_v30, %v1198_v62 }
 0x213   :  { %v1057_v6 = vadd.f32 %v8893_v37, %v1056_v5  ;;  %v1267_v7 = vmul.f32 %v8900_v30, %v1197_v1 }
 0x214   :  { %v1200_v8 = vmax.f32 %v1062_v4, 0.0  ;;  %v1419_v19 = vsel %vm1289_vm1, %v1268_v10, 0.0 }
 0x215   :  { %v1199_v11 = vmax.f32 %v1057_v6, 0.0  ;;  %v8119_v12 = vpop.f32.mrb[40].mxu1  ;;  %1414 = vadd.xlane.f32.xlu1 %v1413_v9  ;;  %v1416_v13 = vsel %vm1289_vm1, %v1267_v7, 0.0 }
 0x216   :  { %v1072_v14 = vadd.f32 %v8119_v12, %v8893_v37  ;;  %v1066_v15 = vpop.f32.mrb[41].mxu1  ;;  %1417 = vadd.xlane.f32.xlu0 %v1416_v13  ;;  %v1270_v20 = vmul.f32 %v8900_v30, %v1200_v8 }
 0x217   :  { %v1067_v16 = vadd.f32 %v8893_v37, %v1066_v15  ;;  %v1269_v17 = vmul.f32 %v8900_v30, %v1199_v11 }
 0x218   :  { %v1202_v18 = vmax.f32 %v1072_v14, 0.0  ;;  %v1425_v29 = vsel %vm1289_vm1, %v1270_v20, 0.0 }
 0x219   :  { %v1201_v21 = vmax.f32 %v1067_v16, 0.0  ;;  %v8122_v22 = vpop.f32.mrb[42].mxu1  ;;  %1420 = vadd.xlane.f32.xlu1 %v1419_v19  ;;  %v1422_v23 = vsel %vm1289_vm1, %v1269_v17, 0.0 }
 0x21a   :  { %v1082_v24 = vadd.f32 %v8122_v22, %v8893_v37  ;;  %v1076_v25 = vpop.f32.mrb[43].mxu1  ;;  %1423 = vadd.xlane.f32.xlu0 %v1422_v23  ;;  %v1272_v31 = vmul.f32 %v8900_v30, %v1202_v18 }
 0x21b   :  { %v1077_v26 = vadd.f32 %v8893_v37, %v1076_v25  ;;  %v1271_v27 = vmul.f32 %v8900_v30, %v1201_v21 }
 0x21c   :  { %v1204_v28 = vmax.f32 %v1082_v24, 0.0  ;;  %v1431_v41 = vsel %vm1289_vm1, %v1272_v31, 0.0 }
 0x21d   :  { %v1203_v32 = vmax.f32 %v1077_v26, 0.0  ;;  %v8125_v33 = vpop.f32.mrb[44].mxu1  ;;  %1426 = vadd.xlane.f32.xlu1 %v1425_v29  ;;  %v1428_v34 = vsel %vm1289_vm1, %v1271_v27, 0.0 }
 0x21e   :  { %v1092_v35 = vadd.f32 %v8125_v33, %v8893_v37  ;;  %v1086_v36 = vpop.f32.mrb[45].mxu1  ;;  %1429 = vadd.xlane.f32.xlu0 %v1428_v34  ;;  %v1274_v42 = vmul.f32 %v8900_v30, %v1204_v28 }
 0x21f   :  { %v1087_v38 = vadd.f32 %v8893_v37, %v1086_v36  ;;  %v1273_v39 = vmul.f32 %v8900_v30, %v1203_v32 }
 0x220   :  { %v1206_v40 = vmax.f32 %v1092_v35, 0.0  ;;  %v1437_v51 = vsel %vm1289_vm1, %v1274_v42, 0.0 }
 0x221   :  { %v1205_v43 = vmax.f32 %v1087_v38, 0.0  ;;  %v8128_v44 = vpop.f32.mrb[46].mxu1  ;;  %1432 = vadd.xlane.f32.xlu1 %v1431_v41  ;;  %v1434_v45 = vsel %vm1289_vm1, %v1273_v39, 0.0 }
 0x222   :  { %v1102_v46 = vadd.f32 %v8128_v44, %v8893_v37  ;;  %v1096_v47 = vpop.f32.mrb[47].mxu1  ;;  %1435 = vadd.xlane.f32.xlu0 %v1434_v45  ;;  %v1276_v52 = vmul.f32 %v8900_v30, %v1206_v40 }
 0x223   :  { %v1097_v48 = vadd.f32 %v8893_v37, %v1096_v47  ;;  %v1275_v49 = vmul.f32 %v8900_v30, %v1205_v43  ;;  %v11006_v47 = vlaneseq }
 0x224   :  { %v1208_v50 = vmax.f32 %v1102_v46, 0.0  ;;  %v1443_v61 = vsel %vm1289_vm1, %v1276_v52, 0.0 }
 0x225   :  { %v1207_v53 = vmax.f32 %v1097_v48, 0.0  ;;  %v8131_v54 = vpop.f32.mrb[48].mxu1  ;;  %1438 = vadd.xlane.f32.xlu1 %v1437_v51  ;;  %v1440_v55 = vsel %vm1289_vm1, %v1275_v49, 0.0  ;;  %v9093_v48 = vshrl.u32 %v11006_v47, 7 }
 0x226   :  { %v1112_v56 = vadd.f32 %v8131_v54, %v8893_v37  ;;  %v1106_v57 = vpop.f32.mrb[49].mxu1  ;;  %1441 = vadd.xlane.f32.xlu0 %v1440_v55  ;;  %v1278_v62 = vmul.f32 %v8900_v30, %v1208_v50  ;;  %v1485_v50 = vpop.permute.xlu0 %1484 }
 0x227   :  { %v1107_v58 = vadd.f32 %v8893_v37, %v1106_v57  ;;  %v1277_v59 = vmul.f32 %v8900_v30, %v1207_v53  ;;  %v9096_v49 = vsub.s32 0, %v9093_v48 }
 0x228   :  { %v1210_v60 = vmax.f32 %v1112_v56, 0.0  ;;  %v1449_v7 = vsel %vm1289_vm1, %v1278_v62, 0.0 }
 0x229   :  { %v1209_v63 = vmax.f32 %v1107_v58, 0.0  ;;  %v8134_v0 = vpop.f32.mrb[50].mxu1  ;;  %1444 = vadd.xlane.f32.xlu1 %v1443_v61  ;;  %v1446_v1 = vsel %vm1289_vm1, %v1277_v59, 0.0  ;;  %v9099_v51 = vrot.slane %v1485_v50, %v9096_v49 }
 0x22a   :  { %v1122_v2 = vadd.f32 %v8134_v0, %v8893_v37  ;;  %v1116_v3 = vpop.f32.mrb[51].mxu1  ;;  %1447 = vadd.xlane.f32.xlu0 %v1446_v1  ;;  %v1280_v8 = vmul.f32 %v8900_v30, %v1210_v60 }
 0x22b   :  { %v1117_v4 = vadd.f32 %v8893_v37, %v1116_v3  ;;  %v1279_v5 = vmul.f32 %v8900_v30, %v1209_v63 }
 0x22c   :  { %v1212_v6 = vmax.f32 %v1122_v2, 0.0  ;;  %v1455_v17 = vsel %vm1289_vm1, %v1280_v8, 0.0 }
 0x22d   :  { %v1211_v9 = vmax.f32 %v1117_v4, 0.0  ;;  %v8137_v10 = vpop.f32.mrb[52].mxu1  ;;  %1450 = vadd.xlane.f32.xlu1 %v1449_v7  ;;  %v1452_v11 = vsel %vm1289_vm1, %v1279_v5, 0.0 }
 0x22e   :  { %v1132_v12 = vadd.f32 %v8137_v10, %v8893_v37  ;;  %v1126_v13 = vpop.f32.mrb[53].mxu1  ;;  %1453 = vadd.xlane.f32.xlu0 %v1452_v11  ;;  %v1282_v18 = vmul.f32 %v8900_v30, %v1212_v6 }
 0x22f   :  { %v1127_v14 = vadd.f32 %v8893_v37, %v1126_v13  ;;  %v1281_v15 = vmul.f32 %v8900_v30, %v1211_v9 }
 0x230   :  { %v1214_v16 = vmax.f32 %v1132_v12, 0.0  ;;  %v1461_v27 = vsel %vm1289_vm1, %v1282_v18, 0.0 }
 0x231   :  { %v1213_v19 = vmax.f32 %v1127_v14, 0.0  ;;  %v8140_v20 = vpop.f32.mrb[54].mxu1  ;;  %1456 = vadd.xlane.f32.xlu1 %v1455_v17  ;;  %v1458_v21 = vsel %vm1289_vm1, %v1281_v15, 0.0 }
 0x232   :  { %v1142_v22 = vadd.f32 %v8140_v20, %v8893_v37  ;;  %v1136_v23 = vpop.f32.mrb[55].mxu1  ;;  %1459 = vadd.xlane.f32.xlu0 %v1458_v21  ;;  %v1284_v28 = vmul.f32 %v8900_v30, %v1214_v16 }
 0x233   :  { %v1137_v24 = vadd.f32 %v8893_v37, %v1136_v23  ;;  %v1283_v25 = vmul.f32 %v8900_v30, %v1213_v19 }
 0x234   :  { %v1216_v26 = vmax.f32 %v1142_v22, 0.0  ;;  %v1467_v40 = vsel %vm1289_vm1, %v1284_v28, 0.0  ;;  %v8461_v28 = vmov 1966171168  }
 0x235   :  { %v1215_v29 = vmax.f32 %v1137_v24, 0.0  ;;  %v8143_v31 = vpop.f32.mrb[56].mxu1  ;;  %1462 = vadd.xlane.f32.xlu1 %v1461_v27  ;;  %v1464_v32 = vsel %vm1289_vm1, %v1283_v25, 0.0 }
 0x236   :  { %v1152_v33 = vadd.f32 %v8143_v31, %v8893_v37  ;;  %v1146_v34 = vpop.f32.mrb[57].mxu1  ;;  %1465 = vadd.xlane.f32.xlu0 %v1464_v32  ;;  %v1286_v35 = vmul.f32 %v8900_v30, %v1216_v26 }
 0x237   :  { %v1147_v36 = vadd.f32 %v8893_v37, %v1146_v34  ;;  %v1285_v38 = vmul.f32 %v8900_v30, %v1215_v29  ;;  %v3992_v29 = vunpack.c.l.s4 %v8461_v28 }
 0x238   :  { %v1218_v39 = vmax.f32 %v1152_v33, 0.0  ;;  %v1473_v43 = vsel %vm1289_vm1, %v1286_v35, 0.0  ;;  %v9113_v35 = vsub.s32 1, %v9093_v48 }
 0x239   :  { %v1217_v41 = vmax.f32 %v1147_v36, 0.0  ;;  %1468 = vadd.xlane.f32.xlu1 %v1467_v40  ;;  %v1470_v42 = vsel %vm1289_vm1, %v1285_v38, 0.0  ;;  %v3993_v50 = vunpack.c.0.s8 %v3992_v29 }
 0x23a   :  { %1471 = vadd.xlane.f32.xlu0 %v1470_v42  ;;  %v1288_v44 = vmul.f32 %v8900_v30, %v1218_v39  ;;  %v9116_v39 = vsub.s32 2, %v9093_v48  ;;  %v9119_v42 = vsub.s32 3, %v9093_v48 }
 0x23b   :  { %v1287_v45 = vmul.f32 %v8900_v30, %v1217_v41 }
 0x23c   :  { %v1479_v37 = vsel %vm1289_vm1, %v1288_v44, 0.0 }
 0x23d   :  { %1474 = vadd.xlane.f32.xlu1 %v1473_v43  ;;  %v1476_v46 = vsel %vm1289_vm1, %v1287_v45, 0.0  ;;  %v9122_v43 = vsub.s32 4, %v9093_v48 }
 0x23e   :  { %1477 = vadd.xlane.f32.xlu0 %v1476_v46 }
 0x241   :  { %1480 = vadd.xlane.f32.xlu1 %v1479_v37 }
 0x24e   :  { %v1295_v52 = vpop.xlane.xlu0 %1294 }
 0x24f   :  { %v1492_v30 = vadd.f32 %v9099_v51, %v1295_v52 }
 0x251   :  { %v1556_v53 = vsub.f32 0.0, %v1492_v30 }
 0x252   :  { %v1301_v54 = vpop.xlane.xlu1 %1300  ;;  %v1292_v55 = vpop.xlane.xlu0 %1291 }
 0x253   :  { %v1621_v56 = vmul.f32 1.442695, %v1556_v53  ;;  %v1494_v57 = vadd.f32 %v9099_v51, %v1301_v54  ;;  %v1491_v58 = vadd.f32 %v9099_v51, %v1292_v55 }
 0x255   :  { %8204 = vpow2.f32 %v1621_v56  ;;  %v1558_v59 = vsub.f32 0.0, %v1494_v57  ;;  %v1555_v60 = vsub.f32 0.0, %v1491_v58  ;;  %v9127_v57 = vsub.s32 5, %v9093_v48 }
 0x256   :  { %v1298_v61 = vpop.xlane.xlu1 %1297 }
 0x257   :  { %v1625_v62 = vmul.f32 1.442695, %v1558_v59  ;;  %v1619_v63 = vmul.f32 1.442695, %v1555_v60  ;;  %v1493_v0 = vadd.f32 %v9099_v51, %v1298_v61  ;;  %v1304_v1 = vpop.xlane.xlu0 %1303  ;;  %v9130_v60 = vsub.s32 6, %v9093_v48 }
 0x258   :  { %v1495_v2 = vadd.f32 %v9099_v51, %v1304_v1  ;;  %v9133_v61 = vsub.s32 7, %v9093_v48 }
 0x259   :  { %8206 = vpow2.f32 %v1625_v62  ;;  %v1557_v3 = vsub.f32 0.0, %v1493_v0 }
 0x25a   :  { %8208 = vpow2.f32 %v1619_v63  ;;  %v1559_v4 = vsub.f32 0.0, %v1495_v2  ;;  %v1307_v5 = vpop.xlane.xlu1 %1306  ;;  %v9137_v2 = vsub.s32 %v3993_v50, %v9093_v48 }
 0x25b   :  { %v1623_v6 = vmul.f32 1.442695, %v1557_v3  ;;  %v1496_v7 = vadd.f32 %v9099_v51, %v1307_v5  ;;  %v1310_v8 = vpop.xlane.xlu0 %1309 }
 0x25c   :  { %v1627_v9 = vmul.f32 1.442695, %v1559_v4  ;;  %v1497_v10 = vadd.f32 %v9099_v51, %v1310_v8  ;;  %11009 = vst [vmem:[#allocation3_spill] sm:$0xff] %v9137_v2 }
 0x25d   :  { %8210 = vpow2.f32 %v1623_v6  ;;  %v1560_v11 = vsub.f32 0.0, %v1496_v7 }
 0x25e   :  { %8212 = vpow2.f32 %v1627_v9  ;;  %v1561_v12 = vsub.f32 0.0, %v1497_v10  ;;  %v1313_v13 = vpop.xlane.xlu1 %1312 }
 0x25f   :  { %v8205_v14 = vpop.eup %8204  ;;  %v1629_v15 = vmul.f32 1.442695, %v1560_v11  ;;  %v1498_v16 = vadd.f32 %v9099_v51, %v1313_v13  ;;  %v1316_v17 = vpop.xlane.xlu0 %1315 }
 0x260   :  { %v1748_v18 = vadd.f32 1.0, %v8205_v14  ;;  %v1631_v19 = vmul.f32 1.442695, %v1561_v12  ;;  %v1499_v20 = vadd.f32 %v9099_v51, %v1316_v17 }
 0x261   :  { %8214 = vpow2.f32 %v1629_v15  ;;  %v1562_v21 = vsub.f32 0.0, %v1498_v16 }
 0x262   :  { %8216 = vrcp.f32 %v1748_v18  ;;  %v1563_v22 = vsub.f32 0.0, %v1499_v20  ;;  %v1319_v23 = vpop.xlane.xlu1 %1318 }
 0x263   :  { %v8207_v24 = vpop.eup %8206  ;;  %8218 = vpow2.f32 %v1631_v19  ;;  %v1633_v25 = vmul.f32 1.442695, %v1562_v21  ;;  %v1500_v26 = vadd.f32 %v9099_v51, %v1319_v23  ;;  %v1322_v27 = vpop.xlane.xlu0 %1321 }
 0x264   :  { %v8209_v31 = vpop.eup %8208  ;;  %v1750_v32 = vadd.f32 1.0, %v8207_v24  ;;  %v1635_v33 = vmul.f32 1.442695, %v1563_v22  ;;  %v1501_v34 = vadd.f32 %v9099_v51, %v1322_v27 }
 0x265   :  { %v1747_v36 = vadd.f32 1.0, %v8209_v31  ;;  %8220 = vpow2.f32 %v1633_v25  ;;  %v1564_v38 = vsub.f32 0.0, %v1500_v26 }
 0x266   :  { %8222 = vrcp.f32 %v1750_v32  ;;  %v1565_v40 = vsub.f32 0.0, %v1501_v34  ;;  %v1325_v41 = vpop.xlane.xlu1 %1324 }
 0x267   :  { %v8211_v44 = vpop.eup %8210  ;;  %8224 = vrcp.f32 %v1747_v36  ;;  %v1637_v45 = vmul.f32 1.442695, %v1564_v38  ;;  %v1502_v46 = vadd.f32 %v9099_v51, %v1325_v41  ;;  %v1328_v37 = vpop.xlane.xlu0 %1327 }
 0x268   :  { %v8213_v52 = vpop.eup %8212  ;;  %v1749_v30 = vadd.f32 1.0, %v8211_v44  ;;  %8226 = vpow2.f32 %v1635_v33  ;;  %v1639_v53 = vmul.f32 1.442695, %v1565_v40  ;;  %v1503_v54 = vadd.f32 %v9099_v51, %v1328_v37 }
 0x269   :  { %v1751_v55 = vadd.f32 1.0, %v8213_v52  ;;  %8228 = vpow2.f32 %v1637_v45  ;;  %v1566_v56 = vsub.f32 0.0, %v1502_v46 }
 0x26a   :  { %8230 = vrcp.f32 %v1749_v30  ;;  %v1567_v58 = vsub.f32 0.0, %v1503_v54  ;;  %v1331_v59 = vpop.xlane.xlu1 %1330 }
 0x26b   :  { %v8215_v62 = vpop.eup %8214  ;;  %8232 = vrcp.f32 %v1751_v55  ;;  %v1641_v63 = vmul.f32 1.442695, %v1566_v56  ;;  %v1504_v0 = vadd.f32 %v9099_v51, %v1331_v59  ;;  %v1334_v1 = vpop.xlane.xlu0 %1333 }
 0x26c   :  { %v8217_v3 = vpop.eup %8216  ;;  %v1752_v4 = vadd.f32 1.0, %v8215_v62  ;;  %8234 = vpow2.f32 %v1639_v53  ;;  %v1643_v5 = vmul.f32 1.442695, %v1567_v58  ;;  %v1505_v6 = vadd.f32 %v9099_v51, %v1334_v1 }
 0x26d   :  { %v8219_v7 = vpop.eup %8218  ;;  %8236 = vpow2.f32 %v1641_v63  ;;  %v1568_v8 = vsub.f32 0.0, %v1504_v0  ;;  %v1974_v9 = vrot.slane %v8217_v3, %v9096_v49  ;;  %v1978_v10 = vrot.slane %v8217_v3, %v9113_v35 }
 0x26e   :  { %8238 = vrcp.f32 %v1752_v4  ;;  %v1753_v11 = vadd.f32 1.0, %v8219_v7  ;;  %v1569_v12 = vsub.f32 0.0, %v1505_v6  ;;  %v1337_v13 = vpop.xlane.xlu1 %1336  ;;  %v1982_v14 = vrot.slane %v8217_v3, %v9116_v39 }
 0x26f   :  { %v8221_v15 = vpop.eup %8220  ;;  %8240 = vpow2.f32 %v1643_v5  ;;  %v1645_v16 = vmul.f32 1.442695, %v1568_v8  ;;  %v1506_v17 = vadd.f32 %v9099_v51, %v1337_v13  ;;  %v1340_v18 = vpop.xlane.xlu0 %1339  ;;  %v1986_v19 = vrot.slane %v8217_v3, %v9119_v42 }
 0x270   :  { %v9145_v20 = vpop.eup %8222  ;;  %8242 = vrcp.f32 %v1753_v11  ;;  %v1754_v21 = vadd.f32 1.0, %v8221_v15  ;;  %v1647_v22 = vmul.f32 1.442695, %v1569_v12  ;;  %v1507_v23 = vadd.f32 %v9099_v51, %v1340_v18 }
 0x271   :  { %v9148_v24 = vpop.eup %8224  ;;  %8244 = vpow2.f32 %v1645_v16  ;;  %v1570_v25 = vsub.f32 0.0, %v1506_v17  ;;  %v1990_v26 = vrot.slane %v8217_v3, %v9122_v43  ;;  %v1994_v27 = vrot.slane %v8217_v3, %v9127_v57 }
 0x272   :  { %v8227_v28 = vpop.eup %8226  ;;  %8246 = vrcp.f32 %v1754_v21  ;;  %v1571_v29 = vsub.f32 0.0, %v1507_v23  ;;  %v1343_v31 = vpop.xlane.xlu1 %1342  ;;  %v1998_v32 = vrot.slane %v8217_v3, %v9130_v60  ;;  %v2002_v33 = vrot.slane %v8217_v3, %v9133_v61 }
 0x273   :  { %v8229_v34 = vpop.eup %8228  ;;  %v1755_v36 = vadd.f32 1.0, %v8227_v28  ;;  %8248 = vpow2.f32 %v1647_v22  ;;  %v1649_v38 = vmul.f32 1.442695, %v1570_v25  ;;  %v1508_v40 = vadd.f32 %v9099_v51, %v1343_v31  ;;  %v1346_v41 = vpop.xlane.xlu0 %1345 }
 0x274   :  { %v9155_v44 = vpop.eup %8230  ;;  %v1756_v45 = vadd.f32 1.0, %v8229_v34  ;;  %v1651_v46 = vmul.f32 1.442695, %v1571_v29  ;;  %v1509_v37 = vadd.f32 %v9099_v51, %v1346_v41  ;;  %v4036_v50 = vcombine.low %v1974_v9, %v1978_v10 }
 0x275   :  { %v9158_v52 = vpop.eup %8232  ;;  %8250 = vrcp.f32 %v1755_v36  ;;  %v1572_v30 = vsub.f32 0.0, %v1508_v40  ;;  %v4037_v53 = vcombine.low %v1982_v14, %v1986_v19  ;;  %v4038_v54 = vcombine.low %v1990_v26, %v1994_v27 }
 0x276   :  { %v8235_v55 = vpop.eup %8234  ;;  %8252 = vrcp.f32 %v1756_v45  ;;  %v1573_v56 = vsub.f32 0.0, %v1509_v37  ;;  %v1349_v58 = vpop.xlane.xlu1 %1348  ;;  %v4039_v59 = vcombine.low %v1998_v32, %v2002_v33  ;;  %v4046_v62 = vrot.slane %v4036_v50, %v9137_v2 }
 0x277   :  { %v8237_v63 = vpop.eup %8236  ;;  %v1757_v0 = vadd.f32 1.0, %v8235_v55  ;;  %8254 = vpow2.f32 %v1649_v38  ;;  %v1653_v1 = vmul.f32 1.442695, %v1572_v30  ;;  %v1510_v3 = vadd.f32 %v9099_v51, %v1349_v58  ;;  %v1352_v4 = vpop.xlane.xlu0 %1351 }
 0x278   :  { %v9162_v5 = vpop.eup %8238  ;;  %v1758_v6 = vadd.f32 1.0, %v8237_v63  ;;  %8256 = vpow2.f32 %v1651_v46  ;;  %v1655_v7 = vmul.f32 1.442695, %v1573_v56  ;;  %v1511_v8 = vadd.f32 %v9099_v51, %v1352_v4 }
 0x279   :  { %v8241_v9 = vpop.eup %8240  ;;  %8258 = vrcp.f32 %v1757_v0  ;;  %v1574_v10 = vsub.f32 0.0, %v1510_v3  ;;  %v4053_v11 = vrot.slane %v4037_v53, %v9137_v2  ;;  %v4060_v12 = vrot.slane %v4038_v54, %v9137_v2 }
 0x27a   :  { %v9167_v13 = vpop.eup %8242  ;;  %8260 = vrcp.f32 %v1758_v6  ;;  %v1759_v14 = vadd.f32 1.0, %v8241_v9  ;;  %v1575_v15 = vsub.f32 0.0, %v1511_v8  ;;  %v4067_v16 = vrot.slane %v4039_v59, %v9137_v2  ;;  %v1355_v17 = vpop.xlane.xlu1 %1354 }
 0x27b   :  { %v8245_v18 = vpop.eup %8244  ;;  %8262 = vpow2.f32 %v1653_v1  ;;  %v1657_v19 = vmul.f32 1.442695, %v1574_v10  ;;  %v4068_v21 = vcombine.low %v4046_v62, %v4053_v11  ;;  %v1512_v22 = vadd.f32 %v9099_v51, %v1355_v17  ;;  %v1358_v23 = vpop.xlane.xlu0 %1357 }
 0x27c   :  { %v9171_v25 = vpop.eup %8246  ;;  %8264 = vrcp.f32 %v1759_v14  ;;  %v1760_v26 = vadd.f32 1.0, %v8245_v18  ;;  %v1659_v27 = vmul.f32 1.442695, %v1575_v15  ;;  %v4069_v28 = vcombine.low %v4060_v12, %v4067_v16 }
 0x27d   :  { %v8249_v29 = vpop.eup %8248  ;;  %8266 = vpow2.f32 %v1655_v7  ;;  %v4076_v31 = vrot.slane %v4068_v21, %v9137_v2  ;;  %v1576_v32 = vsub.f32 0.0, %v1512_v22  ;;  %v1513_v33 = vadd.f32 %v9099_v51, %v1358_v23 }
 0x27e   :  { %8268 = vrcp.f32 %v1760_v26  ;;  %v1761_v34 = vadd.f32 1.0, %v8249_v29  ;;  %v4083_v36 = vrot.slane %v4069_v28, %v9137_v2  ;;  %v1942_v38 = vrot.slane %v9148_v24, %v9096_v49  ;;  %v1361_v59 = vpop.xlane.xlu1 %1360 }
 0x27f   :  { %v9178_v40 = vpop.eup %8250  ;;  %8270 = vpow2.f32 %v1657_v19  ;;  %v1661_v41 = vmul.f32 1.442695, %v1576_v32  ;;  %v1577_v45 = vsub.f32 0.0, %v1513_v33  ;;  %v1946_v46 = vrot.slane %v9148_v24, %v9113_v35  ;;  %v1364_v3 = vpop.xlane.xlu0 %1363 }
 0x280   :  { %v9182_v37 = vpop.eup %8252  ;;  %8272 = vrcp.f32 %v1761_v34  ;;  %v4084_v50 = vcombine.low %v4076_v31, %v4083_v36  ;;  %v1950_v30 = vrot.slane %v9148_v24, %v9116_v39  ;;  %v1954_v53 = vrot.slane %v9148_v24, %v9119_v42 }
 0x281   :  { %v8255_v54 = vpop.eup %8254  ;;  %8274 = vpow2.f32 %v1659_v27  ;;  %v1663_v55 = vmul.f32 1.442695, %v1577_v45  ;;  %v1958_v56 = vrot.slane %v9148_v24, %v9122_v43  ;;  %v1962_v58 = vrot.slane %v9148_v24, %v9127_v57 }
 0x282   :  { %v8257_v62 = vpop.eup %8256  ;;  %v1762_v63 = vadd.f32 1.0, %v8255_v54  ;;  %7127 = vperm.xlu1 %8203, %v4084_v50   ;;  %8276 = vpow2.f32 %v1661_v41  ;;  %v1966_v0 = vrot.slane %v9148_v24, %v9130_v60  ;;  %v1970_v1 = vrot.slane %v9148_v24, %v9133_v61 }
 0x283   :  { %v9196_v4 = vpop.eup %8258  ;;  %v1763_v6 = vadd.f32 1.0, %v8257_v62  ;;  %8278 = vpow2.f32 %v1663_v55  ;;  %v3987_v7 = vcombine.low %v1942_v38, %v1946_v46  ;;  %v3988_v8 = vcombine.low %v1950_v30, %v1954_v53 }
 0x284   :  { %v9198_v9 = vpop.eup %8260  ;;  %8280 = vrcp.f32 %v1762_v63  ;;  %v3989_v10 = vcombine.low %v1958_v56, %v1962_v58  ;;  %v3990_v11 = vcombine.low %v1966_v0, %v1970_v1  ;;  %v1514_v12 = vadd.f32 %v9099_v51, %v1361_v59 }
 0x285   :  { %v8263_v14 = vpop.eup %8262  ;;  %8282 = vrcp.f32 %v1763_v6  ;;  %v3997_v15 = vrot.slane %v3987_v7, %v9137_v2  ;;  %v4004_v24 = vrot.slane %v3988_v8, %v9137_v2  ;;  %v1515_v16 = vadd.f32 %v9099_v51, %v1364_v3  ;;  %v1367_v3 = vpop.xlane.xlu1 %1366 }
 0x286   :  { %v9204_v17 = vpop.eup %8264  ;;  %v1764_v18 = vadd.f32 1.0, %v8263_v14  ;;  %v4011_v19 = vrot.slane %v3989_v10, %v9137_v2  ;;  %v4018_v21 = vrot.slane %v3990_v11, %v9137_v2  ;;  %v1578_v22 = vsub.f32 0.0, %v1514_v12  ;;  %v1370_v11 = vpop.xlane.xlu0 %1369 }
 0x287   :  { %v8267_v23 = vpop.eup %8266  ;;  %v4019_v26 = vcombine.low %v3997_v15, %v4004_v24  ;;  %v1579_v27 = vsub.f32 0.0, %v1515_v16  ;;  %v2038_v28 = vrot.slane %v9145_v20, %v9096_v49  ;;  %v2042_v29 = vrot.slane %v9145_v20, %v9113_v35 }
 0x288   :  { %v9212_v31 = vpop.eup %8268  ;;  %8284 = vrcp.f32 %v1764_v18  ;;  %v1765_v32 = vadd.f32 1.0, %v8267_v23  ;;  %v4020_v33 = vcombine.low %v4011_v19, %v4018_v21  ;;  %v1665_v34 = vmul.f32 1.442695, %v1578_v22 }
 0x289   :  { %v8271_v36 = vpop.eup %8270  ;;  %v4027_v38 = vrot.slane %v4019_v26, %v9137_v2  ;;  %v1667_v41 = vmul.f32 1.442695, %v1579_v27  ;;  %v2046_v45 = vrot.slane %v9145_v20, %v9116_v39  ;;  %v2050_v46 = vrot.slane %v9145_v20, %v9119_v42 }
 0x28a   :  { %v9219_v50 = vpop.eup %8272  ;;  %8286 = vrcp.f32 %v1765_v32  ;;  %v1766_v30 = vadd.f32 1.0, %v8271_v36  ;;  %v4034_v53 = vrot.slane %v4020_v33, %v9137_v2  ;;  %v2054_v54 = vrot.slane %v9145_v20, %v9122_v43 }
 0x28b   :  { %v8275_v55 = vpop.eup %8274  ;;  %8288 = vpow2.f32 %v1665_v34  ;;  %v2058_v56 = vrot.slane %v9145_v20, %v9127_v57  ;;  %v2062_v58 = vrot.slane %v9145_v20, %v9130_v60  ;;  %v2066_v59 = vrot.slane %v9145_v20, %v9133_v61 }
 0x28c   :  { %v8277_v62 = vpop.eup %8276  ;;  %8290 = vrcp.f32 %v1766_v30  ;;  %v1767_v63 = vadd.f32 1.0, %v8275_v55  ;;  %v4035_v0 = vcombine.low %v4027_v38, %v4034_v53  ;;  %v4134_v1 = vcombine.low %v2038_v28, %v2042_v29 }
 0x28d   :  { %v8279_v6 = vpop.eup %8278  ;;  %v1768_v7 = vadd.f32 1.0, %v8277_v62  ;;  %8292 = vpow2.f32 %v1667_v41  ;;  %v4135_v8 = vcombine.low %v2046_v45, %v2050_v46  ;;  %v4136_v10 = vcombine.low %v2054_v54, %v2058_v56  ;;  %v1373_v41 = vpop.xlane.xlu1 %1372 }
 0x28e   :  { %v9230_v12 = vpop.eup %8280  ;;  %8294 = vrcp.f32 %v1767_v63  ;;  %v1769_v14 = vadd.f32 1.0, %v8279_v6  ;;  %7124 = vperm.xlu1 %8203, %v4035_v0   ;;  %v4137_v15 = vcombine.low %v2062_v58, %v2066_v59  ;;  %v4144_v20 = vrot.slane %v4134_v1, %v9137_v2 }
 0x28f   :  { %v9233_v24 = vpop.eup %8282  ;;  %8296 = vrcp.f32 %v1768_v7  ;;  %v4151_v16 = vrot.slane %v4135_v8, %v9137_v2  ;;  %v4158_v18 = vrot.slane %v4136_v10, %v9137_v2  ;;  %v1516_v19 = vadd.f32 %v9099_v51, %v1367_v3  ;;  %v1376_v3 = vpop.xlane.xlu0 %1375 }
 0x290   :  { %8298 = vrcp.f32 %v1769_v14  ;;  %v4165_v21 = vrot.slane %v4137_v15, %v9137_v2  ;;  %v1517_v22 = vadd.f32 %v9099_v51, %v1370_v11  ;;  %v2006_v23 = vrot.slane %v9155_v44, %v9096_v49 }
 0x291   :  { %v4166_v26 = vcombine.low %v4144_v20, %v4151_v16  ;;  %v1580_v27 = vsub.f32 0.0, %v1516_v19  ;;  %v2010_v28 = vrot.slane %v9155_v44, %v9113_v35  ;;  %v2014_v29 = vrot.slane %v9155_v44, %v9116_v39 }
 0x292   :  { %v9246_v32 = vpop.eup %8284  ;;  %v4167_v33 = vcombine.low %v4158_v18, %v4165_v21  ;;  %v1581_v34 = vsub.f32 0.0, %v1517_v22  ;;  %v2018_v36 = vrot.slane %v9155_v44, %v9119_v42  ;;  %v2022_v38 = vrot.slane %v9155_v44, %v9122_v43 }
 0x293   :  { %v4174_v45 = vrot.slane %v4166_v26, %v9137_v2  ;;  %v1669_v46 = vmul.f32 1.442695, %v1580_v27  ;;  %v2026_v30 = vrot.slane %v9155_v44, %v9127_v57  ;;  %v2030_v53 = vrot.slane %v9155_v44, %v9130_v60 }
 0x294   :  { %v9257_v54 = vpop.eup %8286  ;;  %v4181_v55 = vrot.slane %v4167_v33, %v9137_v2  ;;  %v1671_v56 = vmul.f32 1.442695, %v1581_v34  ;;  %v2034_v58 = vrot.slane %v9155_v44, %v9133_v61  ;;  %v4085_v59 = vcombine.low %v2006_v23, %v2010_v28 }
 0x295   :  { %v8289_v62 = vpop.eup %8288  ;;  %8300 = vpow2.f32 %v1669_v46  ;;  %v4086_v63 = vcombine.low %v2014_v29, %v2018_v36  ;;  %v4087_v0 = vcombine.low %v2022_v38, %v2026_v30  ;;  %v1518_v1 = vadd.f32 %v9099_v51, %v1373_v41  ;;  %v1379_v38 = vpop.xlane.xlu1 %1378 }
 0x296   :  { %v9263_v6 = vpop.eup %8290  ;;  %v1770_v7 = vadd.f32 1.0, %v8289_v62  ;;  %v4182_v8 = vcombine.low %v4174_v45, %v4181_v55  ;;  %8302 = vpow2.f32 %v1671_v56  ;;  %v4088_v10 = vcombine.low %v2030_v53, %v2034_v58 }
 0x297   :  { %v8293_v11 = vpop.eup %8292  ;;  %v4095_v14 = vrot.slane %v4085_v59, %v9137_v2  ;;  %v4102_v15 = vrot.slane %v4086_v63, %v9137_v2  ;;  %v4109_v44 = vrot.slane %v4087_v0, %v9137_v2  ;;  %v1582_v20 = vsub.f32 0.0, %v1518_v1 }
 0x298   :  { %v9268_v16 = vpop.eup %8294  ;;  %8304 = vrcp.f32 %v1770_v7  ;;  %7133 = vperm.xlu1 %8203, %v4182_v8   ;;  %v4116_v18 = vrot.slane %v4088_v10, %v9137_v2  ;;  %v1519_v19 = vadd.f32 %v9099_v51, %v1376_v3  ;;  %v2102_v26 = vrot.slane %v9162_v5, %v9096_v49 }
 0x299   :  { %v9272_v21 = vpop.eup %8296  ;;  %v4117_v22 = vcombine.low %v4095_v14, %v4102_v15  ;;  %v1673_v23 = vmul.f32 1.442695, %v1582_v20  ;;  %v2106_v27 = vrot.slane %v9162_v5, %v9113_v35  ;;  %v1771_v29 = vadd.f32 1.0, %v8293_v11 }
 0x29a   :  { %v9278_v28 = vpop.eup %8298  ;;  %v4118_v33 = vcombine.low %v4109_v44, %v4116_v18  ;;  %v1583_v34 = vsub.f32 0.0, %v1519_v19  ;;  %v2110_v36 = vrot.slane %v9162_v5, %v9116_v39  ;;  %v2114_v45 = vrot.slane %v9162_v5, %v9119_v42 }
 0x29b   :  { %v4125_v41 = vrot.slane %v4117_v22, %v9137_v2  ;;  %8306 = vpow2.f32 %v1673_v23  ;;  %v2118_v46 = vrot.slane %v9162_v5, %v9122_v43  ;;  %v2122_v55 = vrot.slane %v9162_v5, %v9127_v57 }
 0x29c   :  { %v4132_v30 = vrot.slane %v4118_v33, %v9137_v2  ;;  %v1675_v53 = vmul.f32 1.442695, %v1583_v34  ;;  %v2126_v56 = vrot.slane %v9162_v5, %v9130_v60  ;;  %v2130_v58 = vrot.slane %v9162_v5, %v9133_v61 }
 0x29d   :  { %v4232_v59 = vcombine.low %v2102_v26, %v2106_v27  ;;  %v4233_v62 = vcombine.low %v2110_v36, %v2114_v45  ;;  %v1520_v63 = vadd.f32 %v9099_v51, %v1379_v38  ;;  %v4234_v1 = vcombine.low %v2118_v46, %v2122_v55  ;;  %v1382_v38 = vpop.xlane.xlu0 %1381 }
 0x29e   :  { %v4133_v0 = vcombine.low %v4125_v41, %v4132_v30  ;;  %8308 = vpow2.f32 %v1675_v53  ;;  %v2198_v3 = vrot.slane %v9178_v40, %v9096_v49  ;;  %v4235_v8 = vcombine.low %v2126_v56, %v2130_v58 }
 0x29f   :  { %v8301_v7 = vpop.eup %8300  ;;  %v4242_v10 = vrot.slane %v4232_v59, %v9137_v2  ;;  %v4249_v11 = vrot.slane %v4233_v62, %v9137_v2  ;;  %v1584_v14 = vsub.f32 0.0, %v1520_v63  ;;  %v4256_v5 = vrot.slane %v4234_v1, %v9137_v2 }
 0x2a0   :  { %v8303_v15 = vpop.eup %8302  ;;  %v1772_v44 = vadd.f32 1.0, %v8301_v7  ;;  %7130 = vperm.xlu1 %8203, %v4133_v0   ;;  %v2202_v20 = vrot.slane %v9178_v40, %v9113_v35  ;;  %v2206_v18 = vrot.slane %v9178_v40, %v9116_v39  ;;  %8310 = vrcp.f32 %v1771_v29 }
 0x2a1   :  { %v4263_v19 = vrot.slane %v4235_v8, %v9137_v2  ;;  %v4264_v22 = vcombine.low %v4242_v10, %v4249_v11  ;;  %v1677_v23 = vmul.f32 1.442695, %v1584_v14  ;;  %v1773_v27 = vadd.f32 1.0, %v8303_v15 }
 0x2a2   :  { %v9305_v26 = vpop.eup %8304  ;;  %v2210_v33 = vrot.slane %v9178_v40, %v9119_v42  ;;  %v2214_v34 = vrot.slane %v9178_v40, %v9122_v43  ;;  %v2218_v36 = vrot.slane %v9178_v40, %v9127_v57  ;;  %8312 = vrcp.f32 %v1772_v44 }
 0x2a3   :  { %v4265_v41 = vcombine.low %v4256_v5, %v4263_v19  ;;  %v4272_v29 = vrot.slane %v4264_v22, %v9137_v2  ;;  %v2222_v45 = vrot.slane %v9178_v40, %v9130_v60  ;;  %8314 = vpow2.f32 %v1677_v23  ;;  %v1385_v19 = vpop.xlane.xlu1 %1384 }
 0x2a4   :  { %v2226_v46 = vrot.slane %v9178_v40, %v9133_v61  ;;  %v4379_v30 = vcombine.low %v2198_v3, %v2202_v20  ;;  %v4380_v53 = vcombine.low %v2206_v18, %v2210_v33  ;;  %v4381_v58 = vcombine.low %v2214_v34, %v2218_v36 }
 0x2a5   :  { %v8307_v55 = vpop.eup %8306  ;;  %v4279_v56 = vrot.slane %v4265_v41, %v9137_v2  ;;  %v1521_v59 = vadd.f32 %v9099_v51, %v1382_v38  ;;  %v2070_v62 = vrot.slane %v9158_v52, %v9096_v49  ;;  %v2074_v10 = vrot.slane %v9158_v52, %v9113_v35 }
 0x2a6   :  { %v1774_v63 = vadd.f32 1.0, %v8307_v55  ;;  %v4382_v0 = vcombine.low %v2222_v45, %v2226_v46  ;;  %v4389_v1 = vrot.slane %v4379_v30, %v9137_v2  ;;  %v4396_v7 = vrot.slane %v4380_v53, %v9137_v2 }
 0x2a7   :  { %v4280_v8 = vcombine.low %v4272_v29, %v4279_v56  ;;  %v4403_v40 = vrot.slane %v4381_v58, %v9137_v2  ;;  %v1585_v3 = vsub.f32 0.0, %v1521_v59  ;;  %8316 = vrcp.f32 %v1773_v27 }
 0x2a8   :  { %v8309_v11 = vpop.eup %8308  ;;  %v4410_v14 = vrot.slane %v4382_v0, %v9137_v2  ;;  %v4411_v15 = vcombine.low %v4389_v1, %v4396_v7  ;;  %v2078_v44 = vrot.slane %v9158_v52, %v9116_v39  ;;  %8318 = vrcp.f32 %v1774_v63 }
 0x2a9   :  { %7139 = vperm.xlu1 %8203, %v4280_v8   ;;  %v1679_v5 = vmul.f32 1.442695, %v1585_v3  ;;  %v2082_v20 = vrot.slane %v9158_v52, %v9119_v42  ;;  %v2086_v18 = vrot.slane %v9158_v52, %v9122_v43  ;;  %v2090_v27 = vrot.slane %v9158_v52, %v9127_v57 }
 0x2aa   :  { %v4412_v22 = vcombine.low %v4403_v40, %v4410_v14  ;;  %v4419_v23 = vrot.slane %v4411_v15, %v9137_v2  ;;  %v2094_v33 = vrot.slane %v9158_v52, %v9130_v60  ;;  %v9339_v34 = vpop.eup %8310  ;;  %v1775_v36 = vadd.f32 1.0, %v8309_v11  ;;  %v1388_v15 = vpop.xlane.xlu0 %1387 }
 0x2ab   :  { %v2098_v38 = vrot.slane %v9158_v52, %v9133_v61  ;;  %v4183_v41 = vcombine.low %v2070_v62, %v2074_v10  ;;  %v4184_v29 = vcombine.low %v2078_v44, %v2082_v20  ;;  %8320 = vpow2.f32 %v1679_v5 }
 0x2ac   :  { %v4426_v45 = vrot.slane %v4412_v22, %v9137_v2  ;;  %v4185_v46 = vcombine.low %v2086_v18, %v2090_v27  ;;  %v1522_v30 = vadd.f32 %v9099_v51, %v1385_v19  ;;  %v9345_v53 = vpop.eup %8312  ;;  %v2262_v59 = vrot.slane %v9196_v4, %v9096_v49 }
 0x2ad   :  { %v4186_v55 = vcombine.low %v2094_v33, %v2098_v38  ;;  %v4193_v56 = vrot.slane %v4183_v41, %v9137_v2  ;;  %v4200_v58 = vrot.slane %v4184_v29, %v9137_v2  ;;  %v8315_v63 = vpop.eup %8314  ;;  %v2266_v1 = vrot.slane %v9196_v4, %v9113_v35 }
 0x2ae   :  { %v4427_v52 = vcombine.low %v4419_v23, %v4426_v45  ;;  %v4207_v62 = vrot.slane %v4185_v46, %v9137_v2  ;;  %v1586_v0 = vsub.f32 0.0, %v1522_v30  ;;  %8322 = vrcp.f32 %v1775_v36 }
 0x2af   :  { %v4214_v7 = vrot.slane %v4186_v55, %v9137_v2  ;;  %v4215_v8 = vcombine.low %v4193_v56, %v4200_v58  ;;  %v2270_v40 = vrot.slane %v9196_v4, %v9116_v39  ;;  %v2274_v10 = vrot.slane %v9196_v4, %v9119_v42 }
 0x2b0   :  { %7148 = vperm.xlu0 %8202, %v4427_v52   ;;  %v1681_v3 = vmul.f32 1.442695, %v1586_v0  ;;  %v2278_v11 = vrot.slane %v9196_v4, %v9122_v43  ;;  %v2282_v14 = vrot.slane %v9196_v4, %v9127_v57  ;;  %v1776_v44 = vadd.f32 1.0, %v8315_v63 }
 0x2b1   :  { %v4216_v5 = vcombine.low %v4207_v62, %v4214_v7  ;;  %v4223_v20 = vrot.slane %v4215_v8, %v9137_v2  ;;  %v2286_v18 = vrot.slane %v9196_v4, %v9130_v60  ;;  %v9366_v19 = vpop.eup %8316  ;;  %v2290_v22 = vrot.slane %v9196_v4, %v9133_v61  ;;  %v1391_v7 = vpop.xlane.xlu1 %1390 }
 0x2b2   :  { %8324 = vpow2.f32 %v1681_v3  ;;  %v4477_v23 = vcombine.low %v2262_v59, %v2266_v1  ;;  %v4478_v27 = vcombine.low %v2270_v40, %v2274_v10  ;;  %v9370_v33 = vpop.eup %8318  ;;  %v4479_v38 = vcombine.low %v2278_v11, %v2282_v14 }
 0x2b3   :  { %v4230_v36 = vrot.slane %v4216_v5, %v9137_v2  ;;  %v1523_v41 = vadd.f32 %v9099_v51, %v1388_v15  ;;  %v2166_v29 = vrot.slane %v9171_v25, %v9096_v49  ;;  %v4480_v45 = vcombine.low %v2286_v18, %v2290_v22 }
 0x2b4   :  { %v4487_v46 = vrot.slane %v4477_v23, %v9137_v2  ;;  %v4494_v30 = vrot.slane %v4478_v27, %v9137_v2  ;;  %v2170_v4 = vrot.slane %v9171_v25, %v9113_v35  ;;  %v4501_v56 = vrot.slane %v4479_v38, %v9137_v2 }
 0x2b5   :  { %v4231_v55 = vcombine.low %v4223_v20, %v4230_v36  ;;  %v1587_v58 = vsub.f32 0.0, %v1523_v41  ;;  %v2174_v59 = vrot.slane %v9171_v25, %v9116_v39  ;;  %v8321_v63 = vpop.eup %8320  ;;  %v4508_v52 = vrot.slane %v4480_v45, %v9137_v2 }
 0x2b6   :  { %v4509_v62 = vcombine.low %v4487_v46, %v4494_v30  ;;  %v2178_v0 = vrot.slane %v9171_v25, %v9119_v42  ;;  %v2182_v1 = vrot.slane %v9171_v25, %v9122_v43  ;;  %8326 = vrcp.f32 %v1776_v44 }
 0x2b7   :  { %7136 = vperm.xlu1 %8203, %v4231_v55   ;;  %v1683_v8 = vmul.f32 1.442695, %v1587_v58  ;;  %v2186_v40 = vrot.slane %v9171_v25, %v9127_v57  ;;  %v2190_v3 = vrot.slane %v9171_v25, %v9130_v60  ;;  %v4510_v10 = vcombine.low %v4501_v56, %v4508_v52 }
 0x2b8   :  { %v4517_v11 = vrot.slane %v4509_v62, %v9137_v2  ;;  %v2194_v14 = vrot.slane %v9171_v25, %v9133_v61  ;;  %v4330_v15 = vcombine.low %v2166_v29, %v2170_v4  ;;  %v9395_v5 = vpop.eup %8322  ;;  %v1777_v20 = vadd.f32 1.0, %v8321_v63 }
 0x2b9   :  { %v4331_v18 = vcombine.low %v2174_v59, %v2178_v0  ;;  %v4332_v44 = vcombine.low %v2182_v1, %v2186_v40  ;;  %v1524_v22 = vadd.f32 %v9099_v51, %v1391_v7  ;;  %v4524_v23 = vrot.slane %v4510_v10, %v9137_v2  ;;  %v1394_v1 = vpop.xlane.xlu0 %1393 }
 0x2ba   :  { %8328 = vpow2.f32 %v1683_v8  ;;  %v4333_v27 = vcombine.low %v2190_v3, %v2194_v14  ;;  %v4340_v36 = vrot.slane %v4330_v15, %v9137_v2  ;;  %v2326_v25 = vrot.slane %v9204_v17, %v9096_v49 }
 0x2bb   :  { %v4347_v38 = vrot.slane %v4331_v18, %v9137_v2  ;;  %v4354_v41 = vrot.slane %v4332_v44, %v9137_v2  ;;  %v1588_v45 = vsub.f32 0.0, %v1524_v22  ;;  %v4525_v46 = vcombine.low %v4517_v11, %v4524_v23 }
 0x2bc   :  { %v8325_v29 = vpop.eup %8324  ;;  %v4361_v30 = vrot.slane %v4333_v27, %v9137_v2  ;;  %v2330_v4 = vrot.slane %v9204_v17, %v9113_v35  ;;  %v2334_v55 = vrot.slane %v9204_v17, %v9116_v39  ;;  %8330 = vrcp.f32 %v1777_v20 }
 0x2bd   :  { %v4362_v56 = vcombine.low %v4340_v36, %v4347_v38  ;;  %v1685_v58 = vmul.f32 1.442695, %v1588_v45  ;;  %v2338_v59 = vrot.slane %v9204_v17, %v9119_v42  ;;  %7154 = vperm.xlu0 %8202, %v4525_v46   ;;  %v2342_v52 = vrot.slane %v9204_v17, %v9122_v43 }
 0x2be   :  { %v4363_v63 = vcombine.low %v4354_v41, %v4361_v30  ;;  %v2346_v62 = vrot.slane %v9204_v17, %v9127_v57  ;;  %v2350_v0 = vrot.slane %v9204_v17, %v9130_v60  ;;  %v1778_v7 = vadd.f32 1.0, %v8325_v29 }
 0x2bf   :  { %v4370_v8 = vrot.slane %v4362_v56, %v9137_v2  ;;  %v2354_v40 = vrot.slane %v9204_v17, %v9133_v61  ;;  %v4575_v3 = vcombine.low %v2326_v25, %v2330_v4  ;;  %8332 = vpow2.f32 %v1685_v58  ;;  %v1397_v56 = vpop.xlane.xlu1 %1396 }
 0x2c0   :  { %v4377_v10 = vrot.slane %v4363_v63, %v9137_v2  ;;  %v4576_v11 = vcombine.low %v2334_v55, %v2338_v59  ;;  %v4577_v14 = vcombine.low %v2342_v52, %v2346_v62  ;;  %v9421_v15 = vpop.eup %8326  ;;  %v1525_v44 = vadd.f32 %v9099_v51, %v1394_v1 }
 0x2c1   :  { %v4578_v20 = vcombine.low %v2350_v0, %v2354_v40  ;;  %v4585_v18 = vrot.slane %v4575_v3, %v9137_v2  ;;  %v2134_v22 = vrot.slane %v9167_v13, %v9096_v49  ;;  %v2138_v36 = vrot.slane %v9167_v13, %v9113_v35 }
 0x2c2   :  { %v4378_v23 = vcombine.low %v4370_v8, %v4377_v10  ;;  %v4592_v27 = vrot.slane %v4576_v11, %v9137_v2  ;;  %v4599_v17 = vrot.slane %v4577_v14, %v9137_v2  ;;  %v1589_v41 = vsub.f32 0.0, %v1525_v44 }
 0x2c3   :  { %v4606_v38 = vrot.slane %v4578_v20, %v9137_v2  ;;  %v2142_v45 = vrot.slane %v9167_v13, %v9116_v39  ;;  %v2146_v25 = vrot.slane %v9167_v13, %v9119_v42  ;;  %v2150_v30 = vrot.slane %v9167_v13, %v9122_v43 }
 0x2c4   :  { %v8329_v29 = vpop.eup %8328  ;;  %7145 = vperm.xlu1 %8203, %v4378_v23   ;;  %v4607_v46 = vcombine.low %v4585_v18, %v4592_v27  ;;  %v2154_v4 = vrot.slane %v9167_v13, %v9127_v57  ;;  %v2158_v55 = vrot.slane %v9167_v13, %v9130_v60  ;;  %8334 = vrcp.f32 %v1778_v7 }
 0x2c5   :  { %v4608_v58 = vcombine.low %v4599_v17, %v4606_v38  ;;  %v1687_v59 = vmul.f32 1.442695, %v1589_v41  ;;  %v2162_v63 = vrot.slane %v9167_v13, %v9133_v61  ;;  %v4281_v62 = vcombine.low %v2134_v22, %v2138_v36 }
 0x2c6   :  { %v4615_v52 = vrot.slane %v4607_v46, %v9137_v2  ;;  %v4282_v0 = vcombine.low %v2142_v45, %v2146_v25  ;;  %v4283_v1 = vcombine.low %v2150_v30, %v2154_v4  ;;  %v9445_v8 = vpop.eup %8330  ;;  %v1779_v40 = vadd.f32 1.0, %v8329_v29  ;;  %v1400_v29 = vpop.xlane.xlu0 %1399 }
 0x2c7   :  { %v4622_v3 = vrot.slane %v4608_v58, %v9137_v2  ;;  %v4284_v10 = vcombine.low %v2158_v55, %v2162_v63  ;;  %v1526_v11 = vadd.f32 %v9099_v51, %v1397_v56  ;;  %8336 = vpow2.f32 %v1687_v59 }
 0x2c8   :  { %v4291_v7 = vrot.slane %v4281_v62, %v9137_v2  ;;  %v4298_v14 = vrot.slane %v4282_v0, %v9137_v2  ;;  %v4305_v13 = vrot.slane %v4283_v1, %v9137_v2  ;;  %v2390_v22 = vrot.slane %v9219_v50, %v9096_v49 }
 0x2c9   :  { %v4623_v20 = vcombine.low %v4615_v52, %v4622_v3  ;;  %v4312_v18 = vrot.slane %v4284_v10, %v9137_v2  ;;  %v1590_v44 = vsub.f32 0.0, %v1526_v11  ;;  %v8333_v23 = vpop.eup %8332  ;;  %v2394_v17 = vrot.slane %v9219_v50, %v9113_v35 }
 0x2ca   :  { %v4313_v27 = vcombine.low %v4291_v7, %v4298_v14  ;;  %v2398_v36 = vrot.slane %v9219_v50, %v9116_v39  ;;  %v2402_v38 = vrot.slane %v9219_v50, %v9119_v42  ;;  %8338 = vrcp.f32 %v1779_v40 }
 0x2cb   :  { %7160 = vperm.xlu0 %8202, %v4623_v20   ;;  %v4314_v41 = vcombine.low %v4305_v13, %v4312_v18  ;;  %v1689_v45 = vmul.f32 1.442695, %v1590_v44  ;;  %v2406_v25 = vrot.slane %v9219_v50, %v9122_v43  ;;  %v2410_v30 = vrot.slane %v9219_v50, %v9127_v57 }
 0x2cc   :  { %v4321_v46 = vrot.slane %v4313_v27, %v9137_v2  ;;  %v2414_v4 = vrot.slane %v9219_v50, %v9130_v60  ;;  %v2418_v55 = vrot.slane %v9219_v50, %v9133_v61  ;;  %v1780_v56 = vadd.f32 1.0, %v8333_v23 }
 0x2cd   :  { %v4328_v58 = vrot.slane %v4314_v41, %v9137_v2  ;;  %v4673_v59 = vcombine.low %v2390_v22, %v2394_v17  ;;  %v4674_v63 = vcombine.low %v2398_v36, %v2402_v38  ;;  %8340 = vpow2.f32 %v1689_v45  ;;  %v1403_v41 = vpop.xlane.xlu1 %1402 }
 0x2ce   :  { %v4675_v52 = vcombine.low %v2406_v25, %v2410_v30  ;;  %v4676_v62 = vcombine.low %v2414_v4, %v2418_v55  ;;  %v1527_v0 = vadd.f32 %v9099_v51, %v1400_v29  ;;  %v9472_v1 = vpop.eup %8334  ;;  %v2230_v50 = vrot.slane %v9182_v37, %v9096_v49 }
 0x2cf   :  { %v4329_v40 = vcombine.low %v4321_v46, %v4328_v58  ;;  %v4683_v3 = vrot.slane %v4673_v59, %v9137_v2  ;;  %v4690_v10 = vrot.slane %v4674_v63, %v9137_v2  ;;  %v2234_v13 = vrot.slane %v9182_v37, %v9113_v35 }
 0x2d0   :  { %v4697_v11 = vrot.slane %v4675_v52, %v9137_v2  ;;  %v4704_v7 = vrot.slane %v4676_v62, %v9137_v2  ;;  %v1591_v14 = vsub.f32 0.0, %v1527_v0  ;;  %v2238_v18 = vrot.slane %v9182_v37, %v9116_v39 }
 0x2d1   :  { %7142 = vperm.xlu1 %8203, %v4329_v40   ;;  %v4705_v20 = vcombine.low %v4683_v3, %v4690_v10  ;;  %v2242_v44 = vrot.slane %v9182_v37, %v9119_v42  ;;  %v2246_v22 = vrot.slane %v9182_v37, %v9122_v43  ;;  %v8337_v23 = vpop.eup %8336  ;;  %v2250_v36 = vrot.slane %v9182_v37, %v9127_v57 }
 0x2d2   :  { %v4706_v27 = vcombine.low %v4697_v11, %v4704_v7  ;;  %v1691_v17 = vmul.f32 1.442695, %v1591_v14  ;;  %v2254_v38 = vrot.slane %v9182_v37, %v9130_v60  ;;  %8342 = vrcp.f32 %v1780_v56 }
 0x2d3   :  { %v4713_v45 = vrot.slane %v4705_v20, %v9137_v2  ;;  %v2258_v25 = vrot.slane %v9182_v37, %v9133_v61  ;;  %v4428_v29 = vcombine.low %v2230_v50, %v2234_v13  ;;  %v4429_v30 = vcombine.low %v2238_v18, %v2242_v44  ;;  %v1406_v18 = vpop.xlane.xlu0 %1405 }
 0x2d4   :  { %v4720_v46 = vrot.slane %v4706_v27, %v9137_v2  ;;  %8344 = vpow2.f32 %v1691_v17  ;;  %v4430_v4 = vcombine.low %v2246_v22, %v2250_v36  ;;  %v9496_v55 = vpop.eup %8338  ;;  %v1781_v58 = vadd.f32 1.0, %v8337_v23 }
 0x2d5   :  { %v4431_v59 = vcombine.low %v2254_v38, %v2258_v25  ;;  %v4438_v63 = vrot.slane %v4428_v29, %v9137_v2  ;;  %v1528_v52 = vadd.f32 %v9099_v51, %v1403_v41  ;;  %v4445_v62 = vrot.slane %v4429_v30, %v9137_v2 }
 0x2d6   :  { %v4721_v56 = vcombine.low %v4713_v45, %v4720_v46  ;;  %v4452_v0 = vrot.slane %v4430_v4, %v9137_v2  ;;  %v2454_v37 = vrot.slane %v9233_v24, %v9096_v49  ;;  %v2458_v10 = vrot.slane %v9233_v24, %v9113_v35 }
 0x2d7   :  { %v4459_v40 = vrot.slane %v4431_v59, %v9137_v2  ;;  %v1592_v3 = vsub.f32 0.0, %v1528_v52  ;;  %v2462_v50 = vrot.slane %v9233_v24, %v9116_v39  ;;  %v8341_v11 = vpop.eup %8340  ;;  %v4460_v7 = vcombine.low %v4438_v63, %v4445_v62 }
 0x2d8   :  { %7166 = vperm.xlu0 %8202, %v4721_v56   ;;  %v2466_v14 = vrot.slane %v9233_v24, %v9119_v42  ;;  %v2470_v13 = vrot.slane %v9233_v24, %v9122_v43  ;;  %v2474_v20 = vrot.slane %v9233_v24, %v9127_v57  ;;  %8346 = vrcp.f32 %v1781_v58 }
 0x2d9   :  { %v4461_v44 = vcombine.low %v4452_v0, %v4459_v40  ;;  %v1693_v22 = vmul.f32 1.442695, %v1592_v3  ;;  %v2478_v23 = vrot.slane %v9233_v24, %v9130_v60  ;;  %v4468_v27 = vrot.slane %v4460_v7, %v9137_v2 }
 0x2da   :  { %v2482_v17 = vrot.slane %v9233_v24, %v9133_v61  ;;  %v4771_v36 = vcombine.low %v2454_v37, %v2458_v10  ;;  %v4772_v38 = vcombine.low %v2462_v50, %v2466_v14  ;;  %v1782_v41 = vadd.f32 1.0, %v8341_v11  ;;  %v1409_v11 = vpop.xlane.xlu1 %1408 }
 0x2db   :  { %v4475_v45 = vrot.slane %v4461_v44, %v9137_v2  ;;  %v4773_v25 = vcombine.low %v2470_v13, %v2474_v20  ;;  %v1529_v29 = vadd.f32 %v9099_v51, %v1406_v18  ;;  %8348 = vpow2.f32 %v1693_v22 }
 0x2dc   :  { %v4774_v46 = vcombine.low %v2478_v23, %v2482_v17  ;;  %v4781_v30 = vrot.slane %v4771_v36, %v9137_v2  ;;  %v4788_v4 = vrot.slane %v4772_v38, %v9137_v2  ;;  %v9524_v58 = vpop.eup %8342  ;;  %v2294_v52 = vrot.slane %v9198_v9, %v9096_v49 }
 0x2dd   :  { %v4476_v59 = vcombine.low %v4468_v27, %v4475_v45  ;;  %v4795_v63 = vrot.slane %v4773_v25, %v9137_v2  ;;  %v1593_v24 = vsub.f32 0.0, %v1529_v29  ;;  %v2298_v37 = vrot.slane %v9198_v9, %v9113_v35 }
 0x2de   :  { %v8345_v56 = vpop.eup %8344  ;;  %v4802_v62 = vrot.slane %v4774_v46, %v9137_v2  ;;  %v4803_v0 = vcombine.low %v4781_v30, %v4788_v4  ;;  %v2302_v40 = vrot.slane %v9198_v9, %v9116_v39  ;;  %8350 = vrcp.f32 %v1782_v41 }
 0x2df   :  { %7151 = vperm.xlu1 %8203, %v4476_v59   ;;  %v1695_v3 = vmul.f32 1.442695, %v1593_v24  ;;  %v2306_v10 = vrot.slane %v9198_v9, %v9119_v42  ;;  %v2310_v50 = vrot.slane %v9198_v9, %v9122_v43  ;;  %v2314_v13 = vrot.slane %v9198_v9, %v9127_v57 }
 0x2e0   :  { %v4804_v7 = vcombine.low %v4795_v63, %v4802_v62  ;;  %v4811_v14 = vrot.slane %v4803_v0, %v9137_v2  ;;  %v2318_v20 = vrot.slane %v9198_v9, %v9130_v60  ;;  %v1783_v18 = vadd.f32 1.0, %v8345_v56 }
 0x2e1   :  { %v2322_v44 = vrot.slane %v9198_v9, %v9133_v61  ;;  %v4526_v22 = vcombine.low %v2294_v52, %v2298_v37  ;;  %v4527_v23 = vcombine.low %v2302_v40, %v2306_v10  ;;  %8352 = vpow2.f32 %v1695_v3  ;;  %v1412_v3 = vpop.xlane.xlu0 %1411 }
 0x2e2   :  { %v4818_v27 = vrot.slane %v4804_v7, %v9137_v2  ;;  %v4528_v17 = vcombine.low %v2310_v50, %v2314_v13  ;;  %v1530_v36 = vadd.f32 %v9099_v51, %v1409_v11  ;;  %v9547_v38 = vpop.eup %8346  ;;  %v2518_v29 = vrot.slane %v9257_v54, %v9096_v49 }
 0x2e3   :  { %v4529_v41 = vcombine.low %v2318_v20, %v2322_v44  ;;  %v4536_v45 = vrot.slane %v4526_v22, %v9137_v2  ;;  %v4543_v25 = vrot.slane %v4527_v23, %v9137_v2  ;;  %v2522_v4 = vrot.slane %v9257_v54, %v9113_v35 }
 0x2e4   :  { %v4819_v46 = vcombine.low %v4811_v14, %v4818_v27  ;;  %v4550_v9 = vrot.slane %v4528_v17, %v9137_v2  ;;  %v1594_v30 = vsub.f32 0.0, %v1530_v36  ;;  %v2526_v24 = vrot.slane %v9257_v54, %v9116_v39 }
 0x2e5   :  { %v4557_v59 = vrot.slane %v4529_v41, %v9137_v2  ;;  %v4558_v63 = vcombine.low %v4536_v45, %v4543_v25  ;;  %v2530_v52 = vrot.slane %v9257_v54, %v9119_v42  ;;  %v8349_v56 = vpop.eup %8348  ;;  %v2534_v0 = vrot.slane %v9257_v54, %v9122_v43 }
 0x2e6   :  { %7172 = vperm.xlu0 %8202, %v4819_v46   ;;  %v1697_v62 = vmul.f32 1.442695, %v1594_v30  ;;  %v2538_v37 = vrot.slane %v9257_v54, %v9127_v57  ;;  %v2542_v40 = vrot.slane %v9257_v54, %v9130_v60  ;;  %8354 = vrcp.f32 %v1783_v18 }
 0x2e7   :  { %v4559_v10 = vcombine.low %v4550_v9, %v4557_v59  ;;  %v4566_v50 = vrot.slane %v4558_v63, %v9137_v2  ;;  %v2546_v11 = vrot.slane %v9257_v54, %v9133_v61  ;;  %v4869_v7 = vcombine.low %v2518_v29, %v2522_v4 }
 0x2e8   :  { %8356 = vpow2.f32 %v1697_v62  ;;  %v4870_v14 = vcombine.low %v2526_v24, %v2530_v52  ;;  %v4871_v13 = vcombine.low %v2534_v0, %v2538_v37  ;;  %v9570_v20 = vpop.eup %8350  ;;  %v1784_v44 = vadd.f32 1.0, %v8349_v56  ;;  %v1415_v56 = vpop.xlane.xlu1 %1414 }
 0x2e9   :  { %v4573_v22 = vrot.slane %v4559_v10, %v9137_v2  ;;  %v4872_v23 = vcombine.low %v2542_v40, %v2546_v11  ;;  %v1531_v27 = vadd.f32 %v9099_v51, %v1412_v3  ;;  %v4879_v18 = vrot.slane %v4869_v7, %v9137_v2 }
 0x2ea   :  { %v4886_v17 = vrot.slane %v4870_v14, %v9137_v2  ;;  %v4893_v36 = vrot.slane %v4871_v13, %v9137_v2  ;;  %v2358_v54 = vrot.slane %v9212_v31, %v9096_v49  ;;  %v2362_v29 = vrot.slane %v9212_v31, %v9113_v35 }
 0x2eb   :  { %v4574_v41 = vcombine.low %v4566_v50, %v4573_v22  ;;  %v4900_v45 = vrot.slane %v4872_v23, %v9137_v2  ;;  %v1595_v25 = vsub.f32 0.0, %v1531_v27  ;;  %v8353_v46 = vpop.eup %8352  ;;  %v2366_v30 = vrot.slane %v9212_v31, %v9116_v39 }
 0x2ec   :  { %v4901_v9 = vcombine.low %v4879_v18, %v4886_v17  ;;  %v2370_v4 = vrot.slane %v9212_v31, %v9119_v42  ;;  %v2374_v59 = vrot.slane %v9212_v31, %v9122_v43  ;;  %8358 = vrcp.f32 %v1784_v44 }
 0x2ed   :  { %7157 = vperm.xlu1 %8203, %v4574_v41   ;;  %v4902_v63 = vcombine.low %v4893_v36, %v4900_v45  ;;  %v1699_v24 = vmul.f32 1.442695, %v1595_v25  ;;  %v2378_v52 = vrot.slane %v9212_v31, %v9127_v57  ;;  %v2382_v0 = vrot.slane %v9212_v31, %v9130_v60 }
 0x2ee   :  { %v4909_v62 = vrot.slane %v4901_v9, %v9137_v2  ;;  %v2386_v37 = vrot.slane %v9212_v31, %v9133_v61  ;;  %v4624_v40 = vcombine.low %v2358_v54, %v2362_v29  ;;  %v1785_v3 = vadd.f32 1.0, %v8353_v46 }
 0x2ef   :  { %v4916_v10 = vrot.slane %v4902_v63, %v9137_v2  ;;  %v4625_v50 = vcombine.low %v2366_v30, %v2370_v4  ;;  %v4626_v11 = vcombine.low %v2374_v59, %v2378_v52  ;;  %8360 = vpow2.f32 %v1699_v24  ;;  %v1418_v59 = vpop.xlane.xlu0 %1417 }
 0x2f0   :  { %v4627_v7 = vcombine.low %v2382_v0, %v2386_v37  ;;  %v4634_v14 = vrot.slane %v4624_v40, %v9137_v2  ;;  %v1532_v13 = vadd.f32 %v9099_v51, %v1415_v56  ;;  %v9598_v44 = vpop.eup %8354  ;;  %v2582_v31 = vrot.slane %v9268_v16, %v9096_v49 }
 0x2f1   :  { %v4917_v22 = vcombine.low %v4909_v62, %v4916_v10  ;;  %v4641_v23 = vrot.slane %v4625_v50, %v9137_v2  ;;  %v4648_v27 = vrot.slane %v4626_v11, %v9137_v2  ;;  %v2586_v54 = vrot.slane %v9268_v16, %v9113_v35 }
 0x2f2   :  { %v8357_v18 = vpop.eup %8356  ;;  %v4655_v17 = vrot.slane %v4627_v7, %v9137_v2  ;;  %v1596_v36 = vsub.f32 0.0, %v1532_v13  ;;  %v2590_v41 = vrot.slane %v9268_v16, %v9116_v39  ;;  %8362 = vrcp.f32 %v1785_v3 }
 0x2f3   :  { %7178 = vperm.xlu0 %8202, %v4917_v22   ;;  %v4656_v45 = vcombine.low %v4634_v14, %v4641_v23  ;;  %v2594_v25 = vrot.slane %v9268_v16, %v9119_v42  ;;  %v2598_v29 = vrot.slane %v9268_v16, %v9122_v43  ;;  %v2602_v30 = vrot.slane %v9268_v16, %v9127_v57 }
 0x2f4   :  { %v4657_v46 = vcombine.low %v4648_v27, %v4655_v17  ;;  %v1701_v9 = vmul.f32 1.442695, %v1596_v36  ;;  %v2606_v4 = vrot.slane %v9268_v16, %v9130_v60  ;;  %v1786_v63 = vadd.f32 1.0, %v8357_v18 }
 0x2f5   :  { %v4664_v24 = vrot.slane %v4656_v45, %v9137_v2  ;;  %v2610_v52 = vrot.slane %v9268_v16, %v9133_v61  ;;  %v4967_v56 = vcombine.low %v2582_v31, %v2586_v54  ;;  %v4968_v0 = vcombine.low %v2590_v41, %v2594_v25  ;;  %v1421_v45 = vpop.xlane.xlu1 %1420 }
 0x2f6   :  { %v4671_v62 = vrot.slane %v4657_v46, %v9137_v2  ;;  %8364 = vpow2.f32 %v1701_v9  ;;  %v4969_v37 = vcombine.low %v2598_v29, %v2602_v30  ;;  %v9621_v40 = vpop.eup %8358  ;;  %v1533_v50 = vadd.f32 %v9099_v51, %v1418_v59 }
 0x2f7   :  { %v4970_v3 = vcombine.low %v2606_v4, %v2610_v52  ;;  %v4977_v10 = vrot.slane %v4967_v56, %v9137_v2  ;;  %v2422_v11 = vrot.slane %v9230_v12, %v9096_v49  ;;  %v4984_v14 = vrot.slane %v4968_v0, %v9137_v2 }
 0x2f8   :  { %v4672_v7 = vcombine.low %v4664_v24, %v4671_v62  ;;  %v4991_v16 = vrot.slane %v4969_v37, %v9137_v2  ;;  %v2426_v13 = vrot.slane %v9230_v12, %v9113_v35  ;;  %v1597_v23 = vsub.f32 0.0, %v1533_v50 }
 0x2f9   :  { %v4998_v22 = vrot.slane %v4970_v3, %v9137_v2  ;;  %v2430_v27 = vrot.slane %v9230_v12, %v9116_v39  ;;  %v2434_v31 = vrot.slane %v9230_v12, %v9119_v42  ;;  %v8361_v18 = vpop.eup %8360  ;;  %v4999_v17 = vcombine.low %v4977_v10, %v4984_v14 }
 0x2fa   :  { %7163 = vperm.xlu1 %8203, %v4672_v7   ;;  %v2438_v36 = vrot.slane %v9230_v12, %v9122_v43  ;;  %v2442_v54 = vrot.slane %v9230_v12, %v9127_v57  ;;  %v2446_v41 = vrot.slane %v9230_v12, %v9130_v60  ;;  %8366 = vrcp.f32 %v1786_v63 }
 0x2fb   :  { %v5000_v25 = vcombine.low %v4991_v16, %v4998_v22  ;;  %v1703_v29 = vmul.f32 1.442695, %v1597_v23  ;;  %v2450_v46 = vrot.slane %v9230_v12, %v9133_v61  ;;  %v5007_v9 = vrot.slane %v4999_v17, %v9137_v2 }
 0x2fc   :  { %v4722_v30 = vcombine.low %v2422_v11, %v2426_v13  ;;  %v4723_v4 = vcombine.low %v2430_v27, %v2434_v31  ;;  %v4724_v59 = vcombine.low %v2438_v36, %v2442_v54  ;;  %v9645_v24 = vpop.eup %8362  ;;  %v1787_v52 = vadd.f32 1.0, %v8361_v18  ;;  %v1424_v18 = vpop.xlane.xlu0 %1423 }
 0x2fd   :  { %v5014_v56 = vrot.slane %v5000_v25, %v9137_v2  ;;  %v4725_v62 = vcombine.low %v2446_v41, %v2450_v46  ;;  %v1534_v0 = vadd.f32 %v9099_v51, %v1421_v45  ;;  %8368 = vpow2.f32 %v1703_v29 }
 0x2fe   :  { %v4732_v63 = vrot.slane %v4722_v30, %v9137_v2  ;;  %v4739_v37 = vrot.slane %v4723_v4, %v9137_v2  ;;  %v4746_v12 = vrot.slane %v4724_v59, %v9137_v2  ;;  %v2646_v11 = vrot.slane %v9278_v28, %v9096_v49 }
 0x2ff   :  { %v5015_v3 = vcombine.low %v5007_v9, %v5014_v56  ;;  %v4753_v10 = vrot.slane %v4725_v62, %v9137_v2  ;;  %v1598_v50 = vsub.f32 0.0, %v1534_v0  ;;  %v2650_v16 = vrot.slane %v9278_v28, %v9113_v35 }
 0x300   :  { %v8365_v7 = vpop.eup %8364  ;;  %v4754_v14 = vcombine.low %v4732_v63, %v4739_v37  ;;  %v2654_v13 = vrot.slane %v9278_v28, %v9116_v39  ;;  %v2658_v22 = vrot.slane %v9278_v28, %v9119_v42  ;;  %8370 = vrcp.f32 %v1787_v52 }
 0x301   :  { %7184 = vperm.xlu0 %8202, %v5015_v3   ;;  %v4755_v23 = vcombine.low %v4746_v12, %v4753_v10  ;;  %v1705_v27 = vmul.f32 1.442695, %v1598_v50  ;;  %v2662_v31 = vrot.slane %v9278_v28, %v9122_v43  ;;  %v2666_v36 = vrot.slane %v9278_v28, %v9127_v57 }
 0x302   :  { %v4762_v17 = vrot.slane %v4754_v14, %v9137_v2  ;;  %v2670_v54 = vrot.slane %v9278_v28, %v9130_v60  ;;  %v2674_v41 = vrot.slane %v9278_v28, %v9133_v61  ;;  %v1788_v45 = vadd.f32 1.0, %v8365_v7 }
 0x303   :  { %v4769_v25 = vrot.slane %v4755_v23, %v9137_v2  ;;  %v5065_v29 = vcombine.low %v2646_v11, %v2650_v16  ;;  %v5066_v46 = vcombine.low %v2654_v13, %v2658_v22  ;;  %8372 = vpow2.f32 %v1705_v27  ;;  %v1427_v23 = vpop.xlane.xlu1 %1426 }
 0x304   :  { %v5067_v9 = vcombine.low %v2662_v31, %v2666_v36  ;;  %v5068_v30 = vcombine.low %v2670_v54, %v2674_v41  ;;  %v1535_v4 = vadd.f32 %v9099_v51, %v1424_v18  ;;  %v9672_v59 = vpop.eup %8366  ;;  %v2486_v28 = vrot.slane %v9246_v32, %v9096_v49 }
 0x305   :  { %v4770_v52 = vcombine.low %v4762_v17, %v4769_v25  ;;  %v5075_v56 = vrot.slane %v5065_v29, %v9137_v2  ;;  %v5082_v62 = vrot.slane %v5066_v46, %v9137_v2  ;;  %v2490_v12 = vrot.slane %v9246_v32, %v9113_v35 }
 0x306   :  { %v5089_v0 = vrot.slane %v5067_v9, %v9137_v2  ;;  %v5096_v63 = vrot.slane %v5068_v30, %v9137_v2  ;;  %v1599_v37 = vsub.f32 0.0, %v1535_v4  ;;  %v2494_v10 = vrot.slane %v9246_v32, %v9116_v39 }
 0x307   :  { %7169 = vperm.xlu1 %8203, %v4770_v52   ;;  %v5097_v3 = vcombine.low %v5075_v56, %v5082_v62  ;;  %v2498_v50 = vrot.slane %v9246_v32, %v9119_v42  ;;  %v2502_v11 = vrot.slane %v9246_v32, %v9122_v43  ;;  %v8369_v7 = vpop.eup %8368  ;;  %v2506_v13 = vrot.slane %v9246_v32, %v9127_v57 }
 0x308   :  { %v5098_v14 = vcombine.low %v5089_v0, %v5096_v63  ;;  %v1707_v16 = vmul.f32 1.442695, %v1599_v37  ;;  %v2510_v22 = vrot.slane %v9246_v32, %v9130_v60  ;;  %8374 = vrcp.f32 %v1788_v45 }
 0x309   :  { %v5105_v27 = vrot.slane %v5097_v3, %v9137_v2  ;;  %v2514_v31 = vrot.slane %v9246_v32, %v9133_v61  ;;  %v4820_v18 = vcombine.low %v2486_v28, %v2490_v12  ;;  %v4821_v36 = vcombine.low %v2494_v10, %v2498_v50  ;;  %v1430_v10 = vpop.xlane.xlu0 %1429 }
 0x30a   :  { %v5112_v17 = vrot.slane %v5098_v14, %v9137_v2  ;;  %8376 = vpow2.f32 %v1707_v16  ;;  %v4822_v54 = vcombine.low %v2502_v11, %v2506_v13  ;;  %v9696_v41 = vpop.eup %8370  ;;  %v1789_v25 = vadd.f32 1.0, %v8369_v7 }
 0x30b   :  { %v4823_v29 = vcombine.low %v2510_v22, %v2514_v31  ;;  %v4830_v46 = vrot.slane %v4820_v18, %v9137_v2  ;;  %v1536_v9 = vadd.f32 %v9099_v51, %v1427_v23  ;;  %v4837_v30 = vrot.slane %v4821_v36, %v9137_v2 }
 0x30c   :  { %v5113_v45 = vcombine.low %v5105_v27, %v5112_v17  ;;  %v4844_v4 = vrot.slane %v4822_v54, %v9137_v2  ;;  %v2710_v32 = vrot.slane %v9339_v34, %v9096_v49  ;;  %v2714_v62 = vrot.slane %v9339_v34, %v9113_v35 }
 0x30d   :  { %v4851_v52 = vrot.slane %v4823_v29, %v9137_v2  ;;  %v1600_v56 = vsub.f32 0.0, %v1536_v9  ;;  %v2718_v28 = vrot.slane %v9339_v34, %v9116_v39  ;;  %v8373_v0 = vpop.eup %8372  ;;  %v4852_v63 = vcombine.low %v4830_v46, %v4837_v30 }
 0x30e   :  { %7190 = vperm.xlu0 %8202, %v5113_v45   ;;  %v2722_v37 = vrot.slane %v9339_v34, %v9119_v42  ;;  %v2726_v12 = vrot.slane %v9339_v34, %v9122_v43  ;;  %v2730_v3 = vrot.slane %v9339_v34, %v9127_v57  ;;  %8378 = vrcp.f32 %v1789_v25 }
 0x30f   :  { %v4853_v50 = vcombine.low %v4844_v4, %v4851_v52  ;;  %v1709_v11 = vmul.f32 1.442695, %v1600_v56  ;;  %v2734_v7 = vrot.slane %v9339_v34, %v9130_v60  ;;  %v4860_v14 = vrot.slane %v4852_v63, %v9137_v2 }
 0x310   :  { %v2738_v16 = vrot.slane %v9339_v34, %v9133_v61  ;;  %v5163_v13 = vcombine.low %v2710_v32, %v2714_v62  ;;  %v5164_v22 = vcombine.low %v2718_v28, %v2722_v37  ;;  %v1790_v23 = vadd.f32 1.0, %v8373_v0  ;;  %v1433_v0 = vpop.xlane.xlu1 %1432 }
 0x311   :  { %v4867_v27 = vrot.slane %v4853_v50, %v9137_v2  ;;  %v5165_v31 = vcombine.low %v2726_v12, %v2730_v3  ;;  %v1537_v18 = vadd.f32 %v9099_v51, %v1430_v10  ;;  %8380 = vpow2.f32 %v1709_v11 }
 0x312   :  { %v5166_v17 = vcombine.low %v2734_v7, %v2738_v16  ;;  %v5173_v36 = vrot.slane %v5163_v13, %v9137_v2  ;;  %v5180_v54 = vrot.slane %v5164_v22, %v9137_v2  ;;  %v9724_v25 = vpop.eup %8374  ;;  %v2550_v9 = vrot.slane %v9263_v6, %v9096_v49 }
 0x313   :  { %v4868_v29 = vcombine.low %v4860_v14, %v4867_v27  ;;  %v5187_v46 = vrot.slane %v5165_v31, %v9137_v2  ;;  %v1601_v34 = vsub.f32 0.0, %v1537_v18  ;;  %v2554_v32 = vrot.slane %v9263_v6, %v9113_v35 }
 0x314   :  { %v8377_v45 = vpop.eup %8376  ;;  %v5194_v30 = vrot.slane %v5166_v17, %v9137_v2  ;;  %v5195_v4 = vcombine.low %v5173_v36, %v5180_v54  ;;  %v2558_v52 = vrot.slane %v9263_v6, %v9116_v39  ;;  %8382 = vrcp.f32 %v1790_v23 }
 0x315   :  { %7175 = vperm.xlu1 %8203, %v4868_v29   ;;  %v1711_v56 = vmul.f32 1.442695, %v1601_v34  ;;  %v2562_v62 = vrot.slane %v9263_v6, %v9119_v42  ;;  %v2566_v28 = vrot.slane %v9263_v6, %v9122_v43  ;;  %v2570_v12 = vrot.slane %v9263_v6, %v9127_v57 }
 0x316   :  { %v5196_v63 = vcombine.low %v5187_v46, %v5194_v30  ;;  %v5203_v37 = vrot.slane %v5195_v4, %v9137_v2  ;;  %v2574_v3 = vrot.slane %v9263_v6, %v9130_v60  ;;  %v1791_v10 = vadd.f32 1.0, %v8377_v45 }
 0x317   :  { %v2578_v50 = vrot.slane %v9263_v6, %v9133_v61  ;;  %v4918_v11 = vcombine.low %v2550_v9, %v2554_v32  ;;  %v4919_v7 = vcombine.low %v2558_v52, %v2562_v62  ;;  %8384 = vpow2.f32 %v1711_v56  ;;  %v1436_v56 = vpop.xlane.xlu0 %1435 }
 0x318   :  { %v5210_v14 = vrot.slane %v5196_v63, %v9137_v2  ;;  %v4920_v16 = vcombine.low %v2566_v28, %v2570_v12  ;;  %v1538_v13 = vadd.f32 %v9099_v51, %v1433_v0  ;;  %v9747_v22 = vpop.eup %8378  ;;  %v2774_v18 = vrot.slane %v9366_v19, %v9096_v49 }
 0x319   :  { %v4921_v23 = vcombine.low %v2574_v3, %v2578_v50  ;;  %v4928_v27 = vrot.slane %v4918_v11, %v9137_v2  ;;  %v4935_v31 = vrot.slane %v4919_v7, %v9137_v2  ;;  %v2778_v54 = vrot.slane %v9366_v19, %v9113_v35 }
 0x31a   :  { %v5211_v17 = vcombine.low %v5203_v37, %v5210_v14  ;;  %v4942_v6 = vrot.slane %v4920_v16, %v9137_v2  ;;  %v1602_v36 = vsub.f32 0.0, %v1538_v13  ;;  %v2782_v34 = vrot.slane %v9366_v19, %v9116_v39 }
 0x31b   :  { %v4949_v29 = vrot.slane %v4921_v23, %v9137_v2  ;;  %v4950_v46 = vcombine.low %v4928_v27, %v4935_v31  ;;  %v2786_v9 = vrot.slane %v9366_v19, %v9119_v42  ;;  %v8381_v45 = vpop.eup %8380  ;;  %v2790_v4 = vrot.slane %v9366_v19, %v9122_v43 }
 0x31c   :  { %7196 = vperm.xlu0 %8202, %v5211_v17   ;;  %v1713_v30 = vmul.f32 1.442695, %v1602_v36  ;;  %v2794_v32 = vrot.slane %v9366_v19, %v9127_v57  ;;  %v2798_v52 = vrot.slane %v9366_v19, %v9130_v60  ;;  %8386 = vrcp.f32 %v1791_v10 }
 0x31d   :  { %v4951_v62 = vcombine.low %v4942_v6, %v4949_v29  ;;  %v4958_v28 = vrot.slane %v4950_v46, %v9137_v2  ;;  %v2802_v0 = vrot.slane %v9366_v19, %v9133_v61  ;;  %v5261_v63 = vcombine.low %v2774_v18, %v2778_v54 }
 0x31e   :  { %8388 = vpow2.f32 %v1713_v30  ;;  %v5262_v37 = vcombine.low %v2782_v34, %v2786_v9  ;;  %v5263_v12 = vcombine.low %v2790_v4, %v2794_v32  ;;  %v9770_v3 = vpop.eup %8382  ;;  %v1792_v50 = vadd.f32 1.0, %v8381_v45  ;;  %v1439_v45 = vpop.xlane.xlu1 %1438 }
 0x31f   :  { %v4965_v11 = vrot.slane %v4951_v62, %v9137_v2  ;;  %v5264_v7 = vcombine.low %v2798_v52, %v2802_v0  ;;  %v1539_v14 = vadd.f32 %v9099_v51, %v1436_v56  ;;  %v5271_v10 = vrot.slane %v5261_v63, %v9137_v2 }
 0x320   :  { %v5278_v16 = vrot.slane %v5262_v37, %v9137_v2  ;;  %v5285_v13 = vrot.slane %v5263_v12, %v9137_v2  ;;  %v2614_v19 = vrot.slane %v9272_v21, %v9096_v49  ;;  %v2618_v18 = vrot.slane %v9272_v21, %v9113_v35 }
 0x321   :  { %v4966_v23 = vcombine.low %v4958_v28, %v4965_v11  ;;  %v5292_v27 = vrot.slane %v5264_v7, %v9137_v2  ;;  %v1603_v31 = vsub.f32 0.0, %v1539_v14  ;;  %v8385_v17 = vpop.eup %8384  ;;  %v2622_v36 = vrot.slane %v9272_v21, %v9116_v39 }
 0x322   :  { %v5293_v6 = vcombine.low %v5271_v10, %v5278_v16  ;;  %v2626_v54 = vrot.slane %v9272_v21, %v9119_v42  ;;  %v2630_v29 = vrot.slane %v9272_v21, %v9122_v43  ;;  %8390 = vrcp.f32 %v1792_v50 }
 0x323   :  { %7181 = vperm.xlu1 %8203, %v4966_v23   ;;  %v5294_v46 = vcombine.low %v5285_v13, %v5292_v27  ;;  %v1715_v34 = vmul.f32 1.442695, %v1603_v31  ;;  %v2634_v9 = vrot.slane %v9272_v21, %v9127_v57  ;;  %v2638_v4 = vrot.slane %v9272_v21, %v9130_v60 }
 0x324   :  { %v5301_v30 = vrot.slane %v5293_v6, %v9137_v2  ;;  %v2642_v32 = vrot.slane %v9272_v21, %v9133_v61  ;;  %v5016_v52 = vcombine.low %v2614_v19, %v2618_v18  ;;  %v1793_v56 = vadd.f32 1.0, %v8385_v17 }
 0x325   :  { %v5308_v62 = vrot.slane %v5294_v46, %v9137_v2  ;;  %v5017_v28 = vcombine.low %v2622_v36, %v2626_v54  ;;  %v5018_v0 = vcombine.low %v2630_v29, %v2634_v9  ;;  %8392 = vpow2.f32 %v1715_v34  ;;  %v1442_v29 = vpop.xlane.xlu0 %1441 }
 0x326   :  { %v5019_v63 = vcombine.low %v2638_v4, %v2642_v32  ;;  %v5026_v37 = vrot.slane %v5016_v52, %v9137_v2  ;;  %v1540_v12 = vadd.f32 %v9099_v51, %v1439_v45  ;;  %v9798_v50 = vpop.eup %8386  ;;  %v2838_v21 = vrot.slane %v9395_v5, %v9096_v49 }
 0x327   :  { %v5309_v11 = vcombine.low %v5301_v30, %v5308_v62  ;;  %v5033_v7 = vrot.slane %v5017_v28, %v9137_v2  ;;  %v5040_v14 = vrot.slane %v5018_v0, %v9137_v2  ;;  %v2842_v19 = vrot.slane %v9395_v5, %v9113_v35 }
 0x328   :  { %v8389_v10 = vpop.eup %8388  ;;  %v5047_v16 = vrot.slane %v5019_v63, %v9137_v2  ;;  %v1604_v13 = vsub.f32 0.0, %v1540_v12  ;;  %v2846_v23 = vrot.slane %v9395_v5, %v9116_v39  ;;  %8394 = vrcp.f32 %v1793_v56 }
 0x329   :  { %7202 = vperm.xlu0 %8202, %v5309_v11   ;;  %v5048_v27 = vcombine.low %v5026_v37, %v5033_v7  ;;  %v2850_v31 = vrot.slane %v9395_v5, %v9119_v42  ;;  %v2854_v18 = vrot.slane %v9395_v5, %v9122_v43  ;;  %v2858_v36 = vrot.slane %v9395_v5, %v9127_v57 }
 0x32a   :  { %v5049_v17 = vcombine.low %v5040_v14, %v5047_v16  ;;  %v1717_v6 = vmul.f32 1.442695, %v1604_v13  ;;  %v2862_v54 = vrot.slane %v9395_v5, %v9130_v60  ;;  %v1794_v46 = vadd.f32 1.0, %v8389_v10 }
 0x32b   :  { %v5056_v34 = vrot.slane %v5048_v27, %v9137_v2  ;;  %v2866_v9 = vrot.slane %v9395_v5, %v9133_v61  ;;  %v5359_v45 = vcombine.low %v2838_v21, %v2842_v19  ;;  %v5360_v4 = vcombine.low %v2846_v23, %v2850_v31  ;;  %v1445_v27 = vpop.xlane.xlu1 %1444 }
 0x32c   :  { %v5063_v30 = vrot.slane %v5049_v17, %v9137_v2  ;;  %8396 = vpow2.f32 %v1717_v6  ;;  %v5361_v32 = vcombine.low %v2854_v18, %v2858_v36  ;;  %v9821_v52 = vpop.eup %8390  ;;  %v1541_v28 = vadd.f32 %v9099_v51, %v1442_v29 }
 0x32d   :  { %v5362_v56 = vcombine.low %v2862_v54, %v2866_v9  ;;  %v5369_v62 = vrot.slane %v5359_v45, %v9137_v2  ;;  %v2678_v0 = vrot.slane %v9305_v26, %v9096_v49  ;;  %v5376_v37 = vrot.slane %v5360_v4, %v9137_v2 }
 0x32e   :  { %v5064_v63 = vcombine.low %v5056_v34, %v5063_v30  ;;  %v5383_v5 = vrot.slane %v5361_v32, %v9137_v2  ;;  %v2682_v12 = vrot.slane %v9305_v26, %v9113_v35  ;;  %v1605_v7 = vsub.f32 0.0, %v1541_v28 }
 0x32f   :  { %v5390_v11 = vrot.slane %v5362_v56, %v9137_v2  ;;  %v2686_v14 = vrot.slane %v9305_v26, %v9116_v39  ;;  %v2690_v21 = vrot.slane %v9305_v26, %v9119_v42  ;;  %v8393_v10 = vpop.eup %8392  ;;  %v5391_v16 = vcombine.low %v5369_v62, %v5376_v37 }
 0x330   :  { %7187 = vperm.xlu1 %8203, %v5064_v63   ;;  %v2694_v13 = vrot.slane %v9305_v26, %v9122_v43  ;;  %v2698_v19 = vrot.slane %v9305_v26, %v9127_v57  ;;  %v2702_v23 = vrot.slane %v9305_v26, %v9130_v60  ;;  %8398 = vrcp.f32 %v1794_v46 }
 0x331   :  { %v5392_v31 = vcombine.low %v5383_v5, %v5390_v11  ;;  %v1719_v18 = vmul.f32 1.442695, %v1605_v7  ;;  %v2706_v17 = vrot.slane %v9305_v26, %v9133_v61  ;;  %v5399_v6 = vrot.slane %v5391_v16, %v9137_v2 }
 0x332   :  { %v5114_v36 = vcombine.low %v2678_v0, %v2682_v12  ;;  %v5115_v54 = vcombine.low %v2686_v14, %v2690_v21  ;;  %v5116_v29 = vcombine.low %v2694_v13, %v2698_v19  ;;  %v9845_v34 = vpop.eup %8394  ;;  %v1795_v9 = vadd.f32 1.0, %v8393_v10  ;;  %v1448_v10 = vpop.xlane.xlu0 %1447 }
 0x333   :  { %v5406_v45 = vrot.slane %v5392_v31, %v9137_v2  ;;  %v5117_v30 = vcombine.low %v2702_v23, %v2706_v17  ;;  %v1542_v4 = vadd.f32 %v9099_v51, %v1445_v27  ;;  %8400 = vpow2.f32 %v1719_v18 }
 0x334   :  { %v5124_v46 = vrot.slane %v5114_v36, %v9137_v2  ;;  %v5131_v32 = vrot.slane %v5115_v54, %v9137_v2  ;;  %v5138_v26 = vrot.slane %v5116_v29, %v9137_v2  ;;  %v2902_v0 = vrot.slane %v9445_v8, %v9096_v49 }
 0x335   :  { %v5407_v56 = vcombine.low %v5399_v6, %v5406_v45  ;;  %v5145_v62 = vrot.slane %v5117_v30, %v9137_v2  ;;  %v1606_v28 = vsub.f32 0.0, %v1542_v4  ;;  %v2906_v5 = vrot.slane %v9445_v8, %v9113_v35 }
 0x336   :  { %v8397_v63 = vpop.eup %8396  ;;  %v5146_v37 = vcombine.low %v5124_v46, %v5131_v32  ;;  %v2910_v12 = vrot.slane %v9445_v8, %v9116_v39  ;;  %v2914_v11 = vrot.slane %v9445_v8, %v9119_v42  ;;  %8402 = vrcp.f32 %v1795_v9 }
 0x337   :  { %7208 = vperm.xlu0 %8202, %v5407_v56   ;;  %v5147_v7 = vcombine.low %v5138_v26, %v5145_v62  ;;  %v1721_v14 = vmul.f32 1.442695, %v1606_v28  ;;  %v2918_v21 = vrot.slane %v9445_v8, %v9122_v43  ;;  %v2922_v13 = vrot.slane %v9445_v8, %v9127_v57 }
 0x338   :  { %v5154_v16 = vrot.slane %v5146_v37, %v9137_v2  ;;  %v2926_v19 = vrot.slane %v9445_v8, %v9130_v60  ;;  %v2930_v23 = vrot.slane %v9445_v8, %v9133_v61  ;;  %v1796_v27 = vadd.f32 1.0, %v8397_v63 }
 0x339   :  { %v5161_v31 = vrot.slane %v5147_v7, %v9137_v2  ;;  %v5457_v18 = vcombine.low %v2902_v0, %v2906_v5  ;;  %v5458_v17 = vcombine.low %v2910_v12, %v2914_v11  ;;  %8404 = vpow2.f32 %v1721_v14  ;;  %v1451_v7 = vpop.xlane.xlu1 %1450 }
 0x33a   :  { %v5459_v6 = vcombine.low %v2918_v21, %v2922_v13  ;;  %v5460_v36 = vcombine.low %v2926_v19, %v2930_v23  ;;  %v1543_v54 = vadd.f32 %v9099_v51, %v1448_v10  ;;  %v9872_v29 = vpop.eup %8398  ;;  %v2742_v8 = vrot.slane %v9345_v53, %v9096_v49 }
 0x33b   :  { %v5162_v9 = vcombine.low %v5154_v16, %v5161_v31  ;;  %v5467_v45 = vrot.slane %v5457_v18, %v9137_v2  ;;  %v5474_v30 = vrot.slane %v5458_v17, %v9137_v2  ;;  %v2746_v26 = vrot.slane %v9345_v53, %v9113_v35 }
 0x33c   :  { %v5481_v4 = vrot.slane %v5459_v6, %v9137_v2  ;;  %v5488_v46 = vrot.slane %v5460_v36, %v9137_v2  ;;  %v1607_v32 = vsub.f32 0.0, %v1543_v54  ;;  %v2750_v62 = vrot.slane %v9345_v53, %v9116_v39 }
 0x33d   :  { %7193 = vperm.xlu1 %8203, %v5162_v9   ;;  %v5489_v56 = vcombine.low %v5467_v45, %v5474_v30  ;;  %v2754_v28 = vrot.slane %v9345_v53, %v9119_v42  ;;  %v2758_v0 = vrot.slane %v9345_v53, %v9122_v43  ;;  %v8401_v63 = vpop.eup %8400  ;;  %v2762_v12 = vrot.slane %v9345_v53, %v9127_v57 }
 0x33e   :  { %v5490_v37 = vcombine.low %v5481_v4, %v5488_v46  ;;  %v1723_v5 = vmul.f32 1.442695, %v1607_v32  ;;  %v2766_v11 = vrot.slane %v9345_v53, %v9130_v60  ;;  %8406 = vrcp.f32 %v1796_v27 }
 0x33f   :  { %v5497_v14 = vrot.slane %v5489_v56, %v9137_v2  ;;  %v2770_v21 = vrot.slane %v9345_v53, %v9133_v61  ;;  %v5212_v10 = vcombine.low %v2742_v8, %v2746_v26  ;;  %v5213_v13 = vcombine.low %v2750_v62, %v2754_v28  ;;  %v1454_v62 = vpop.xlane.xlu0 %1453 }
 0x340   :  { %v5504_v16 = vrot.slane %v5490_v37, %v9137_v2  ;;  %8408 = vpow2.f32 %v1723_v5  ;;  %v5214_v19 = vcombine.low %v2758_v0, %v2762_v12  ;;  %v9896_v23 = vpop.eup %8402  ;;  %v1797_v31 = vadd.f32 1.0, %v8401_v63 }
 0x341   :  { %v5215_v18 = vcombine.low %v2766_v11, %v2770_v21  ;;  %v5222_v17 = vrot.slane %v5212_v10, %v9137_v2  ;;  %v1544_v6 = vadd.f32 %v9099_v51, %v1451_v7  ;;  %v5229_v36 = vrot.slane %v5213_v13, %v9137_v2 }
 0x342   :  { %v5505_v27 = vcombine.low %v5497_v14, %v5504_v16  ;;  %v5236_v54 = vrot.slane %v5214_v19, %v9137_v2  ;;  %v2966_v53 = vrot.slane %v9496_v55, %v9096_v49  ;;  %v2970_v30 = vrot.slane %v9496_v55, %v9113_v35 }
 0x343   :  { %v5243_v9 = vrot.slane %v5215_v18, %v9137_v2  ;;  %v1608_v45 = vsub.f32 0.0, %v1544_v6  ;;  %v2974_v8 = vrot.slane %v9496_v55, %v9116_v39  ;;  %v8405_v4 = vpop.eup %8404  ;;  %v5244_v46 = vcombine.low %v5222_v17, %v5229_v36 }
 0x344   :  { %7214 = vperm.xlu0 %8202, %v5505_v27   ;;  %v2978_v32 = vrot.slane %v9496_v55, %v9119_v42  ;;  %v2982_v26 = vrot.slane %v9496_v55, %v9122_v43  ;;  %v2986_v56 = vrot.slane %v9496_v55, %v9127_v57  ;;  %8410 = vrcp.f32 %v1797_v31 }
 0x345   :  { %v5245_v28 = vcombine.low %v5236_v54, %v5243_v9  ;;  %v1725_v0 = vmul.f32 1.442695, %v1608_v45  ;;  %v2990_v63 = vrot.slane %v9496_v55, %v9130_v60  ;;  %v5252_v37 = vrot.slane %v5244_v46, %v9137_v2 }
 0x346   :  { %v2994_v5 = vrot.slane %v9496_v55, %v9133_v61  ;;  %v5555_v12 = vcombine.low %v2966_v53, %v2970_v30  ;;  %v5556_v11 = vcombine.low %v2974_v8, %v2978_v32  ;;  %v1798_v7 = vadd.f32 1.0, %v8405_v4  ;;  %v1457_v4 = vpop.xlane.xlu1 %1456 }
 0x347   :  { %v5259_v14 = vrot.slane %v5245_v28, %v9137_v2  ;;  %v5557_v21 = vcombine.low %v2982_v26, %v2986_v56  ;;  %v1545_v10 = vadd.f32 %v9099_v51, %v1454_v62  ;;  %8412 = vpow2.f32 %v1725_v0 }
 0x348   :  { %v5558_v16 = vcombine.low %v2990_v63, %v2994_v5  ;;  %v5565_v13 = vrot.slane %v5555_v12, %v9137_v2  ;;  %v5572_v19 = vrot.slane %v5556_v11, %v9137_v2  ;;  %v9924_v31 = vpop.eup %8406  ;;  %v2806_v6 = vrot.slane %v9370_v33, %v9096_v49 }
 0x349   :  { %v5260_v18 = vcombine.low %v5252_v37, %v5259_v14  ;;  %v5579_v17 = vrot.slane %v5557_v21, %v9137_v2  ;;  %v1609_v55 = vsub.f32 0.0, %v1545_v10  ;;  %v2810_v53 = vrot.slane %v9370_v33, %v9113_v35 }
 0x34a   :  { %v8409_v27 = vpop.eup %8408  ;;  %v5586_v36 = vrot.slane %v5558_v16, %v9137_v2  ;;  %v5587_v54 = vcombine.low %v5565_v13, %v5572_v19  ;;  %v2814_v9 = vrot.slane %v9370_v33, %v9116_v39  ;;  %8414 = vrcp.f32 %v1798_v7 }
 0x34b   :  { %7199 = vperm.xlu1 %8203, %v5260_v18   ;;  %v1727_v45 = vmul.f32 1.442695, %v1609_v55  ;;  %v2818_v30 = vrot.slane %v9370_v33, %v9119_v42  ;;  %v2822_v8 = vrot.slane %v9370_v33, %v9122_v43  ;;  %v2826_v26 = vrot.slane %v9370_v33, %v9127_v57 }
 0x34c   :  { %v5588_v46 = vcombine.low %v5579_v17, %v5586_v36  ;;  %v5595_v32 = vrot.slane %v5587_v54, %v9137_v2  ;;  %v2830_v56 = vrot.slane %v9370_v33, %v9130_v60  ;;  %v1799_v62 = vadd.f32 1.0, %v8409_v27 }
 0x34d   :  { %v2834_v28 = vrot.slane %v9370_v33, %v9133_v61  ;;  %v5310_v0 = vcombine.low %v2806_v6, %v2810_v53  ;;  %v5311_v63 = vcombine.low %v2814_v9, %v2818_v30  ;;  %8416 = vpow2.f32 %v1727_v45  ;;  %v1460_v45 = vpop.xlane.xlu0 %1459 }
 0x34e   :  { %v5602_v37 = vrot.slane %v5588_v46, %v9137_v2  ;;  %v5312_v5 = vcombine.low %v2822_v8, %v2826_v26  ;;  %v1546_v12 = vadd.f32 %v9099_v51, %v1457_v4  ;;  %v9947_v11 = vpop.eup %8410  ;;  %v3030_v10 = vrot.slane %v9547_v38, %v9096_v49 }
 0x34f   :  { %v5313_v7 = vcombine.low %v2830_v56, %v2834_v28  ;;  %v5320_v14 = vrot.slane %v5310_v0, %v9137_v2  ;;  %v5327_v21 = vrot.slane %v5311_v63, %v9137_v2  ;;  %v3034_v19 = vrot.slane %v9547_v38, %v9113_v35 }
 0x350   :  { %v5603_v16 = vcombine.low %v5595_v32, %v5602_v37  ;;  %v5334_v33 = vrot.slane %v5312_v5, %v9137_v2  ;;  %v1610_v13 = vsub.f32 0.0, %v1546_v12  ;;  %v3038_v55 = vrot.slane %v9547_v38, %v9116_v39 }
 0x351   :  { %v5341_v18 = vrot.slane %v5313_v7, %v9137_v2  ;;  %v5342_v17 = vcombine.low %v5320_v14, %v5327_v21  ;;  %v3042_v6 = vrot.slane %v9547_v38, %v9119_v42  ;;  %v8413_v27 = vpop.eup %8412  ;;  %v3046_v54 = vrot.slane %v9547_v38, %v9122_v43 }
 0x352   :  { %7220 = vperm.xlu0 %8202, %v5603_v16   ;;  %v1729_v36 = vmul.f32 1.442695, %v1610_v13  ;;  %v3050_v53 = vrot.slane %v9547_v38, %v9127_v57  ;;  %v3054_v9 = vrot.slane %v9547_v38, %v9130_v60  ;;  %8418 = vrcp.f32 %v1799_v62 }
 0x353   :  { %v5343_v30 = vcombine.low %v5334_v33, %v5341_v18  ;;  %v5350_v8 = vrot.slane %v5342_v17, %v9137_v2  ;;  %v3058_v4 = vrot.slane %v9547_v38, %v9133_v61  ;;  %v5653_v46 = vcombine.low %v3030_v10, %v3034_v19 }
 0x354   :  { %8420 = vpow2.f32 %v1729_v36  ;;  %v5654_v32 = vcombine.low %v3038_v55, %v3042_v6  ;;  %v5655_v26 = vcombine.low %v3046_v54, %v3050_v53  ;;  %v9970_v56 = vpop.eup %8414  ;;  %v1800_v28 = vadd.f32 1.0, %v8413_v27  ;;  %v1463_v6 = vpop.xlane.xlu1 %1462 }
 0x355   :  { %v5357_v0 = vrot.slane %v5343_v30, %v9137_v2  ;;  %v5656_v63 = vcombine.low %v3054_v9, %v3058_v4  ;;  %v1547_v37 = vadd.f32 %v9099_v51, %v1460_v45  ;;  %v5663_v62 = vrot.slane %v5653_v46, %v9137_v2 }
 0x356   :  { %v5670_v5 = vrot.slane %v5654_v32, %v9137_v2  ;;  %v5677_v12 = vrot.slane %v5655_v26, %v9137_v2  ;;  %v2870_v38 = vrot.slane %v9421_v15, %v9096_v49  ;;  %v2874_v10 = vrot.slane %v9421_v15, %v9113_v35 }
 0x357   :  { %v5358_v7 = vcombine.low %v5350_v8, %v5357_v0  ;;  %v5684_v14 = vrot.slane %v5656_v63, %v9137_v2  ;;  %v1611_v21 = vsub.f32 0.0, %v1547_v37  ;;  %v8417_v16 = vpop.eup %8416  ;;  %v2878_v13 = vrot.slane %v9421_v15, %v9116_v39 }
 0x358   :  { %v5685_v33 = vcombine.low %v5663_v62, %v5670_v5  ;;  %v2882_v19 = vrot.slane %v9421_v15, %v9119_v42  ;;  %v2886_v18 = vrot.slane %v9421_v15, %v9122_v43  ;;  %8422 = vrcp.f32 %v1800_v28 }
 0x359   :  { %7205 = vperm.xlu1 %8203, %v5358_v7   ;;  %v5686_v17 = vcombine.low %v5677_v12, %v5684_v14  ;;  %v2890_v55 = vrot.slane %v9421_v15, %v9127_v57  ;;  %v2894_v36 = vrot.slane %v9421_v15, %v9130_v60  ;;  %v2898_v54 = vrot.slane %v9421_v15, %v9133_v61 }
 0x35a   :  { %v5693_v27 = vrot.slane %v5685_v33, %v9137_v2  ;;  %v5408_v53 = vcombine.low %v2870_v38, %v2874_v10  ;;  %v1801_v9 = vadd.f32 1.0, %v8417_v16  ;;  %v5409_v30 = vcombine.low %v2878_v13, %v2882_v19  ;;  %v1466_v19 = vpop.xlane.xlu0 %1465 }
 0x35b   :  { %v5700_v45 = vrot.slane %v5686_v17, %v9137_v2  ;;  %v5410_v8 = vcombine.low %v2886_v18, %v2890_v55  ;;  %v1731_v4 = vmul.f32 1.442695, %v1611_v21  ;;  %v5411_v46 = vcombine.low %v2894_v36, %v2898_v54 }
 0x35c   :  { %v5418_v32 = vrot.slane %v5408_v53, %v9137_v2  ;;  %v1548_v26 = vadd.f32 %v9099_v51, %v1463_v6  ;;  %v9998_v28 = vpop.eup %8418  ;;  %v5425_v63 = vrot.slane %v5409_v30, %v9137_v2  ;;  %v3094_v15 = vrot.slane %v9598_v44, %v9096_v49 }
 0x35d   :  { %v5701_v0 = vcombine.low %v5693_v27, %v5700_v45  ;;  %v5432_v37 = vrot.slane %v5410_v8, %v9137_v2  ;;  %v5439_v5 = vrot.slane %v5411_v46, %v9137_v2  ;;  %v3098_v38 = vrot.slane %v9598_v44, %v9113_v35 }
 0x35e   :  { %v8421_v62 = vpop.eup %8420  ;;  %v1612_v12 = vsub.f32 0.0, %v1548_v26  ;;  %v3102_v7 = vrot.slane %v9598_v44, %v9116_v39  ;;  %8424 = vrcp.f32 %v1801_v9  ;;  %v5440_v14 = vcombine.low %v5418_v32, %v5425_v63 }
 0x35f   :  { %7226 = vperm.xlu0 %8202, %v5701_v0   ;;  %v3106_v21 = vrot.slane %v9598_v44, %v9119_v42  ;;  %v3110_v10 = vrot.slane %v9598_v44, %v9122_v43  ;;  %8426 = vpow2.f32 %v1731_v4  ;;  %v5441_v16 = vcombine.low %v5432_v37, %v5439_v5 }
 0x360   :  { %v3114_v33 = vrot.slane %v9598_v44, %v9127_v57  ;;  %v3118_v13 = vrot.slane %v9598_v44, %v9130_v60  ;;  %v1802_v18 = vadd.f32 1.0, %v8421_v62  ;;  %v5448_v17 = vrot.slane %v5440_v14, %v9137_v2 }
 0x361   :  { %v3122_v55 = vrot.slane %v9598_v44, %v9133_v61  ;;  %v5751_v6 = vcombine.low %v3094_v15, %v3098_v38  ;;  %v5455_v27 = vrot.slane %v5441_v16, %v9137_v2  ;;  %v1733_v36 = vmul.f32 1.442695, %v1612_v12 }
 0x362   :  { %v5752_v54 = vcombine.low %v3102_v7, %v3106_v21  ;;  %v5753_v53 = vcombine.low %v3110_v10, %v3114_v33  ;;  %v10021_v9 = vpop.eup %8422  ;;  %v1549_v8 = vadd.f32 %v9099_v51, %v1466_v19  ;;  %v2934_v4 = vrot.slane %v9472_v1, %v9096_v49  ;;  %v1469_v7 = vpop.xlane.xlu1 %1468 }
 0x363   :  { %v5754_v45 = vcombine.low %v3118_v13, %v3122_v55  ;;  %v5761_v30 = vrot.slane %v5751_v6, %v9137_v2  ;;  %v5456_v46 = vcombine.low %v5448_v17, %v5455_v27  ;;  %v2938_v26 = vrot.slane %v9472_v1, %v9113_v35 }
 0x364   :  { %v5768_v32 = vrot.slane %v5752_v54, %v9137_v2  ;;  %v5775_v44 = vrot.slane %v5753_v53, %v9137_v2  ;;  %v1613_v63 = vsub.f32 0.0, %v1549_v8  ;;  %v2942_v37 = vrot.slane %v9472_v1, %v9116_v39 }
 0x365   :  { %v5782_v0 = vrot.slane %v5754_v45, %v9137_v2  ;;  %v2946_v15 = vrot.slane %v9472_v1, %v9119_v42  ;;  %7211 = vperm.xlu1 %8203, %v5456_v46   ;;  %v2950_v5 = vrot.slane %v9472_v1, %v9122_v43  ;;  %v2954_v12 = vrot.slane %v9472_v1, %v9127_v57 }
 0x366   :  { %v5783_v62 = vcombine.low %v5761_v30, %v5768_v32  ;;  %v2958_v38 = vrot.slane %v9472_v1, %v9130_v60  ;;  %8428 = vrcp.f32 %v1802_v18  ;;  %v2962_v21 = vrot.slane %v9472_v1, %v9133_v61 }
 0x367   :  { %v5784_v14 = vcombine.low %v5775_v44, %v5782_v0  ;;  %v5506_v16 = vcombine.low %v2934_v4, %v2938_v26  ;;  %v5507_v33 = vcombine.low %v2942_v37, %v2946_v15  ;;  %v5508_v13 = vcombine.low %v2950_v5, %v2954_v12  ;;  %v1472_v15 = vpop.xlane.xlu0 %1471 }
 0x368   :  { %v5791_v10 = vrot.slane %v5783_v62, %v9137_v2  ;;  %v10045_v19 = vpop.eup %8424  ;;  %8430 = vpow2.f32 %v1733_v36  ;;  %v5509_v55 = vcombine.low %v2958_v38, %v2962_v21  ;;  %v1550_v6 = vadd.f32 %v9099_v51, %v1469_v7 }
 0x369   :  { %v5798_v17 = vrot.slane %v5784_v14, %v9137_v2  ;;  %v8427_v27 = vpop.eup %8426  ;;  %v1735_v54 = vmul.f32 1.442695, %v1613_v63  ;;  %v5516_v18 = vrot.slane %v5506_v16, %v9137_v2  ;;  %v5523_v53 = vrot.slane %v5507_v33, %v9137_v2 }
 0x36a   :  { %v5530_v1 = vrot.slane %v5508_v13, %v9137_v2  ;;  %v5537_v30 = vrot.slane %v5509_v55, %v9137_v2  ;;  %v1614_v8 = vsub.f32 0.0, %v1550_v6  ;;  %v3158_v36 = vrot.slane %v9645_v24, %v9096_v49 }
 0x36b   :  { %v5799_v45 = vcombine.low %v5791_v10, %v5798_v17  ;;  %v5538_v4 = vcombine.low %v5516_v18, %v5523_v53  ;;  %v3162_v46 = vrot.slane %v9645_v24, %v9113_v35  ;;  %v3166_v32 = vrot.slane %v9645_v24, %v9116_v39 }
 0x36c   :  { %v3170_v44 = vrot.slane %v9645_v24, %v9119_v42  ;;  %v1803_v26 = vadd.f32 1.0, %v8427_v27  ;;  %v5539_v0 = vcombine.low %v5530_v1, %v5537_v30  ;;  %v1737_v63 = vmul.f32 1.442695, %v1614_v8 }
 0x36d   :  { %7232 = vperm.xlu0 %8202, %v5799_v45   ;;  %v3174_v37 = vrot.slane %v9645_v24, %v9122_v43  ;;  %v5546_v62 = vrot.slane %v5538_v4, %v9137_v2  ;;  %v3178_v5 = vrot.slane %v9645_v24, %v9127_v57  ;;  %v3182_v12 = vrot.slane %v9645_v24, %v9130_v60 }
 0x36e   :  { %v3186_v38 = vrot.slane %v9645_v24, %v9133_v61  ;;  %8432 = vpow2.f32 %v1735_v54  ;;  %v5553_v7 = vrot.slane %v5539_v0, %v9137_v2  ;;  %v5849_v14 = vcombine.low %v3158_v36, %v3162_v46  ;;  %v1475_v0 = vpop.xlane.xlu1 %1474 }
 0x36f   :  { %v5850_v21 = vcombine.low %v3166_v32, %v3170_v44  ;;  %8434 = vpow2.f32 %v1737_v63  ;;  %v5851_v10 = vcombine.low %v3174_v37, %v3178_v5  ;;  %v1551_v33 = vadd.f32 %v9099_v51, %v1472_v15 }
 0x370   :  { %v5852_v16 = vcombine.low %v3182_v12, %v3186_v38  ;;  %v10072_v13 = vpop.eup %8428  ;;  %v5554_v17 = vcombine.low %v5546_v62, %v5553_v7  ;;  %v5859_v55 = vrot.slane %v5849_v14, %v9137_v2  ;;  %v2998_v24 = vrot.slane %v9524_v58, %v9096_v49 }
 0x371   :  { %v5866_v6 = vrot.slane %v5850_v21, %v9137_v2  ;;  %v5873_v27 = vrot.slane %v5851_v10, %v9137_v2  ;;  %v1615_v18 = vsub.f32 0.0, %v1551_v33  ;;  %v3002_v53 = vrot.slane %v9524_v58, %v9113_v35 }
 0x372   :  { %v5880_v54 = vrot.slane %v5852_v16, %v9137_v2  ;;  %v8431_v1 = vpop.eup %8430  ;;  %7217 = vperm.xlu1 %8203, %v5554_v17   ;;  %v3006_v30 = vrot.slane %v9524_v58, %v9116_v39  ;;  %v3010_v8 = vrot.slane %v9524_v58, %v9119_v42  ;;  %v3014_v36 = vrot.slane %v9524_v58, %v9122_v43 }
 0x373   :  { %v5881_v45 = vcombine.low %v5859_v55, %v5866_v6  ;;  %v1739_v46 = vmul.f32 1.442695, %v1615_v18  ;;  %v3018_v32 = vrot.slane %v9524_v58, %v9127_v57  ;;  %v3022_v44 = vrot.slane %v9524_v58, %v9130_v60 }
 0x374   :  { %v5882_v4 = vcombine.low %v5873_v27, %v5880_v54  ;;  %8436 = vrcp.f32 %v1803_v26  ;;  %v3026_v37 = vrot.slane %v9524_v58, %v9133_v61  ;;  %v5604_v15 = vcombine.low %v2998_v24, %v3002_v53 }
 0x375   :  { %v5889_v63 = vrot.slane %v5881_v45, %v9137_v2  ;;  %v1804_v62 = vadd.f32 1.0, %v8431_v1  ;;  %v5605_v12 = vcombine.low %v3006_v30, %v3010_v8  ;;  %v5606_v38 = vcombine.low %v3014_v36, %v3018_v32  ;;  %v1478_v45 = vpop.xlane.xlu0 %1477 }
 0x376   :  { %v5896_v5 = vrot.slane %v5882_v4, %v9137_v2  ;;  %8438 = vpow2.f32 %v1739_v46  ;;  %v5607_v7 = vcombine.low %v3022_v44, %v3026_v37  ;;  %v5614_v14 = vrot.slane %v5604_v15, %v9137_v2 }
 0x377   :  { %v1552_v21 = vadd.f32 %v9099_v51, %v1475_v0  ;;  %v5621_v26 = vrot.slane %v5605_v12, %v9137_v2  ;;  %v5628_v16 = vrot.slane %v5606_v38, %v9137_v2  ;;  %v3222_v58 = vrot.slane %v9696_v41, %v9096_v49 }
 0x378   :  { %v5897_v10 = vcombine.low %v5889_v63, %v5896_v5  ;;  %v8433_v33 = vpop.eup %8432  ;;  %v5635_v17 = vrot.slane %v5607_v7, %v9137_v2  ;;  %v3226_v6 = vrot.slane %v9696_v41, %v9113_v35  ;;  %v3230_v24 = vrot.slane %v9696_v41, %v9116_v39 }
 0x379   :  { %v1616_v55 = vsub.f32 0.0, %v1552_v21  ;;  %v8435_v27 = vpop.eup %8434  ;;  %v5636_v54 = vcombine.low %v5614_v14, %v5621_v26  ;;  %v3234_v18 = vrot.slane %v9696_v41, %v9119_v42  ;;  %v3238_v53 = vrot.slane %v9696_v41, %v9122_v43 }
 0x37a   :  { %7238 = vperm.xlu0 %8202, %v5897_v10   ;;  %v3242_v1 = vrot.slane %v9696_v41, %v9127_v57  ;;  %8440 = vrcp.f32 %v1804_v62  ;;  %v5637_v30 = vcombine.low %v5628_v16, %v5635_v17  ;;  %v3246_v8 = vrot.slane %v9696_v41, %v9130_v60 }
 0x37b   :  { %v5644_v36 = vrot.slane %v5636_v54, %v9137_v2  ;;  %v3250_v4 = vrot.slane %v9696_v41, %v9133_v61  ;;  %v5947_v46 = vcombine.low %v3222_v58, %v3226_v6  ;;  %v5948_v32 = vcombine.low %v3230_v24, %v3234_v18 }
 0x37c   :  { %v1805_v44 = vadd.f32 1.0, %v8433_v33  ;;  %v5651_v0 = vrot.slane %v5637_v30, %v9137_v2  ;;  %v5949_v63 = vcombine.low %v3238_v53, %v3242_v1  ;;  %v1553_v37 = vadd.f32 %v9099_v51, %v1478_v45  ;;  %v1481_v1 = vpop.xlane.xlu1 %1480 }
 0x37d   :  { %v1741_v15 = vmul.f32 1.442695, %v1616_v55  ;;  %v5950_v5 = vcombine.low %v3246_v8, %v3250_v4  ;;  %v5957_v62 = vrot.slane %v5947_v46, %v9137_v2  ;;  %v5964_v12 = vrot.slane %v5948_v32, %v9137_v2 }
 0x37e   :  { %v10122_v38 = vpop.eup %8436  ;;  %v5652_v7 = vcombine.low %v5644_v36, %v5651_v0  ;;  %v5971_v14 = vrot.slane %v5949_v63, %v9137_v2  ;;  %v1617_v41 = vsub.f32 0.0, %v1553_v37  ;;  %v3062_v21 = vrot.slane %v9570_v20, %v9096_v49 }
 0x37f   :  { %v5978_v10 = vrot.slane %v5950_v5, %v9137_v2  ;;  %v5979_v26 = vcombine.low %v5957_v62, %v5964_v12  ;;  %v3066_v16 = vrot.slane %v9570_v20, %v9113_v35  ;;  %v3070_v58 = vrot.slane %v9570_v20, %v9116_v39 }
 0x380   :  { %v8439_v33 = vpop.eup %8438  ;;  %8442 = vrcp.f32 %v1805_v44  ;;  %v1806_v17 = vadd.f32 1.0, %v8435_v27  ;;  %7223 = vperm.xlu1 %8203, %v5652_v7   ;;  %v3074_v55 = vrot.slane %v9570_v20, %v9119_v42  ;;  %v3078_v6 = vrot.slane %v9570_v20, %v9122_v43 }
 0x381   :  { %v5980_v24 = vcombine.low %v5971_v14, %v5978_v10  ;;  %v5987_v54 = vrot.slane %v5979_v26, %v9137_v2  ;;  %v3082_v18 = vrot.slane %v9570_v20, %v9127_v57  ;;  %v3086_v53 = vrot.slane %v9570_v20, %v9130_v60 }
 0x382   :  { %8444 = vpow2.f32 %v1741_v15  ;;  %v3090_v27 = vrot.slane %v9570_v20, %v9133_v61  ;;  %v5702_v45 = vcombine.low %v3062_v21, %v3066_v16  ;;  %v5703_v30 = vcombine.low %v3070_v58, %v3074_v55 }
 0x383   :  { %v1807_v8 = vadd.f32 1.0, %v8439_v33  ;;  %v5994_v36 = vrot.slane %v5980_v24, %v9137_v2  ;;  %v1743_v4 = vmul.f32 1.442695, %v1617_v41  ;;  %v5704_v46 = vcombine.low %v3078_v6, %v3082_v18 }
 0x384   :  { %v10144_v32 = vpop.eup %8440  ;;  %v5705_v44 = vcombine.low %v3086_v53, %v3090_v27  ;;  %v5712_v0 = vrot.slane %v5702_v45, %v9137_v2  ;;  %v5719_v63 = vrot.slane %v5703_v30, %v9137_v2  ;;  %v1554_v37 = vadd.f32 %v9099_v51, %v1481_v1 }
 0x385   :  { %v5995_v15 = vcombine.low %v5987_v54, %v5994_v36  ;;  %v5726_v5 = vrot.slane %v5704_v46, %v9137_v2  ;;  %v3126_v20 = vrot.slane %v9621_v40, %v9096_v49  ;;  %v3130_v62 = vrot.slane %v9621_v40, %v9113_v35 }
 0x386   :  { %v5733_v12 = vrot.slane %v5705_v44, %v9137_v2  ;;  %v5734_v7 = vcombine.low %v5712_v0, %v5719_v63  ;;  %v3134_v14 = vrot.slane %v9621_v40, %v9116_v39  ;;  %v3138_v41 = vrot.slane %v9621_v40, %v9119_v42 }
 0x387   :  { %8446 = vrcp.f32 %v1806_v17  ;;  %7244 = vperm.xlu0 %8202, %v5995_v15   ;;  %v3142_v51 = vrot.slane %v9621_v40, %v9122_v43  ;;  %v3146_v21 = vrot.slane %v9621_v40, %v9127_v57  ;;  %v3150_v10 = vrot.slane %v9621_v40, %v9130_v60 }
 0x388   :  { %8448 = vrcp.f32 %v1807_v8  ;;  %v5735_v26 = vcombine.low %v5726_v5, %v5733_v12  ;;  %v5742_v16 = vrot.slane %v5734_v7, %v9137_v2  ;;  %v3154_v58 = vrot.slane %v9621_v40, %v9133_v61 }
 0x389   :  { %8450 = vpow2.f32 %v1743_v4  ;;  %v5800_v33 = vcombine.low %v3126_v20, %v3130_v62  ;;  %v5801_v17 = vcombine.low %v3134_v14, %v3138_v41  ;;  %v5802_v55 = vcombine.low %v3142_v51, %v3146_v21 }
 0x38a   :  { %v10168_v6 = vpop.eup %8442  ;;  %v5749_v24 = vrot.slane %v5735_v26, %v9137_v2  ;;  %v1618_v54 = vsub.f32 0.0, %v1554_v37  ;;  %v5803_v18 = vcombine.low %v3150_v10, %v3154_v58  ;;  %v3318_v53 = vrot.slane %v9770_v3, %v9096_v49 }
 0x38b   :  { %v5810_v1 = vrot.slane %v5800_v33, %v9137_v2  ;;  %v5817_v27 = vrot.slane %v5801_v17, %v9137_v2  ;;  %v5824_v45 = vrot.slane %v5802_v55, %v9137_v2  ;;  %v3322_v40 = vrot.slane %v9770_v3, %v9113_v35 }
 0x38c   :  { %v8445_v30 = vpop.eup %8444  ;;  %v5750_v8 = vcombine.low %v5742_v16, %v5749_v24  ;;  %v5831_v36 = vrot.slane %v5803_v18, %v9137_v2  ;;  %v3326_v4 = vrot.slane %v9770_v3, %v9116_v39  ;;  %v3330_v46 = vrot.slane %v9770_v3, %v9119_v42 }
 0x38d   :  { %v5832_v44 = vcombine.low %v5810_v1, %v5817_v27  ;;  %v3334_v0 = vrot.slane %v9770_v3, %v9122_v43  ;;  %v3338_v63 = vrot.slane %v9770_v3, %v9127_v57  ;;  %v3342_v37 = vrot.slane %v9770_v3, %v9130_v60 }
 0x38e   :  { %7229 = vperm.xlu1 %8203, %v5750_v8   ;;  %v1745_v15 = vmul.f32 1.442695, %v1618_v54  ;;  %v5833_v5 = vcombine.low %v5824_v45, %v5831_v36  ;;  %v3346_v20 = vrot.slane %v9770_v3, %v9133_v61  ;;  %v6094_v62 = vcombine.low %v3318_v53, %v3322_v40 }
 0x38f   :  { %v1808_v12 = vadd.f32 1.0, %v8445_v30  ;;  %v5840_v7 = vrot.slane %v5832_v44, %v9137_v2  ;;  %v6095_v14 = vcombine.low %v3326_v4, %v3330_v46  ;;  %v6096_v41 = vcombine.low %v3334_v0, %v3338_v63 }
 0x390   :  { %v5847_v51 = vrot.slane %v5833_v5, %v9137_v2  ;;  %v6097_v21 = vcombine.low %v3342_v37, %v3346_v20  ;;  %v6104_v10 = vrot.slane %v6094_v62, %v9137_v2  ;;  %v3190_v26 = vrot.slane %v9672_v59, %v9096_v49 }
 0x391   :  { %v10196_v16 = vpop.eup %8446  ;;  %v6111_v58 = vrot.slane %v6095_v14, %v9137_v2  ;;  %v6118_v3 = vrot.slane %v6096_v41, %v9137_v2  ;;  %v3194_v33 = vrot.slane %v9672_v59, %v9113_v35  ;;  %v3198_v17 = vrot.slane %v9672_v59, %v9116_v39 }
 0x392   :  { %v10204_v55 = vpop.eup %8448  ;;  %v5848_v24 = vcombine.low %v5840_v7, %v5847_v51  ;;  %v6125_v54 = vrot.slane %v6097_v21, %v9137_v2  ;;  %v3202_v18 = vrot.slane %v9672_v59, %v9119_v42  ;;  %v3206_v53 = vrot.slane %v9672_v59, %v9122_v43 }
 0x393   :  { %v10211_v1 = vpop.eup %8450  ;;  %v6126_v27 = vcombine.low %v6104_v10, %v6111_v58  ;;  %v3210_v45 = vrot.slane %v9672_v59, %v9127_v57  ;;  %v3214_v40 = vrot.slane %v9672_v59, %v9130_v60  ;;  %v3218_v30 = vrot.slane %v9672_v59, %v9133_v61 }
 0x394   :  { %8452 = vpow2.f32 %v1745_v15  ;;  %7235 = vperm.xlu1 %8203, %v5848_v24   ;;  %v6127_v8 = vcombine.low %v6118_v3, %v6125_v54  ;;  %v5898_v36 = vcombine.low %v3190_v26, %v3194_v33  ;;  %v5899_v4 = vcombine.low %v3198_v17, %v3202_v18 }
 0x395   :  { %8454 = vrcp.f32 %v1808_v12  ;;  %v6134_v46 = vrot.slane %v6126_v27, %v9137_v2  ;;  %v5900_v44 = vcombine.low %v3206_v53, %v3210_v45  ;;  %v5901_v0 = vcombine.low %v3214_v40, %v3218_v30 }
 0x396   :  { %v6141_v63 = vrot.slane %v6127_v8, %v9137_v2  ;;  %v5908_v37 = vrot.slane %v5898_v36, %v9137_v2  ;;  %v5915_v5 = vrot.slane %v5899_v4, %v9137_v2  ;;  %v3286_v20 = vrot.slane %v9747_v22, %v9096_v49 }
 0x397   :  { %v5922_v59 = vrot.slane %v5900_v44, %v9137_v2  ;;  %v5929_v15 = vrot.slane %v5901_v0, %v9137_v2  ;;  %v3290_v62 = vrot.slane %v9747_v22, %v9113_v35  ;;  %v3294_v12 = vrot.slane %v9747_v22, %v9116_v39 }
 0x398   :  { %v6142_v7 = vcombine.low %v6134_v46, %v6141_v63  ;;  %v5930_v14 = vcombine.low %v5908_v37, %v5915_v5  ;;  %v3298_v41 = vrot.slane %v9747_v22, %v9119_v42  ;;  %v3302_v51 = vrot.slane %v9747_v22, %v9122_v43 }
 0x399   :  { %v5931_v21 = vcombine.low %v5922_v59, %v5929_v15  ;;  %v3306_v10 = vrot.slane %v9747_v22, %v9127_v57  ;;  %v3310_v26 = vrot.slane %v9747_v22, %v9130_v60  ;;  %v3314_v58 = vrot.slane %v9747_v22, %v9133_v61 }
 0x39a   :  { %7253 = vperm.xlu0 %8202, %v6142_v7   ;;  %v5938_v3 = vrot.slane %v5930_v14, %v9137_v2  ;;  %v6045_v33 = vcombine.low %v3286_v20, %v3290_v62  ;;  %v6046_v17 = vcombine.low %v3294_v12, %v3298_v41  ;;  %v3254_v24 = vrot.slane %v9724_v25, %v9096_v49 }
 0x39b   :  { %v5945_v54 = vrot.slane %v5931_v21, %v9137_v2  ;;  %v6047_v18 = vcombine.low %v3302_v51, %v3306_v10  ;;  %v6048_v53 = vcombine.low %v3310_v26, %v3314_v58  ;;  %v3258_v27 = vrot.slane %v9724_v25, %v9113_v35 }
 0x39c   :  { %v6055_v45 = vrot.slane %v6045_v33, %v9137_v2  ;;  %v6062_v40 = vrot.slane %v6046_v17, %v9137_v2  ;;  %v3262_v22 = vrot.slane %v9724_v25, %v9116_v39  ;;  %v3266_v30 = vrot.slane %v9724_v25, %v9119_v42 }
 0x39d   :  { %v5946_v8 = vcombine.low %v5938_v3, %v5945_v54  ;;  %v6069_v36 = vrot.slane %v6047_v18, %v9137_v2  ;;  %v6076_v4 = vrot.slane %v6048_v53, %v9137_v2  ;;  %v3270_v46 = vrot.slane %v9724_v25, %v9122_v43 }
 0x39e   :  { %v10257_v44 = vpop.eup %8452  ;;  %v6077_v0 = vcombine.low %v6055_v45, %v6062_v40  ;;  %v3274_v63 = vrot.slane %v9724_v25, %v9127_v57  ;;  %v3278_v37 = vrot.slane %v9724_v25, %v9130_v60  ;;  %v3282_v5 = vrot.slane %v9724_v25, %v9133_v61 }
 0x39f   :  { %v10265_v20 = vpop.eup %8454  ;;  %7241 = vperm.xlu1 %8203, %v5946_v8   ;;  %v6078_v59 = vcombine.low %v6069_v36, %v6076_v4  ;;  %v5996_v15 = vcombine.low %v3254_v24, %v3258_v27  ;;  %v5997_v62 = vcombine.low %v3262_v22, %v3266_v30  ;;  %v3382_v12 = vrot.slane %v9821_v52, %v9096_v49 }
 0x3a0   :  { %v6085_v7 = vrot.slane %v6077_v0, %v9137_v2  ;;  %v5998_v14 = vcombine.low %v3270_v46, %v3274_v63  ;;  %v5999_v41 = vcombine.low %v3278_v37, %v3282_v5  ;;  %v3386_v51 = vrot.slane %v9821_v52, %v9113_v35 }
 0x3a1   :  { %v6092_v21 = vrot.slane %v6078_v59, %v9137_v2  ;;  %v6006_v25 = vrot.slane %v5996_v15, %v9137_v2  ;;  %v6013_v10 = vrot.slane %v5997_v62, %v9137_v2  ;;  %v3390_v26 = vrot.slane %v9821_v52, %v9116_v39 }
 0x3a2   :  { %v6020_v58 = vrot.slane %v5998_v14, %v9137_v2  ;;  %v6027_v3 = vrot.slane %v5999_v41, %v9137_v2  ;;  %v3394_v33 = vrot.slane %v9821_v52, %v9119_v42  ;;  %v3398_v17 = vrot.slane %v9821_v52, %v9122_v43 }
 0x3a3   :  { %v6093_v24 = vcombine.low %v6085_v7, %v6092_v21  ;;  %v6028_v54 = vcombine.low %v6006_v25, %v6013_v10  ;;  %v3402_v18 = vrot.slane %v9821_v52, %v9127_v57  ;;  %v3406_v53 = vrot.slane %v9821_v52, %v9130_v60 }
 0x3a4   :  { %v6029_v27 = vcombine.low %v6020_v58, %v6027_v3  ;;  %v3410_v45 = vrot.slane %v9821_v52, %v9133_v61  ;;  %v6192_v40 = vcombine.low %v3382_v12, %v3386_v51  ;;  %v6193_v22 = vcombine.low %v3390_v26, %v3394_v33 }
 0x3a5   :  { %7250 = vperm.xlu0 %8202, %v6093_v24   ;;  %v6036_v30 = vrot.slane %v6028_v54, %v9137_v2  ;;  %v6194_v8 = vcombine.low %v3398_v17, %v3402_v18  ;;  %v3510_v36 = vrot.slane %v9924_v31, %v9096_v49  ;;  %v3514_v4 = vrot.slane %v9924_v31, %v9113_v35 }
 0x3a6   :  { %v6043_v46 = vrot.slane %v6029_v27, %v9137_v2  ;;  %v6195_v0 = vcombine.low %v3406_v53, %v3410_v45  ;;  %v6202_v63 = vrot.slane %v6192_v40, %v9137_v2  ;;  %v6209_v37 = vrot.slane %v6193_v22, %v9137_v2 }
 0x3a7   :  { %v6216_v52 = vrot.slane %v6194_v8, %v9137_v2  ;;  %v3518_v5 = vrot.slane %v9924_v31, %v9116_v39  ;;  %v3522_v59 = vrot.slane %v9924_v31, %v9119_v42  ;;  %v3526_v15 = vrot.slane %v9924_v31, %v9122_v43 }
 0x3a8   :  { %v6044_v62 = vcombine.low %v6036_v30, %v6043_v46  ;;  %v6223_v12 = vrot.slane %v6195_v0, %v9137_v2  ;;  %v6224_v7 = vcombine.low %v6202_v63, %v6209_v37  ;;  %v3530_v14 = vrot.slane %v9924_v31, %v9127_v57 }
 0x3a9   :  { %v3534_v41 = vrot.slane %v9924_v31, %v9130_v60  ;;  %v3538_v51 = vrot.slane %v9924_v31, %v9133_v61  ;;  %v6388_v21 = vcombine.low %v3510_v36, %v3514_v4  ;;  %v6389_v25 = vcombine.low %v3518_v5, %v3522_v59 }
 0x3aa   :  { %7247 = vperm.xlu1 %8203, %v6044_v62   ;;  %v6225_v10 = vcombine.low %v6216_v52, %v6223_v12  ;;  %v6232_v26 = vrot.slane %v6224_v7, %v9137_v2  ;;  %v6390_v58 = vcombine.low %v3526_v15, %v3530_v14  ;;  %v3350_v3 = vrot.slane %v9798_v50, %v9096_v49 }
 0x3ab   :  { %v6391_v33 = vcombine.low %v3534_v41, %v3538_v51  ;;  %v6398_v17 = vrot.slane %v6388_v21, %v9137_v2  ;;  %v6405_v24 = vrot.slane %v6389_v25, %v9137_v2  ;;  %v3354_v54 = vrot.slane %v9798_v50, %v9113_v35 }
 0x3ac   :  { %v6239_v31 = vrot.slane %v6225_v10, %v9137_v2  ;;  %v6412_v18 = vrot.slane %v6390_v58, %v9137_v2  ;;  %v3358_v53 = vrot.slane %v9798_v50, %v9116_v39  ;;  %v3362_v27 = vrot.slane %v9798_v50, %v9119_v42 }
 0x3ad   :  { %v6419_v45 = vrot.slane %v6391_v33, %v9137_v2  ;;  %v6420_v40 = vcombine.low %v6398_v17, %v6405_v24  ;;  %v3366_v22 = vrot.slane %v9798_v50, %v9122_v43  ;;  %v3370_v30 = vrot.slane %v9798_v50, %v9127_v57 }
 0x3ae   :  { %v6240_v8 = vcombine.low %v6232_v26, %v6239_v31  ;;  %v3374_v36 = vrot.slane %v9798_v50, %v9130_v60  ;;  %v3378_v4 = vrot.slane %v9798_v50, %v9133_v61  ;;  %v6143_v46 = vcombine.low %v3350_v3, %v3354_v54 }
 0x3af   :  { %v6421_v0 = vcombine.low %v6412_v18, %v6419_v45  ;;  %v6428_v63 = vrot.slane %v6420_v40, %v9137_v2  ;;  %v6144_v37 = vcombine.low %v3358_v53, %v3362_v27  ;;  %v6145_v52 = vcombine.low %v3366_v22, %v3370_v30  ;;  %v10360_v45 = vpop.permute.xlu1 %7127 }
 0x3b0   :  { %7259 = vperm.xlu0 %8202, %v6240_v8   ;;  %v6146_v5 = vcombine.low %v3374_v36, %v3378_v4  ;;  %v6153_v59 = vrot.slane %v6143_v46, %v9137_v2  ;;  %v3574_v15 = vrot.slane %v9970_v56, %v9096_v49  ;;  %v3578_v62 = vrot.slane %v9970_v56, %v9113_v35 }
 0x3b1   :  { %v6435_v12 = vrot.slane %v6421_v0, %v9137_v2  ;;  %v6160_v50 = vrot.slane %v6144_v37, %v9137_v2  ;;  %v6167_v7 = vrot.slane %v6145_v52, %v9137_v2  ;;  %v3582_v14 = vrot.slane %v9970_v56, %v9116_v39 }
 0x3b2   :  { %v6174_v41 = vrot.slane %v6146_v5, %v9137_v2  ;;  %v3586_v51 = vrot.slane %v9970_v56, %v9119_v42  ;;  %v3590_v21 = vrot.slane %v9970_v56, %v9122_v43  ;;  %v3594_v25 = vrot.slane %v9970_v56, %v9127_v57 }
 0x3b3   :  { %v6436_v10 = vcombine.low %v6428_v63, %v6435_v12  ;;  %v6175_v26 = vcombine.low %v6153_v59, %v6160_v50  ;;  %v3598_v58 = vrot.slane %v9970_v56, %v9130_v60  ;;  %v3602_v3 = vrot.slane %v9970_v56, %v9133_v61 }
 0x3b4   :  { %v6176_v33 = vcombine.low %v6167_v7, %v6174_v41  ;;  %v6486_v17 = vcombine.low %v3574_v15, %v3578_v62  ;;  %v6487_v24 = vcombine.low %v3582_v14, %v3586_v51  ;;  %v6488_v54 = vcombine.low %v3590_v21, %v3594_v25 }
 0x3b5   :  { %7271 = vperm.xlu1 %8203, %v6436_v10   ;;  %v6183_v31 = vrot.slane %v6175_v26, %v9137_v2  ;;  %v6489_v18 = vcombine.low %v3598_v58, %v3602_v3  ;;  %v3478_v53 = vrot.slane %v9896_v23, %v9096_v49  ;;  %v3482_v27 = vrot.slane %v9896_v23, %v9113_v35 }
 0x3b6   :  { %v6190_v40 = vrot.slane %v6176_v33, %v9137_v2  ;;  %v6496_v56 = vrot.slane %v6486_v17, %v9137_v2  ;;  %v6503_v22 = vrot.slane %v6487_v24, %v9137_v2  ;;  %v6510_v30 = vrot.slane %v6488_v54, %v9137_v2 }
 0x3b7   :  { %v6517_v8 = vrot.slane %v6489_v18, %v9137_v2  ;;  %v3486_v36 = vrot.slane %v9896_v23, %v9116_v39  ;;  %v3490_v4 = vrot.slane %v9896_v23, %v9119_v42  ;;  %v3494_v46 = vrot.slane %v9896_v23, %v9122_v43 }
 0x3b8   :  { %v6191_v0 = vcombine.low %v6183_v31, %v6190_v40  ;;  %v6518_v63 = vcombine.low %v6496_v56, %v6503_v22  ;;  %v3498_v37 = vrot.slane %v9896_v23, %v9127_v57  ;;  %v3502_v52 = vrot.slane %v9896_v23, %v9130_v60 }
 0x3b9   :  { %v6519_v5 = vcombine.low %v6510_v30, %v6517_v8  ;;  %v3506_v59 = vrot.slane %v9896_v23, %v9133_v61  ;;  %v6339_v15 = vcombine.low %v3478_v53, %v3482_v27  ;;  %v6340_v62 = vcombine.low %v3486_v36, %v3490_v4  ;;  %v10387_v23 = vpop.permute.xlu1 %7124 }
 0x3ba   :  { %7256 = vperm.xlu0 %8202, %v6191_v0   ;;  %v6526_v12 = vrot.slane %v6518_v63, %v9137_v2  ;;  %v6341_v50 = vcombine.low %v3494_v46, %v3498_v37  ;;  %v3638_v7 = vrot.slane %v10021_v9, %v9096_v49  ;;  %v3642_v14 = vrot.slane %v10021_v9, %v9113_v35 }
 0x3bb   :  { %v6533_v41 = vrot.slane %v6519_v5, %v9137_v2  ;;  %v6342_v51 = vcombine.low %v3502_v52, %v3506_v59  ;;  %v6349_v21 = vrot.slane %v6339_v15, %v9137_v2  ;;  %v6356_v25 = vrot.slane %v6340_v62, %v9137_v2 }
 0x3bc   :  { %v6363_v10 = vrot.slane %v6341_v50, %v9137_v2  ;;  %v3646_v26 = vrot.slane %v10021_v9, %v9116_v39  ;;  %v3650_v58 = vrot.slane %v10021_v9, %v9119_v42  ;;  %v3654_v3 = vrot.slane %v10021_v9, %v9122_v43 }
 0x3bd   :  { %v6534_v33 = vcombine.low %v6526_v12, %v6533_v41  ;;  %v6370_v17 = vrot.slane %v6342_v51, %v9137_v2  ;;  %v6371_v24 = vcombine.low %v6349_v21, %v6356_v25  ;;  %v3658_v54 = vrot.slane %v10021_v9, %v9127_v57  ;;  %v10416_v52 = vpop.permute.xlu1 %7133 }
 0x3be   :  { %v3662_v31 = vrot.slane %v10021_v9, %v9130_v60  ;;  %v3666_v18 = vrot.slane %v10021_v9, %v9133_v61  ;;  %v6584_v53 = vcombine.low %v3638_v7, %v3642_v14  ;;  %v6585_v27 = vcombine.low %v3646_v26, %v3650_v58 }
 0x3bf   :  { %7277 = vperm.xlu1 %8203, %v6534_v33   ;;  %v6372_v40 = vcombine.low %v6363_v10, %v6370_v17  ;;  %v6379_v56 = vrot.slane %v6371_v24, %v9137_v2  ;;  %v6586_v22 = vcombine.low %v3654_v3, %v3658_v54  ;;  %v3542_v30 = vrot.slane %v9947_v11, %v9096_v49 }
 0x3c0   :  { %v6587_v8 = vcombine.low %v3662_v31, %v3666_v18  ;;  %v6594_v36 = vrot.slane %v6584_v53, %v9137_v2  ;;  %v6601_v4 = vrot.slane %v6585_v27, %v9137_v2  ;;  %v3546_v46 = vrot.slane %v9947_v11, %v9113_v35 }
 0x3c1   :  { %v6386_v9 = vrot.slane %v6372_v40, %v9137_v2  ;;  %v6608_v0 = vrot.slane %v6586_v22, %v9137_v2  ;;  %v3550_v63 = vrot.slane %v9947_v11, %v9116_v39  ;;  %v3554_v37 = vrot.slane %v9947_v11, %v9119_v42  ;;  %v10445_v27 = vpop.permute.xlu1 %7130 }
 0x3c2   :  { %v6615_v5 = vrot.slane %v6587_v8, %v9137_v2  ;;  %v6616_v59 = vcombine.low %v6594_v36, %v6601_v4  ;;  %v3558_v15 = vrot.slane %v9947_v11, %v9122_v43  ;;  %v3562_v62 = vrot.slane %v9947_v11, %v9127_v57 }
 0x3c3   :  { %v6387_v12 = vcombine.low %v6379_v56, %v6386_v9  ;;  %v3566_v50 = vrot.slane %v9947_v11, %v9130_v60  ;;  %v3570_v7 = vrot.slane %v9947_v11, %v9133_v61  ;;  %v6437_v14 = vcombine.low %v3542_v30, %v3546_v46 }
 0x3c4   :  { %v6617_v41 = vcombine.low %v6608_v0, %v6615_v5  ;;  %v6624_v51 = vrot.slane %v6616_v59, %v9137_v2  ;;  %v6438_v21 = vcombine.low %v3550_v63, %v3554_v37  ;;  %v6439_v25 = vcombine.low %v3558_v15, %v3562_v62 }
 0x3c5   :  { %7268 = vperm.xlu0 %8202, %v6387_v12   ;;  %v6440_v10 = vcombine.low %v3566_v50, %v3570_v7  ;;  %v6447_v26 = vrot.slane %v6437_v14, %v9137_v2  ;;  %v3702_v58 = vrot.slane %v10072_v13, %v9096_v49  ;;  %v3706_v3 = vrot.slane %v10072_v13, %v9113_v35 }
 0x3c6   :  { %v6631_v33 = vrot.slane %v6617_v41, %v9137_v2  ;;  %v6454_v11 = vrot.slane %v6438_v21, %v9137_v2  ;;  %v6461_v17 = vrot.slane %v6439_v25, %v9137_v2  ;;  %v3710_v24 = vrot.slane %v10072_v13, %v9116_v39  ;;  %v10471_v25 = vpop.permute.xlu1 %7139 }
 0x3c7   :  { %v6468_v54 = vrot.slane %v6440_v10, %v9137_v2  ;;  %v3714_v31 = vrot.slane %v10072_v13, %v9119_v42  ;;  %v3718_v18 = vrot.slane %v10072_v13, %v9122_v43  ;;  %v3722_v53 = vrot.slane %v10072_v13, %v9127_v57 }
 0x3c8   :  { %v6632_v40 = vcombine.low %v6624_v51, %v6631_v33  ;;  %v6469_v56 = vcombine.low %v6447_v26, %v6454_v11  ;;  %v3726_v22 = vrot.slane %v10072_v13, %v9130_v60  ;;  %v3730_v30 = vrot.slane %v10072_v13, %v9133_v61 }
 0x3c9   :  { %v6470_v8 = vcombine.low %v6461_v17, %v6468_v54  ;;  %v6682_v36 = vcombine.low %v3702_v58, %v3706_v3  ;;  %v6683_v4 = vcombine.low %v3710_v24, %v3714_v31  ;;  %v6684_v46 = vcombine.low %v3718_v18, %v3722_v53 }
 0x3ca   :  { %7283 = vperm.xlu1 %8203, %v6632_v40   ;;  %v6477_v9 = vrot.slane %v6469_v56, %v9137_v2  ;;  %v6685_v0 = vcombine.low %v3726_v22, %v3730_v30  ;;  %v3606_v63 = vrot.slane %v9998_v28, %v9096_v49  ;;  %v3610_v37 = vrot.slane %v9998_v28, %v9113_v35 }
 0x3cb   :  { %v6484_v5 = vrot.slane %v6470_v8, %v9137_v2  ;;  %v6692_v59 = vrot.slane %v6682_v36, %v9137_v2  ;;  %v6699_v13 = vrot.slane %v6683_v4, %v9137_v2  ;;  %v6706_v15 = vrot.slane %v6684_v46, %v9137_v2 }
 0x3cc   :  { %v6713_v62 = vrot.slane %v6685_v0, %v9137_v2  ;;  %v3614_v12 = vrot.slane %v9998_v28, %v9116_v39  ;;  %v3618_v50 = vrot.slane %v9998_v28, %v9119_v42  ;;  %v3622_v7 = vrot.slane %v9998_v28, %v9122_v43 }
 0x3cd   :  { %v6485_v14 = vcombine.low %v6477_v9, %v6484_v5  ;;  %v6714_v41 = vcombine.low %v6692_v59, %v6699_v13  ;;  %v3626_v51 = vrot.slane %v9998_v28, %v9127_v57  ;;  %v3630_v21 = vrot.slane %v9998_v28, %v9130_v60 }
 0x3ce   :  { %v6715_v10 = vcombine.low %v6706_v15, %v6713_v62  ;;  %v3634_v26 = vrot.slane %v9998_v28, %v9133_v61  ;;  %v6535_v58 = vcombine.low %v3606_v63, %v3610_v37  ;;  %v6536_v3 = vcombine.low %v3614_v12, %v3618_v50  ;;  %v10497_v37 = vpop.permute.xlu1 %7136 }
 0x3cf   :  { %7274 = vperm.xlu0 %8202, %v6485_v14   ;;  %v6722_v33 = vrot.slane %v6714_v41, %v9137_v2  ;;  %v6537_v11 = vcombine.low %v3622_v7, %v3626_v51  ;;  %v3766_v17 = vrot.slane %v10144_v32, %v9096_v49  ;;  %v3770_v24 = vrot.slane %v10144_v32, %v9113_v35 }
 0x3d0   :  { %v6729_v54 = vrot.slane %v6715_v10, %v9137_v2  ;;  %v6538_v31 = vcombine.low %v3630_v21, %v3634_v26  ;;  %v6545_v18 = vrot.slane %v6535_v58, %v9137_v2  ;;  %v6552_v53 = vrot.slane %v6536_v3, %v9137_v2 }
 0x3d1   :  { %v6559_v28 = vrot.slane %v6537_v11, %v9137_v2  ;;  %v3774_v40 = vrot.slane %v10144_v32, %v9116_v39  ;;  %v3778_v56 = vrot.slane %v10144_v32, %v9119_v42  ;;  %v3782_v22 = vrot.slane %v10144_v32, %v9122_v43 }
 0x3d2   :  { %v6730_v30 = vcombine.low %v6722_v33, %v6729_v54  ;;  %v6566_v8 = vrot.slane %v6538_v31, %v9137_v2  ;;  %v6567_v36 = vcombine.low %v6545_v18, %v6552_v53  ;;  %v3786_v4 = vrot.slane %v10144_v32, %v9127_v57  ;;  %v10522_v53 = vpop.permute.xlu1 %7145 }
 0x3d3   :  { %v3790_v46 = vrot.slane %v10144_v32, %v9130_v60  ;;  %v3794_v9 = vrot.slane %v10144_v32, %v9133_v61  ;;  %v6780_v0 = vcombine.low %v3766_v17, %v3770_v24  ;;  %v6781_v63 = vcombine.low %v3774_v40, %v3778_v56 }
 0x3d4   :  { %7289 = vperm.xlu1 %8203, %v6730_v30   ;;  %v6568_v5 = vcombine.low %v6559_v28, %v6566_v8  ;;  %v6575_v59 = vrot.slane %v6567_v36, %v9137_v2  ;;  %v6782_v13 = vcombine.low %v3782_v22, %v3786_v4  ;;  %v3670_v15 = vrot.slane %v10045_v19, %v9096_v49 }
 0x3d5   :  { %v6783_v62 = vcombine.low %v3790_v46, %v3794_v9  ;;  %v6790_v12 = vrot.slane %v6780_v0, %v9137_v2  ;;  %v6797_v50 = vrot.slane %v6781_v63, %v9137_v2  ;;  %v3674_v32 = vrot.slane %v10045_v19, %v9113_v35 }
 0x3d6   :  { %v6582_v7 = vrot.slane %v6568_v5, %v9137_v2  ;;  %v6804_v14 = vrot.slane %v6782_v13, %v9137_v2  ;;  %v3678_v41 = vrot.slane %v10045_v19, %v9116_v39  ;;  %v3682_v51 = vrot.slane %v10045_v19, %v9119_v42 }
 0x3d7   :  { %v6811_v21 = vrot.slane %v6783_v62, %v9137_v2  ;;  %v6812_v10 = vcombine.low %v6790_v12, %v6797_v50  ;;  %v3686_v26 = vrot.slane %v10045_v19, %v9122_v43  ;;  %v3690_v58 = vrot.slane %v10045_v19, %v9127_v57 }
 0x3d8   :  { %v6583_v3 = vcombine.low %v6575_v59, %v6582_v7  ;;  %v3694_v33 = vrot.slane %v10045_v19, %v9130_v60  ;;  %v3698_v11 = vrot.slane %v10045_v19, %v9133_v61  ;;  %v6633_v17 = vcombine.low %v3670_v15, %v3674_v32 }
 0x3d9   :  { %v6813_v24 = vcombine.low %v6804_v14, %v6811_v21  ;;  %v6820_v54 = vrot.slane %v6812_v10, %v9137_v2  ;;  %v6634_v31 = vcombine.low %v3678_v41, %v3682_v51  ;;  %v6635_v18 = vcombine.low %v3686_v26, %v3690_v58  ;;  %v10550_v51 = vpop.permute.xlu1 %7142 }
 0x3da   :  { %7280 = vperm.xlu0 %8202, %v6583_v3   ;;  %v6636_v28 = vcombine.low %v3694_v33, %v3698_v11  ;;  %v6643_v40 = vrot.slane %v6633_v17, %v9137_v2  ;;  %v3830_v56 = vrot.slane %v10196_v16, %v9096_v49  ;;  %v3834_v22 = vrot.slane %v10196_v16, %v9113_v35 }
 0x3db   :  { %v6827_v19 = vrot.slane %v6813_v24, %v9137_v2  ;;  %v6650_v30 = vrot.slane %v6634_v31, %v9137_v2  ;;  %v6657_v8 = vrot.slane %v6635_v18, %v9137_v2  ;;  %v3838_v36 = vrot.slane %v10196_v16, %v9116_v39 }
 0x3dc   :  { %v6664_v4 = vrot.slane %v6636_v28, %v9137_v2  ;;  %v3842_v46 = vrot.slane %v10196_v16, %v9119_v42  ;;  %v3846_v9 = vrot.slane %v10196_v16, %v9122_v43  ;;  %v3850_v0 = vrot.slane %v10196_v16, %v9127_v57 }
 0x3dd   :  { %v6828_v63 = vcombine.low %v6820_v54, %v6827_v19  ;;  %v6665_v5 = vcombine.low %v6643_v40, %v6650_v30  ;;  %v3854_v59 = vrot.slane %v10196_v16, %v9130_v60  ;;  %v3858_v13 = vrot.slane %v10196_v16, %v9133_v61 }
 0x3de   :  { %v6666_v15 = vcombine.low %v6657_v8, %v6664_v4  ;;  %v6878_v62 = vcombine.low %v3830_v56, %v3834_v22  ;;  %v6879_v12 = vcombine.low %v3838_v36, %v3842_v46  ;;  %v6880_v50 = vcombine.low %v3846_v9, %v3850_v0 }
 0x3df   :  { %7295 = vperm.xlu1 %8203, %v6828_v63   ;;  %v6673_v32 = vrot.slane %v6665_v5, %v9137_v2  ;;  %v6881_v7 = vcombine.low %v3854_v59, %v3858_v13  ;;  %v3734_v14 = vrot.slane %v10122_v38, %v9096_v49  ;;  %v3738_v41 = vrot.slane %v10122_v38, %v9113_v35  ;;  %v10586_v13 = vpop.permute.xlu0 %7148 }
 0x3e0   :  { %v6680_v21 = vrot.slane %v6666_v15, %v9137_v2  ;;  %v6888_v16 = vrot.slane %v6878_v62, %v9137_v2  ;;  %v6895_v10 = vrot.slane %v6879_v12, %v9137_v2  ;;  %v6902_v26 = vrot.slane %v6880_v50, %v9137_v2 }
 0x3e1   :  { %v6909_v58 = vrot.slane %v6881_v7, %v9137_v2  ;;  %v3742_v3 = vrot.slane %v10122_v38, %v9116_v39  ;;  %v3746_v33 = vrot.slane %v10122_v38, %v9119_v42  ;;  %v3750_v11 = vrot.slane %v10122_v38, %v9122_v43 }
 0x3e2   :  { %v6681_v17 = vcombine.low %v6673_v32, %v6680_v21  ;;  %v6910_v24 = vcombine.low %v6888_v16, %v6895_v10  ;;  %v3754_v54 = vrot.slane %v10122_v38, %v9127_v57  ;;  %v3758_v31 = vrot.slane %v10122_v38, %v9130_v60 }
 0x3e3   :  { %v6911_v18 = vcombine.low %v6902_v26, %v6909_v58  ;;  %v3762_v28 = vrot.slane %v10122_v38, %v9133_v61  ;;  %v6731_v40 = vcombine.low %v3734_v14, %v3738_v41  ;;  %v6732_v56 = vcombine.low %v3742_v3, %v3746_v33  ;;  %v10577_v38 = vpop.permute.xlu1 %7151 }
 0x3e4   :  { %7286 = vperm.xlu0 %8202, %v6681_v17   ;;  %v6918_v22 = vrot.slane %v6910_v24, %v9137_v2  ;;  %v6733_v19 = vcombine.low %v3750_v11, %v3754_v54  ;;  %v3414_v30 = vrot.slane %v9845_v34, %v9096_v49  ;;  %v3418_v8 = vrot.slane %v9845_v34, %v9113_v35 }
 0x3e5   :  { %v6925_v36 = vrot.slane %v6911_v18, %v9137_v2  ;;  %v6734_v4 = vcombine.low %v3758_v31, %v3762_v28  ;;  %v6741_v46 = vrot.slane %v6731_v40, %v9137_v2  ;;  %v6748_v9 = vrot.slane %v6732_v56, %v9137_v2 }
 0x3e6   :  { %v6755_v0 = vrot.slane %v6733_v19, %v9137_v2  ;;  %v3422_v63 = vrot.slane %v9845_v34, %v9116_v39  ;;  %v3426_v5 = vrot.slane %v9845_v34, %v9119_v42  ;;  %v3430_v59 = vrot.slane %v9845_v34, %v9122_v43 }
 0x3e7   :  { %v6926_v15 = vcombine.low %v6918_v22, %v6925_v36  ;;  %v6762_v62 = vrot.slane %v6734_v4, %v9137_v2  ;;  %v6763_v12 = vcombine.low %v6741_v46, %v6748_v9  ;;  %v3434_v50 = vrot.slane %v9845_v34, %v9127_v57  ;;  %v10608_v31 = vpop.permute.xlu1 %7157  ;;  %v10615_v22 = vpop.permute.xlu0 %7154 }
 0x3e8   :  { %v3438_v32 = vrot.slane %v9845_v34, %v9130_v60  ;;  %v3442_v7 = vrot.slane %v9845_v34, %v9133_v61  ;;  %v6241_v14 = vcombine.low %v3414_v30, %v3418_v8  ;;  %v6242_v41 = vcombine.low %v3422_v63, %v3426_v5 }
 0x3e9   :  { %7301 = vperm.xlu1 %8203, %v6926_v15   ;;  %v6764_v21 = vcombine.low %v6755_v0, %v6762_v62  ;;  %v6771_v16 = vrot.slane %v6763_v12, %v9137_v2  ;;  %v6243_v10 = vcombine.low %v3430_v59, %v3434_v50  ;;  %v3798_v26 = vrot.slane %v10168_v6, %v9096_v49 }
 0x3ea   :  { %v6244_v58 = vcombine.low %v3438_v32, %v3442_v7  ;;  %v6251_v3 = vrot.slane %v6241_v14, %v9137_v2  ;;  %v6258_v33 = vrot.slane %v6242_v41, %v9137_v2  ;;  %v3802_v11 = vrot.slane %v10168_v6, %v9113_v35 }
 0x3eb   :  { %v6778_v34 = vrot.slane %v6764_v21, %v9137_v2  ;;  %v6265_v17 = vrot.slane %v6243_v10, %v9137_v2  ;;  %v3806_v24 = vrot.slane %v10168_v6, %v9116_v39  ;;  %v3810_v54 = vrot.slane %v10168_v6, %v9119_v42  ;;  %v10636_v14 = vpop.permute.xlu1 %7163 }
 0x3ec   :  { %v6272_v18 = vrot.slane %v6244_v58, %v9137_v2  ;;  %v6273_v28 = vcombine.low %v6251_v3, %v6258_v33  ;;  %v3814_v40 = vrot.slane %v10168_v6, %v9122_v43  ;;  %v3818_v56 = vrot.slane %v10168_v6, %v9127_v57 }
 0x3ed   :  { %v6779_v19 = vcombine.low %v6771_v16, %v6778_v34  ;;  %v3822_v30 = vrot.slane %v10168_v6, %v9130_v60  ;;  %v3826_v8 = vrot.slane %v10168_v6, %v9133_v61  ;;  %v6829_v36 = vcombine.low %v3798_v26, %v3802_v11  ;;  %v10642_v26 = vpop.permute.xlu0 %7160 }
 0x3ee   :  { %v6274_v4 = vcombine.low %v6265_v17, %v6272_v18  ;;  %v6281_v46 = vrot.slane %v6273_v28, %v9137_v2  ;;  %v6830_v9 = vcombine.low %v3806_v24, %v3810_v54  ;;  %v6831_v0 = vcombine.low %v3814_v40, %v3818_v56 }
 0x3ef   :  { %v1809_v63 = vadd.f32 1.0, %v10211_v1  ;;  %7292 = vperm.xlu0 %8202, %v6779_v19   ;;  %v6832_v5 = vcombine.low %v3822_v30, %v3826_v8  ;;  %v6839_v59 = vrot.slane %v6829_v36, %v9137_v2  ;;  %v3446_v15 = vrot.slane %v9872_v29, %v9096_v49 }
 0x3f0   :  { %v6288_v62 = vrot.slane %v6274_v4, %v9137_v2  ;;  %v6846_v12 = vrot.slane %v6830_v9, %v9137_v2  ;;  %v6853_v6 = vrot.slane %v6831_v0, %v9137_v2  ;;  %v3450_v50 = vrot.slane %v9872_v29, %v9113_v35 }
 0x3f1   :  { %v6860_v32 = vrot.slane %v6832_v5, %v9137_v2  ;;  %v3454_v1 = vrot.slane %v9872_v29, %v9116_v39  ;;  %v3458_v7 = vrot.slane %v9872_v29, %v9119_v42  ;;  %v3462_v16 = vrot.slane %v9872_v29, %v9122_v43 }
 0x3f2   :  { %v6289_v41 = vcombine.low %v6281_v46, %v6288_v62  ;;  %v6861_v21 = vcombine.low %v6839_v59, %v6846_v12  ;;  %v3466_v10 = vrot.slane %v9872_v29, %v9127_v57  ;;  %8456 = vrcp.f32 %v1809_v63  ;;  %v10663_v46 = vpop.permute.xlu1 %7169  ;;  %v10671_v59 = vpop.permute.xlu0 %7166 }
 0x3f3   :  { %v6862_v58 = vcombine.low %v6853_v6, %v6860_v32  ;;  %v3470_v3 = vrot.slane %v9872_v29, %v9130_v60  ;;  %v3474_v33 = vrot.slane %v9872_v29, %v9133_v61  ;;  %v6290_v34 = vcombine.low %v3446_v15, %v3450_v50 }
 0x3f4   :  { %7262 = vperm.xlu0 %8202, %v6289_v41   ;;  %v6869_v11 = vrot.slane %v6861_v21, %v9137_v2  ;;  %v6291_v17 = vcombine.low %v3454_v1, %v3458_v7  ;;  %v6292_v24 = vcombine.low %v3462_v16, %v3466_v10  ;;  %v1810_v54 = vadd.f32 1.0, %v10257_v44 }
 0x3f5   :  { %v6876_v18 = vrot.slane %v6862_v58, %v9137_v2  ;;  %v6293_v28 = vcombine.low %v3470_v3, %v3474_v33  ;;  %v3894_v40 = vrot.slane %v10265_v20, %v9096_v49  ;;  %v6300_v56 = vrot.slane %v6290_v34, %v9137_v2 }
 0x3f6   :  { %v6307_v19 = vrot.slane %v6291_v17, %v9137_v2  ;;  %v6314_v29 = vrot.slane %v6292_v24, %v9137_v2  ;;  %v3898_v30 = vrot.slane %v10265_v20, %v9113_v35  ;;  %v3902_v44 = vrot.slane %v10265_v20, %v9116_v39  ;;  %v10687_v17 = vpop.permute.xlu1 %7175 }
 0x3f7   :  { %v6877_v8 = vcombine.low %v6869_v11, %v6876_v18  ;;  %v6321_v36 = vrot.slane %v6293_v28, %v9137_v2  ;;  %v3906_v4 = vrot.slane %v10265_v20, %v9119_v42  ;;  %v3910_v0 = vrot.slane %v10265_v20, %v9122_v43  ;;  %v10695_v28 = vpop.permute.xlu0 %7172 }
 0x3f8   :  { %v6322_v9 = vcombine.low %v6300_v56, %v6307_v19  ;;  %v3914_v63 = vrot.slane %v10265_v20, %v9127_v57  ;;  %v3918_v5 = vrot.slane %v10265_v20, %v9130_v60  ;;  %v3922_v62 = vrot.slane %v10265_v20, %v9133_v61 }
 0x3f9   :  { %7298 = vperm.xlu1 %8203, %v6877_v8   ;;  %v6323_v15 = vcombine.low %v6314_v29, %v6321_v36  ;;  %v6976_v12 = vcombine.low %v3894_v40, %v3898_v30  ;;  %v6977_v6 = vcombine.low %v3902_v44, %v3906_v4  ;;  %8458 = vrcp.f32 %v1810_v54 }
 0x3fa   :  { %v6330_v50 = vrot.slane %v6322_v9, %v9137_v2  ;;  %v6978_v32 = vcombine.low %v3910_v0, %v3914_v63  ;;  %v6979_v7 = vcombine.low %v3918_v5, %v3922_v62  ;;  %v3862_v10 = vrot.slane %v10204_v55, %v9096_v49 }
 0x3fb   :  { %v6337_v1 = vrot.slane %v6323_v15, %v9137_v2  ;;  %v6986_v41 = vrot.slane %v6976_v12, %v9137_v2  ;;  %v6993_v21 = vrot.slane %v6977_v6, %v9137_v2  ;;  %v3866_v20 = vrot.slane %v10204_v55, %v9113_v35 }
 0x3fc   :  { %v7000_v16 = vrot.slane %v6978_v32, %v9137_v2  ;;  %v8457_v58 = vpop.eup %8456  ;;  %v7007_v33 = vrot.slane %v6979_v7, %v9137_v2  ;;  %v3870_v34 = vrot.slane %v10204_v55, %v9116_v39  ;;  %v3874_v24 = vrot.slane %v10204_v55, %v9119_v42 }
 0x3fd   :  { %v6338_v3 = vcombine.low %v6330_v50, %v6337_v1  ;;  %v7008_v11 = vcombine.low %v6986_v41, %v6993_v21  ;;  %v3878_v54 = vrot.slane %v10204_v55, %v9122_v43  ;;  %v3882_v18 = vrot.slane %v10204_v55, %v9127_v57  ;;  %v10711_v50 = vpop.permute.xlu1 %7181  ;;  %v10715_v21 = vpop.permute.xlu0 %7178 }
 0x3fe   :  { %v7009_v40 = vcombine.low %v7000_v16, %v7007_v33  ;;  %v3886_v19 = vrot.slane %v10204_v55, %v9130_v60  ;;  %v3890_v29 = vrot.slane %v10204_v55, %v9133_v61  ;;  %v6927_v30 = vcombine.low %v3862_v10, %v3866_v20 }
 0x3ff   :  { %7265 = vperm.xlu0 %8202, %v6338_v3   ;;  %v7016_v56 = vrot.slane %v7008_v11, %v9137_v2  ;;  %v6928_v8 = vcombine.low %v3870_v34, %v3874_v24  ;;  %v6929_v36 = vcombine.low %v3878_v54, %v3882_v18  ;;  %v3926_v9 = vrot.slane %v8457_v58, %v9096_v49 }
 0x400   :  { %v7023_v44 = vrot.slane %v7009_v40, %v9137_v2  ;;  %v6930_v4 = vcombine.low %v3886_v19, %v3890_v29  ;;  %v3930_v0 = vrot.slane %v8457_v58, %v9113_v35  ;;  %v6937_v63 = vrot.slane %v6927_v30, %v9137_v2 }
 0x401   :  { %v6944_v5 = vrot.slane %v6928_v8, %v9137_v2  ;;  %v6951_v15 = vrot.slane %v6929_v36, %v9137_v2  ;;  %v3934_v55 = vrot.slane %v8457_v58, %v9116_v39  ;;  %v3938_v6 = vrot.slane %v8457_v58, %v9119_v42  ;;  %v10728_v36 = vpop.permute.xlu1 %7187 }
 0x402   :  { %v7024_v62 = vcombine.low %v7016_v56, %v7023_v44  ;;  %v6958_v12 = vrot.slane %v6930_v4, %v9137_v2  ;;  %v3942_v7 = vrot.slane %v8457_v58, %v9122_v43  ;;  %v3946_v41 = vrot.slane %v8457_v58, %v9127_v57 }
 0x403   :  { %v8459_v32 = vpop.eup %8458  ;;  %v6959_v1 = vcombine.low %v6937_v63, %v6944_v5  ;;  %v3950_v10 = vrot.slane %v8457_v58, %v9130_v60  ;;  %v3954_v20 = vrot.slane %v8457_v58, %v9133_v61  ;;  %v7025_v3 = vcombine.low %v3926_v9, %v3930_v0  ;;  %v10732_v0 = vpop.permute.xlu0 %7184 }
 0x404   :  { %7307 = vperm.xlu1 %8203, %v7024_v62   ;;  %v6960_v16 = vcombine.low %v6951_v15, %v6958_v12  ;;  %v7026_v11 = vcombine.low %v3934_v55, %v3938_v6  ;;  %v7027_v34 = vcombine.low %v3942_v7, %v3946_v41  ;;  %v3958_v19 = vrot.slane %v8459_v32, %v9096_v49 }
 0x405   :  { %v6967_v33 = vrot.slane %v6959_v1, %v9137_v2  ;;  %v7028_v54 = vcombine.low %v3950_v10, %v3954_v20  ;;  %v7035_v18 = vrot.slane %v7025_v3, %v9137_v2  ;;  %v3962_v58 = vrot.slane %v8459_v32, %v9113_v35 }
 0x406   :  { %v6974_v24 = vrot.slane %v6960_v16, %v9137_v2  ;;  %v7042_v40 = vrot.slane %v7026_v11, %v9137_v2  ;;  %v7049_v56 = vrot.slane %v7027_v34, %v9137_v2  ;;  %v3966_v8 = vrot.slane %v8459_v32, %v9116_v39 }
 0x407   :  { %v7056_v30 = vrot.slane %v7028_v54, %v9137_v2  ;;  %v3970_v4 = vrot.slane %v8459_v32, %v9119_v42  ;;  %v3974_v9 = vrot.slane %v8459_v32, %v9122_v43  ;;  %v3978_v49 = vrot.slane %v8459_v32, %v9127_v57 }
 0x408   :  { %v6975_v29 = vcombine.low %v6967_v33, %v6974_v24  ;;  %v7057_v44 = vcombine.low %v7035_v18, %v7042_v40  ;;  %v3982_v5 = vrot.slane %v8459_v32, %v9130_v60  ;;  %v3986_v15 = vrot.slane %v8459_v32, %v9133_v61  ;;  %v10743_v60 = vpop.permute.xlu1 %7193  ;;  %v10745_v32 = vpop.permute.xlu0 %7190 }
 0x409   :  { %v7058_v63 = vcombine.low %v7049_v56, %v7056_v30  ;;  %v7074_v39 = vcombine.low %v3958_v19, %v3962_v58  ;;  %v7075_v62 = vcombine.low %v3966_v8, %v3970_v4  ;;  %v7076_v55 = vcombine.low %v3974_v9, %v3978_v49 }
 0x40a   :  { %7304 = vperm.xlu1 %8203, %v6975_v29   ;;  %v7065_v35 = vrot.slane %v7057_v44, %v9137_v2  ;;  %v7077_v42 = vcombine.low %v3982_v5, %v3986_v15  ;;  %v7316_v16 = vand.u32 127, %v11006_v47 }
 0x40b   :  { %v7072_v12 = vrot.slane %v7058_v63, %v9137_v2  ;;  %v7084_v43 = vrot.slane %v7074_v39, %v9137_v2  ;;  %v7091_v6 = vrot.slane %v7075_v62, %v9137_v2  ;;  %v7098_v7 = vrot.slane %v7076_v55, %v9137_v2 }
 0x40c   :  { %v7105_v57 = vrot.slane %v7077_v42, %v9137_v2  ;;  %v10750_v33 = vpop.permute.xlu1 %7199  ;;  %v7321_v11 = vadd.s32 4294967288, %v7316_v16  ;;  %v10752_v34 = vpop.permute.xlu0 %7196  ;;  %v7335_v24 = vadd.s32 4294967272, %v7316_v16  ;;  %v7328_v54 = vadd.s32 4294967280, %v7316_v16 }
 0x40d   :  { %v7073_v1 = vcombine.low %v7065_v35, %v7072_v12  ;;  %v7106_v61 = vcombine.low %v7084_v43, %v7091_v6  ;;  %v7349_v18 = vadd.s32 4294967256, %v7316_v16  ;;  %v7370_v40 = vadd.s32 4294967232, %v7316_v16 }
 0x40e   :  { %v7107_v41 = vcombine.low %v7098_v7, %v7105_v57  ;;  %v10755_v56 = vsub.s32 %v7321_v11, %v9093_v48  ;;  %v10758_v19 = vsub.s32 %v7316_v16, %v9093_v48  ;;  %v7342_v29 = vadd.s32 4294967264, %v7316_v16 }
 0x40f   :  { %7310 = vperm.xlu1 %8203, %v7073_v1   ;;  %v7114_v10 = vrot.slane %v7106_v61, %v9137_v2  ;;  %v7384_v30 = vadd.s32 4294967216, %v7316_v16  ;;  %v10763_v8 = vsub.s32 %v7335_v24, %v9093_v48  ;;  %v10766_v44 = vsub.s32 %v7328_v54, %v9093_v48 }
 0x410   :  { %v7121_v20 = vrot.slane %v7107_v41, %v9137_v2  ;;  %v10760_v58 = vpop.permute.xlu1 %7205  ;;  %v7363_v4 = vadd.s32 4294967240, %v7316_v16  ;;  %v7203_v9 = vpop.permute.xlu0 %7202  ;;  %v10769_v63 = vsub.s32 %v7349_v18, %v9093_v48  ;;  %v10772_v49 = vsub.s32 %v7370_v40, %v9093_v48 }
 0x411   :  { %v7356_v5 = vadd.s32 4294967248, %v7316_v16  ;;  %v7377_v15 = vadd.s32 4294967224, %v7316_v16  ;;  %v7429_v35 = vrot.slane %v10695_v28, %v10758_v19  ;;  %v7433_v39 = vrot.slane %v10687_v17, %v10755_v56 }
 0x412   :  { %v7122_v3 = vcombine.low %v7114_v10, %v7121_v20  ;;  %v10779_v62 = vsub.s32 %v7342_v29, %v9093_v48  ;;  %v10782_v12 = vsub.s32 %v7384_v30, %v9093_v48  ;;  %v7398_v55 = vadd.s32 4294967200, %v7316_v16 }
 0x413   :  { %v7438_v42 = vrot.slane %v10715_v21, %v10766_v44  ;;  %v10787_v43 = vsub.s32 %v7363_v4, %v9093_v48  ;;  %v7391_v6 = vadd.s32 4294967208, %v7316_v16  ;;  %v7434_v1 = vsel %vm7326_vm2, %v7433_v39, %v7429_v35 }
 0x414   :  { %7313 = vperm.xlu1 %8203, %v7122_v3   ;;  %v7443_v28 = vrot.slane %v10711_v50, %v10763_v8  ;;  %v10793_v17 = vsub.s32 %v7356_v5, %v9093_v48  ;;  %v7448_v7 = vrot.slane %v10732_v0, %v10779_v62  ;;  %v7453_v21 = vrot.slane %v10728_v36, %v10769_v63  ;;  %v7212_v61 = vpop.permute.xlu1 %7211  ;;  %v7209_v3 = vpop.permute.xlu0 %7208 }
 0x415   :  { %v7439_v57 = vsel %vm7333_vm3, %v7438_v42, %v7434_v1  ;;  %v10801_v41 = vsub.s32 %v7377_v15, %v9093_v48  ;;  %v7405_v10 = vadd.s32 4294967192, %v7316_v16  ;;  %v7463_v50 = vrot.slane %v10743_v60, %v10787_v43 }
 0x416   :  { %v7444_v20 = vsel %vm7340_vm4, %v7443_v28, %v7439_v57  ;;  %v7458_v0 = vrot.slane %v10745_v32, %v10793_v17  ;;  %v10810_v36 = vsub.s32 %v7391_v6, %v9093_v48  ;;  %v7419_v24 = vadd.s32 4294967176, %v7316_v16 }
 0x417   :  { %v7449_v11 = vsel %vm7347_vm5, %v7448_v7, %v7444_v20  ;;  %v7473_v18 = vrot.slane %v10750_v33, %v10801_v41  ;;  %v7412_v40 = vadd.s32 4294967184, %v7316_v16  ;;  %v7468_v60 = vrot.slane %v10752_v34, %v10772_v49 }
 0x418   :  { %v7454_v54 = vsel %vm7354_vm6, %v7453_v21, %v7449_v11  ;;  %v10819_v32 = vsub.s32 %v7405_v10, %v9093_v48  ;;  %v7483_v4 = vrot.slane %v10760_v58, %v10810_v36  ;;  %v10825_v5 = vsub.s32 %v7398_v55, %v9093_v48  ;;  %v7218_v34 = vpop.permute.xlu1 %7217  ;;  %v7215_v35 = vpop.permute.xlu0 %7214 }
 0x419   :  { %v7459_v29 = vsel %vm7361_vm7, %v7458_v0, %v7454_v54  ;;  %v7478_v16 = vrot.slane %v7203_v9, %v10782_v12  ;;  %v10830_v15 = vsub.s32 %v7419_v24, %v9093_v48  ;;  %v10835_v58 = vsub.s32 %v7412_v40, %v9093_v48 }
 0x41a   :  { %v7464_v30 = vsel %vm7368_vm8, %v7463_v50, %v7459_v29  ;;  %v7493_v42 = vrot.slane %v7212_v61, %v10819_v32  ;;  %v7488_v55 = vrot.slane %v7209_v3, %v10825_v5 }
 0x41b   :  { %v7469_v33 = vsel %vm7375_vm9, %v7468_v60, %v7464_v30  ;;  %v7503_v1 = vrot.slane %v7218_v34, %v10830_v15  ;;  %v7498_v28 = vrot.slane %v7215_v35, %v10835_v58 }
 0x41c   :  { %v7474_v39 = vsel %vm7382_vm10, %v7473_v18, %v7469_v33  ;;  %v7221_v61 = vpop.permute.xlu0 %7220  ;;  %v7224_v10 = vpop.permute.xlu1 %7223 }
 0x41d   :  { %v7479_v9 = vsel %vm7389_vm11, %v7478_v16, %v7474_v39 }
 0x41e   :  { %v7484_v6 = vsel %vm7396_vm12, %v7483_v4, %v7479_v9  ;;  %v7332_v9 = vrot.slane %v10445_v27, %v10766_v44  ;;  %v7339_v27 = vrot.slane %v10416_v52, %v10763_v8 }
 0x41f   :  { %v7489_v7 = vsel %vm7403_vm13, %v7488_v55, %v7484_v6  ;;  %v7320_v55 = vrot.slane %v10387_v23, %v10758_v19  ;;  %v7325_v6 = vrot.slane %v10360_v45, %v10755_v56  ;;  %v7346_v23 = vrot.slane %v10497_v37, %v10779_v62 }
 0x420   :  { %v7494_v57 = vsel %vm7410_vm14, %v7493_v42, %v7489_v7  ;;  %v7227_v20 = vpop.permute.xlu0 %7226  ;;  %v7230_v3 = vpop.permute.xlu1 %7229  ;;  %v7360_v37 = vrot.slane %v10550_v51, %v10793_v17 }
 0x421   :  { %v7499_v48 = vsel %vm7417_vm15, %v7498_v28, %v7494_v57  ;;  %v7327_v7 = vsel %vm7326_vm2, %v7325_v6, %v7320_v55  ;;  %v7508_v57 = vrot.slane %v7221_v61, %v10758_v19  ;;  %v7522_v45 = vrot.slane %v7230_v3, %v10763_v8 }
 0x422   :  { %v10846_v21 = vsel %vm7424_vm0, %v7503_v1, %v7499_v48  ;;  %v7512_v1 = vrot.slane %v7224_v10, %v10755_v56  ;;  %v7334_v47 = vsel %vm7333_vm3, %v7332_v9, %v7327_v7  ;;  %v7353_v3 = vrot.slane %v10471_v25, %v10769_v63 }
 0x423   :  { %11010 = vst [vmem:[#allocation4_spill] sm:$0xff] %v10846_v21  ;;  %v7517_v21 = vrot.slane %v7227_v20, %v10766_v44  ;;  %v7341_v61 = vsel %vm7340_vm4, %v7339_v27, %v7334_v47  ;;  %v7374_v27 = vrot.slane %v10586_v13, %v10772_v49 }
 0x424   :  { %v7233_v50 = vpop.permute.xlu0 %7232  ;;  %v7236_v0 = vpop.permute.xlu1 %7235  ;;  %v7513_v2 = vsel %vm7326_vm2, %v7512_v1, %v7508_v57  ;;  %v7348_v6 = vsel %vm7347_vm5, %v7346_v23, %v7341_v61 }
 0x425   :  { %v7518_v52 = vsel %vm7333_vm3, %v7517_v21, %v7513_v2  ;;  %v7532_v20 = vrot.slane %v7236_v0, %v10769_v63  ;;  %v7355_v51 = vsel %vm7354_vm6, %v7353_v3, %v7348_v6  ;;  %v7367_v0 = vrot.slane %v10522_v53, %v10787_v43 }
 0x426   :  { %v7362_v21 = vsel %vm7361_vm7, %v7360_v37, %v7355_v51  ;;  %v7416_v51 = vrot.slane %v10671_v59, %v10835_v58 }
 0x428   :  { %v10848_v11 = vpop.permute.xlu0 %7238  ;;  %v10850_v24 = vpop.permute.xlu1 %7241 }
 0x42c   :  { %v10852_v54 = vpop.permute.xlu0 %7244  ;;  %v10854_v18 = vpop.permute.xlu1 %7247 }
 0x430   :  { %v10856_v40 = vpop.permute.xlu0 %7253 }
 0x434   :  { %v7272_v60 = vpop.permute.xlu1 %7271  ;;  %v10858_v29 = vpop.permute.xlu0 %7250 }
 0x435   :  { %v7591_v9 = vrot.slane %v7272_v60, %v10755_v56  ;;  %v7527_v56 = vrot.slane %v7233_v50, %v10779_v62  ;;  %v7542_v50 = vrot.slane %v10850_v24, %v10787_v43 }
 0x438   :  { %v10860_v4 = vpop.permute.xlu0 %7259 }
 0x43c   :  { %v10862_v33 = vpop.permute.xlu0 %7256 }
 0x43e   :  { %v7278_v30 = vpop.permute.xlu1 %7277 }
 0x43f   :  { %v7601_v2 = vrot.slane %v7278_v30, %v10763_v8 }
 0x444   :  { %v7269_v35 = vpop.permute.xlu0 %7268 }
 0x445   :  { %v7587_v10 = vrot.slane %v7269_v35, %v10758_v19  ;;  %v7523_v19 = vsel %vm7340_vm4, %v7522_v45, %v7518_v52  ;;  %v7381_v45 = vrot.slane %v10577_v38, %v10801_v41 }
 0x446   :  { %v7528_v25 = vsel %vm7347_vm5, %v7527_v56, %v7523_v19 }
 0x449   :  { %v7284_v16 = vpop.permute.xlu1 %7283 }
 0x44a   :  { %v7611_v23 = vrot.slane %v7284_v16, %v10769_v63  ;;  %v7547_v63 = vrot.slane %v10852_v54, %v10772_v49  ;;  %v7388_v54 = vrot.slane %v10615_v22, %v10782_v12  ;;  %v7409_v22 = vrot.slane %v10636_v14, %v10819_v32 }
 0x44e   :  { %v7275_v42 = vpop.permute.xlu0 %7274 }
 0x44f   :  { %v7596_v55 = vrot.slane %v7275_v42, %v10766_v44  ;;  %v7592_v44 = vsel %vm7326_vm2, %v7591_v9, %v7587_v10  ;;  %v7533_v42 = vsel %vm7354_vm6, %v7532_v20, %v7528_v25  ;;  %v7552_v10 = vrot.slane %v10854_v18, %v10801_v41 }
 0x450   :  { %v7395_v18 = vrot.slane %v10608_v31, %v10810_v36 }
 0x451   :  { %v7597_v60 = vsel %vm7333_vm3, %v7596_v55, %v7592_v44 }
 0x452   :  { %v7602_v7 = vsel %vm7340_vm4, %v7601_v2, %v7597_v60 }
 0x453   :  { %v10864_v34 = vpop.permute.xlu1 %7289 }
 0x454   :  { %v7621_v61 = vrot.slane %v10864_v34, %v10787_v43 }
 0x459   :  { %v7281_v48 = vpop.permute.xlu0 %7280 }
 0x45a   :  { %v7606_v35 = vrot.slane %v7281_v48, %v10779_v62  ;;  %v7537_v62 = vrot.slane %v10848_v11, %v10793_v17  ;;  %v7369_v48 = vsel %vm7368_vm8, %v7367_v0, %v7362_v21 }
 0x45b   :  { %v7376_v55 = vsel %vm7375_vm9, %v7374_v27, %v7369_v48 }
 0x45c   :  { %v7607_v57 = vsel %vm7347_vm5, %v7606_v35, %v7602_v7  ;;  %v7538_v24 = vsel %vm7361_vm7, %v7537_v62, %v7533_v42  ;;  %v7383_v6 = vsel %vm7382_vm10, %v7381_v45, %v7376_v55 }
 0x45d   :  { %v7543_v11 = vsel %vm7368_vm8, %v7542_v50, %v7538_v24  ;;  %v7390_v31 = vsel %vm7389_vm11, %v7388_v54, %v7383_v6 }
 0x45e   :  { %v10866_v39 = vpop.permute.xlu1 %7295  ;;  %v7548_v38 = vsel %vm7375_vm9, %v7547_v63, %v7543_v11  ;;  %v7397_v44 = vsel %vm7396_vm12, %v7395_v18, %v7390_v31  ;;  %v11013_v11 = vlaneseq }
 0x45f   :  { %v7553_v37 = vsel %vm7382_vm10, %v7552_v10, %v7548_v38  ;;  %v7631_v19 = vrot.slane %v10866_v39, %v10801_v41  ;;  %v7567_v41 = vrot.slane %v10862_v33, %v10825_v5  ;;  %v7423_v33 = vrot.slane %v10663_v46, %v10830_v15 }
 0x460   :  { %vm7690_vm1 = vcmp.lt.s32.totalorder %v11013_v11, 512 }
 0x463   :  { %v7287_v47 = vpop.permute.xlu0 %7286 }
 0x464   :  { %v7616_v8 = vrot.slane %v7287_v47, %v10793_v17  ;;  %v7612_v17 = vsel %vm7354_vm6, %v7611_v23, %v7607_v57 }
 0x466   :  { %v7617_v16 = vsel %vm7361_vm7, %v7616_v8, %v7612_v17  ;;  %v11011_v8 = vld [vmem:[#allocation4_spill] sm:$0xff] }
 0x467   :  { %v7622_v52 = vsel %vm7368_vm8, %v7621_v61, %v7617_v16 }
 0x468   :  { %v10875_v28 = vpop.permute.xlu1 %7301 }
 0x469   :  { %v7641_v14 = vrot.slane %v10875_v28, %v10810_v36  ;;  %v7572_v28 = vrot.slane %v10860_v4, %v10819_v32 }
 0x46e   :  { %v7293_v53 = vpop.permute.xlu0 %7292 }
 0x46f   :  { %v7626_v13 = vrot.slane %v7293_v53, %v10772_v49  ;;  %v7557_v49 = vrot.slane %v10858_v29, %v10782_v12  ;;  %v7562_v29 = vrot.slane %v10856_v40, %v10810_v36  ;;  %v11012_v53 = vld [vmem:[#allocation3_spill] sm:$0xff] }
 0x471   :  { %v7627_v43 = vsel %vm7375_vm9, %v7626_v13, %v7622_v52  ;;  %v7558_v20 = vsel %vm7389_vm11, %v7557_v49, %v7553_v37 }
 0x472   :  { %v7632_v47 = vsel %vm7382_vm10, %v7631_v19, %v7627_v43  ;;  %v7563_v60 = vsel %vm7396_vm12, %v7562_v29, %v7558_v20 }
 0x473   :  { %v7263_v3 = vpop.permute.xlu0 %7262 }
 0x474   :  { %v7577_v21 = vrot.slane %v7263_v3, %v10835_v58 }
 0x478   :  { %v7299_v1 = vpop.permute.xlu1 %7298 }
 0x479   :  { %v7636_v34 = vrot.slane %v7299_v1, %v10782_v12  ;;  %v7402_v12 = vrot.slane %v10642_v26, %v10825_v5 }
 0x47b   :  { %v7637_v39 = vsel %vm7389_vm11, %v7636_v34, %v7632_v47  ;;  %v7404_v40 = vsel %vm7403_vm13, %v7402_v12, %v7397_v44 }
 0x47c   :  { %v7411_v26 = vsel %vm7410_vm14, %v7409_v22, %v7404_v40  ;;  %v7642_v2 = vsel %vm7396_vm12, %v7641_v14, %v7637_v39 }
 0x47d   :  { %v7418_v42 = vsel %vm7417_vm15, %v7416_v51, %v7411_v26 }
 0x47e   :  { %v7266_v35 = vpop.permute.xlu0 %7265  ;;  %v7425_v50 = vsel %vm7424_vm0, %v7423_v33, %v7418_v42 }
 0x47f   :  { %v7582_v0 = vrot.slane %v7266_v35, %v10830_v15 }
 0x483   :  { %v7308_v30 = vpop.permute.xlu1 %7307 }
 0x484   :  { %v7651_v59 = vrot.slane %v7308_v30, %v10819_v32 }
 0x489   :  { %v7305_v9 = vpop.permute.xlu1 %7304 }
 0x48a   :  { %v7646_v1 = vrot.slane %v7305_v9, %v10825_v5  ;;  %v7568_v5 = vsel %vm7403_vm13, %v7567_v41, %v7563_v60 }
 0x48b   :  { %v7573_v7 = vsel %vm7410_vm14, %v7572_v28, %v7568_v5 }
 0x48c   :  { %v7647_v25 = vsel %vm7403_vm13, %v7646_v1, %v7642_v2  ;;  %v7578_v48 = vsel %vm7417_vm15, %v7577_v21, %v7573_v7 }
 0x48d   :  { %v7652_v62 = vsel %vm7410_vm14, %v7651_v59, %v7647_v25  ;;  %v7583_v32 = vsel %vm7424_vm0, %v7582_v0, %v7578_v48 }
 0x48e   :  { %v7311_v56 = vpop.permute.xlu1 %7310 }
 0x48f   :  { %v7656_v36 = vrot.slane %v7311_v56, %v10835_v58  ;;  %v7663_v58 = vcombine.low %v7425_v50, %v11011_v8 }
 0x491   :  { %v7657_v4 = vsel %vm7417_vm15, %v7656_v36, %v7652_v62  ;;  %v7671_v27 = vrot.slane %v7663_v58, %v11012_v53 }
 0x493   :  { %v7314_v46 = vpop.permute.xlu1 %7313 }
 0x494   :  { %v7661_v57 = vrot.slane %v7314_v46, %v10830_v15 }
 0x496   :  { %v7662_v30 = vsel %vm7424_vm0, %v7661_v57, %v7657_v4 }
 0x497   :  { %v7664_v23 = vcombine.low %v7583_v32, %v7662_v30 }
 0x499   :  { %v7678_v24 = vrot.slane %v7664_v23, %v11012_v53 }
 0x49b   :  { %v7679_v45 = vcombine.low %v7671_v27, %v7678_v24 }
 0x49d   :  { %v7686_v15 = vrot.slane %v7679_v45, %v11012_v53 }
 0x49f   :  { %7692 = vst.msk [vmem:[%s11005_s7] sm:$0xf] %vm7690_vm1, %v7686_v15 }

</bundles_post_ra>
